<compile_context>
chip_gen: v5e
topology: v5e:2x2
jax: 0.10.0
libtpu: 0.0.40
codegen_flags: <defaults>
</compile_context>

<pallas_src>
from functools import partial

import jax
import jax.numpy as jnp
from jax import lax
from jax.experimental import pallas as pl
from jax.experimental.pallas import tpu as pltpu


def _erf(x):
    # Abramowitz & Stegun 7.1.26 polynomial erf (max abs err ~1.5e-7) so the
    # exact (erf-based) nn.GELU can be evaluated in-kernel with VPU/EUP ops.
    p = 0.3275911
    a1, a2, a3, a4, a5 = (0.254829592, -0.284496736, 1.421413741,
                          -1.453152027, 1.061405429)
    sgn = jnp.where(x >= 0.0, 1.0, -1.0)
    ax = jnp.abs(x)
    t = 1.0 / (1.0 + p * ax)
    poly = ((((a5 * t + a4) * t + a3) * t + a2) * t + a1) * t
    return sgn * (1.0 - poly * jnp.exp(-ax * ax))


def _make_kernel(S, TB, H, use_bf16_nl):
    nl_dtype = jnp.bfloat16 if use_bf16_nl else jnp.float32

    def kernel(x_ref,                              # (S, TB, H) bf16 fused emb
               wih_ref, whh_ref, b_ref,            # LSTM params
               attw_ref,                           # attention vector (1, H)
               dw_ref, db_ref, ow_ref, ob_ref,     # classification head
               onehot_ref,                         # label one-hot (TB, 128)
               loss_ref, logits_ref):              # outputs (TB,128) each
        wih = wih_ref[...]                                   # (H, 4H) bf16
        whh = whh_ref[...]                                   # (H, 4H) bf16
        # Hoist loop-invariant broadcasts (JAX does not CSE broadcast_in_dim).
        bias = jnp.broadcast_to(b_ref[...], (TB, 4 * H))     # (TB, 4H) f32
        attw = jnp.broadcast_to(attw_ref[...], (TB, H))      # (TB, H)  f32

        # ---- LSTM recurrence fused with online-softmax attention over t ----
        def step(t, carry):
            h, c, m, l, acc = carry
            x_t = x_ref[t]                                   # (TB, H) bf16
            gates = (jnp.dot(x_t, wih, preferred_element_type=jnp.float32)
                     + jnp.dot(h.astype(jnp.bfloat16), whh,
                               preferred_element_type=jnp.float32)
                     + bias)                                 # (TB, 4H) f32
            g = gates.astype(nl_dtype)                       # bf16 EUP on v6e/v7x
            i_g = jax.nn.sigmoid(g[:, 0 * H:1 * H]).astype(jnp.float32)
            f_g = jax.nn.sigmoid(g[:, 1 * H:2 * H]).astype(jnp.float32)
            g_g = jnp.tanh(g[:, 2 * H:3 * H]).astype(jnp.float32)
            o_g = jax.nn.sigmoid(g[:, 3 * H:4 * H]).astype(jnp.float32)
            c_new = f_g * c + i_g * g_g
            h_new = o_g * jnp.tanh(c_new.astype(nl_dtype)).astype(jnp.float32)

            # score_t = tanh(h_t) . att_w ; online softmax over the sequence.
            # Lane reduce stays on the XLU (off the MXU/VPU critical path).
            s_t = jnp.sum(jnp.tanh(h_new.astype(nl_dtype)).astype(jnp.float32)
                          * attw, axis=-1, keepdims=True)    # (TB, 1)
            m_new = jnp.maximum(m, s_t)
            alpha = jnp.exp(m - m_new)
            p = jnp.exp(s_t - m_new)
            l_new = alpha * l + p
            acc_new = alpha * acc + p * h_new
            return h_new, c_new, m_new, l_new, acc_new

        h0 = jnp.zeros((TB, H), jnp.float32)
        c0 = jnp.zeros((TB, H), jnp.float32)
        m0 = jnp.full((TB, 1), -1e30, jnp.float32)
        l0 = jnp.zeros((TB, 1), jnp.float32)
        a0 = jnp.zeros((TB, H), jnp.float32)
        _, _, _, l_f, acc_f = lax.fori_loop(0, S, step, (h0, c0, m0, l0, a0))

        ctx = acc_f / l_f                                    # exact denominator
        attn_output = jnp.tanh(ctx)

        # dense -> GELU(exact erf) -> (dropout: eval no-op) -> out_proj.
        # out_proj is padded to 128 lanes so the stores are full-lane vst.
        y = (jnp.dot(attn_output.astype(jnp.bfloat16), dw_ref[...],
                     preferred_element_type=jnp.float32) + db_ref[...])
        y = 0.5 * y * (1.0 + _erf(y * 0.7071067811865476))
        logits_pad = (jnp.dot(y, ow_ref[...],
                              preferred_element_type=jnp.float32)
                      + ob_ref[...])                         # (TB, 128)
        logits_ref[...] = logits_pad

        # Per-example CE over the 2 real classes; padded lanes/rows give 0.
        lane = lax.broadcasted_iota(jnp.int32, (TB, 128), 1)
        valid = lane < 2
        z = jnp.where(valid, logits_pad, -1e30)
        mx = jnp.max(z, axis=-1, keepdims=True)
        z = z - mx
        lse = jnp.log(jnp.sum(jnp.exp(z), axis=-1, keepdims=True))
        logprob = jnp.where(valid, z - lse, 0.0)
        loss_pe = -jnp.sum(onehot_ref[...] * logprob, axis=-1, keepdims=True)
        loss_ref[...] = jnp.broadcast_to(loss_pe, (TB, 128))

    return kernel


def _vmem_estimate(S, tb, H):
    x_tile = S * tb * H * 2                      # bf16 fused-embedding tile
    weights = (2 * H * 4 * H * 2                 # w_ih, w_hh (bf16)
               + H * H * 2                       # dense (bf16)
               + H * 128 * 4                     # padded out projection (f32)
               + (4 * H + 2 * H + 256) * 4)      # biases / att vector
    loop_state = (2 * tb * 4 * H * 4             # gates + hoisted bias bcast
                  + 8 * tb * H * 4)              # h, c, acc, tanh temps, attw
    io = 3 * 2 * tb * 128 * 4                    # onehot + 2 outputs (dbl buf)
    return 2 * x_tile + weights + loop_state + io + (4 << 20)


def _plan(B, S, H):
    kind = jax.devices()[0].device_kind.lower()
    try:
        cap = int(pltpu.get_tpu_info().vmem_capacity_bytes)
    except Exception:
        cap = (64 << 20) if "v7" in kind else (128 << 20)
    budget = (cap * 3) // 4                      # headroom for compiler scratch

    newer = ("v6" in kind) or ("v7" in kind)
    use_bf16_nl = newer                          # bf16 EUP only on v6e / v7x
    max_tb = 256 if newer else 128

    # Batch tile: multiple of 16 (bf16 sublane packing), no wider than the
    # padded batch, largest value that fits the VMEM budget.
    tb = min(max_tb, max(16, -(-B // 16) * 16))
    while tb > 16 and _vmem_estimate(S, tb, H) > budget:
        tb -= 16
    # v7x has 2 TensorCores per chip: prefer >= 2 batch tiles so the
    # "parallel" grid axis can shard across both cores.
    if "v7" in kind and tb >= 32 and -(-B // tb) < 2 and B > tb // 2:
        tb = max(16, (tb // 32) * 16)

    vmem_limit = int(min(budget,
                         max(32 << 20, _vmem_estimate(S, tb, H) + (8 << 20))))
    return tb, use_bf16_nl, vmem_limit


def _weight_spec(shape, single_buffer):
    # Grid-invariant operand: same block for every grid step; ask for a
    # single pipeline buffer when supported (saves ~10 MiB VMEM at H=768).
    index_map = lambda i: (0, 0)
    if single_buffer:
        return pl.BlockSpec(shape, index_map, pipeline_mode=pl.Buffered(1))
    return pl.BlockSpec(shape, index_map)


@partial(jax.jit,
         static_argnames=("tb", "use_bf16_nl", "vmem_limit", "single_buffer"))
def _forward_impl(params, input_ids, labels, polarity_ids, intensity_ids, *,
                  tb, use_bf16_nl, vmem_limit, single_buffer):
    B, S = input_ids.shape
    H = params["word_emb"].shape[1]
    assert H % 128 == 0, "hidden size must be lane-aligned (multiple of 128)"
    TB = tb
    B_pad = -(-B // TB) * TB
    G = B_pad // TB

    # KOSAC embedding fusion (the /100 scales are folded into the tables at
    # init); cast to bf16 *before* pad / reshape / transpose.
    emb = (jnp.take(params["word_emb"], input_ids, axis=0)
           + jnp.take(params["pol_emb"], polarity_ids, axis=0)
           + jnp.take(params["int_emb"], intensity_ids, axis=0)
           ).astype(jnp.bfloat16)                            # (B, S, H)
    # TODO(synk): pretrained transformer backbone (self.emb) replaced by
    # identity on the fused KOSAC embeddings.
    if B_pad != B:
        emb = jnp.pad(emb, ((0, B_pad - B), (0, 0), (0, 0)))
    # (G, S, TB, H): time-major per batch tile; batch on sublanes, H on lanes.
    x = emb.reshape(G, TB, S, H).transpose(0, 2, 1, 3)

    onehot = jax.nn.one_hot(labels, 2, dtype=jnp.float32)    # (B, 2)
    onehot = jnp.pad(onehot, ((0, B_pad - B), (0, 126)))     # lane-dense

    out_w = jnp.pad(params["out_w_t"], ((0, 0), (0, 126)))   # (H, 128)
    out_b = jnp.pad(params["out_b"], ((0, 0), (0, 126)))     # (1, 128)

    kernel = _make_kernel(S, TB, H, use_bf16_nl)

    in_specs = [
        pl.BlockSpec((None, S, TB, H), lambda i: (i, 0, 0, 0)),   # embeddings
        _weight_spec((H, 4 * H), single_buffer),                  # w_ih^T
        _weight_spec((H, 4 * H), single_buffer),                  # w_hh^T
        _weight_spec((1, 4 * H), single_buffer),                  # lstm bias
        _weight_spec((1, H), single_buffer),                      # att_w
        _weight_spec((H, H), single_buffer),                      # dense W^T
        _weight_spec((1, H), single_buffer),                      # dense b
        _weight_spec((H, 128), single_buffer),                    # out W^T (pad)
        _weight_spec((1, 128), single_buffer),                    # out b (pad)
        pl.BlockSpec((TB, 128), lambda i: (i, 0)),                # one-hot
    ]
    out_specs = [
        pl.BlockSpec((TB, 128), lambda i: (i, 0)),                # per-ex CE
        pl.BlockSpec((TB, 128), lambda i: (i, 0)),                # logits (pad)
    ]

    loss_tile, logits_tile = pl.pallas_call(
        kernel,
        out_shape=(jax.ShapeDtypeStruct((B_pad, 128), jnp.float32),
                   jax.ShapeDtypeStruct((B_pad, 128), jnp.float32)),
        grid_spec=pltpu.PrefetchScalarGridSpec(
            num_scalar_prefetch=0,
            grid=(G,),
            in_specs=in_specs,
            out_specs=out_specs),
        compiler_params=pltpu.CompilerParams(
            dimension_semantics=("parallel",),
            vmem_limit_bytes=vmem_limit),
    )(x, params["w_ih_t"], params["w_hh_t"], params["b_lstm"],
      params["att_w"], params["dense_w_t"], params["dense_b"],
      out_w, out_b, onehot)

    loss = jnp.sum(loss_tile[:B, 0]) / B        # CE mean over the real batch
    logits = logits_tile[:B, :2]
    return loss, logits


def kosac_lstm_att_forward(params, input_ids, attention_mask, labels,
                           token_type_ids, polarity_ids, intensity_ids):
    # attention_mask / token_type_ids are only consumed by the (replaced)
    # pretrained backbone and nowhere else in the reference forward.
    del attention_mask, token_type_ids
    B, S = input_ids.shape
    H = params["word_emb"].shape[1]
    tb, use_bf16_nl, vmem_limit = _plan(B, S, H)
    args = (params, input_ids, labels, polarity_ids, intensity_ids)
    common = dict(tb=tb, use_bf16_nl=use_bf16_nl, vmem_limit=vmem_limit)
    try:
        out = _forward_impl(*args, single_buffer=True, **common)
        jax.block_until_ready(out)
        return out
    except Exception:
        # This jax build rejected pl.Buffered(1) single-buffering of the
        # grid-invariant weights; fall back to default double buffering.
        return _forward_impl(*args, single_buffer=False, **common)


def init_params(key, vocab_size, hidden):
    H = hidden
    keys = jax.random.split(key, 11)

    def n(k, shape, scale, dtype=jnp.float32):
        return (jax.random.normal(k, shape, jnp.float32) * scale).astype(dtype)

    s = float(1.0 / (H ** 0.5))
    return {
        "word_emb": n(keys[0], (vocab_size, H), 0.02),   # BERT word embeddings
        # The forward's /100 KOSAC scales are folded into the tables here.
        "pol_emb": n(keys[1], (5, H), 0.02) * 0.01,      # nn.Embedding(5,H)/100
        "int_emb": n(keys[2], (5, H), 0.02) * 0.01,      # nn.Embedding(5,H)/100
        "w_ih_t": n(keys[3], (H, 4 * H), s, jnp.bfloat16),   # lstm.weight_ih^T
        "w_hh_t": n(keys[4], (H, 4 * H), s, jnp.bfloat16),   # lstm.weight_hh^T
        "b_lstm": n(keys[5], (1, 4 * H), 0.01),          # b_ih + b_hh
        "att_w": n(keys[6], (1, H), 1.0),                # torch att_w (1,H,1)
        "dense_w_t": n(keys[7], (H, H), s, jnp.bfloat16),    # dense.weight^T
        "dense_b": n(keys[8], (1, H), 0.01),
        "out_w_t": n(keys[9], (H, 2), s),                # out_proj.weight^T
        "out_b": n(keys[10], (1, 2), 0.01),
    }


if __name__ == "__main__":
    B, S, H, V = 2, 8, 128, 32   # small shapes; module uses H=768 (also works)
    key = jax.random.PRNGKey(0)
    pkey, k1, k2, k3, k4 = jax.random.split(key, 5)
    params = init_params(pkey, V, H)

    input_ids = jax.random.randint(k1, (B, S), 0, V, dtype=jnp.int32)
    polarity_ids = jax.random.randint(k2, (B, S), 0, 5, dtype=jnp.int32)
    intensity_ids = jax.random.randint(k3, (B, S), 0, 5, dtype=jnp.int32)
    labels = jax.random.randint(k4, (B,), 0, 2, dtype=jnp.int32)
    attention_mask = jnp.ones((B, S), dtype=jnp.int32)
    token_type_ids = jnp.zeros((B, S), dtype=jnp.int32)

    loss, logits = kosac_lstm_att_forward(
        params, input_ids, attention_mask, labels,
        token_type_ids, polarity_ids, intensity_ids)
    jax.block_until_ready((loss, logits))
    assert logits.shape == (B, 2) and loss.shape == ()
    assert bool(jnp.isfinite(loss)) and bool(jnp.all(jnp.isfinite(logits)))
    print("KERNEL_OK")
</pallas_src>

<mosaic_0001>
module attributes {stable_mosaic.version = 11 : i64} {
  func.func @kernel(%arg0: i32, %arg1: memref<1x8x16x128xbf16, #tpu.memory_space<vmem>>, %arg2: memref<128x512xbf16, #tpu.memory_space<vmem>>, %arg3: memref<128x512xbf16, #tpu.memory_space<vmem>>, %arg4: memref<1x512xf32, #tpu.memory_space<vmem>>, %arg5: memref<1x128xf32, #tpu.memory_space<vmem>>, %arg6: memref<128x128xbf16, #tpu.memory_space<vmem>>, %arg7: memref<1x128xf32, #tpu.memory_space<vmem>>, %arg8: memref<128x128xf32, #tpu.memory_space<vmem>>, %arg9: memref<1x128xf32, #tpu.memory_space<vmem>>, %arg10: memref<16x128xf32, #tpu.memory_space<vmem>>, %arg11: memref<16x128xf32, #tpu.memory_space<vmem>>, %arg12: memref<16x128xf32, #tpu.memory_space<vmem>>) attributes {dimension_semantics = [#tpu.dimension_semantics<parallel>], iteration_bounds = array<i64: 1>, scalar_prefetch = 0 : i64, scratch_operands = 0 : i64, tpu.core_type = #tpu.core_type<tc>, window_params = [{transform_indices = @transform_0, window_bounds = array<i64: 1, 8, 16, 128>}, {pipeline_mode = #tpu.pipeline_mode<synchronous>, transform_indices = @transform_1, window_bounds = array<i64: 128, 512>}, {pipeline_mode = #tpu.pipeline_mode<synchronous>, transform_indices = @transform_2, window_bounds = array<i64: 128, 512>}, {pipeline_mode = #tpu.pipeline_mode<synchronous>, transform_indices = @transform_3, window_bounds = array<i64: 1, 512>}, {pipeline_mode = #tpu.pipeline_mode<synchronous>, transform_indices = @transform_4, window_bounds = array<i64: 1, 128>}, {pipeline_mode = #tpu.pipeline_mode<synchronous>, transform_indices = @transform_5, window_bounds = array<i64: 128, 128>}, {pipeline_mode = #tpu.pipeline_mode<synchronous>, transform_indices = @transform_6, window_bounds = array<i64: 1, 128>}, {pipeline_mode = #tpu.pipeline_mode<synchronous>, transform_indices = @transform_7, window_bounds = array<i64: 128, 128>}, {pipeline_mode = #tpu.pipeline_mode<synchronous>, transform_indices = @transform_8, window_bounds = array<i64: 1, 128>}, {transform_indices = @transform_9, window_bounds = array<i64: 16, 128>}, {transform_indices = @transform_10, window_bounds = array<i64: 16, 128>}, {transform_indices = @transform_11, window_bounds = array<i64: 16, 128>}]} {
    %c0 = arith.constant 0 : index
    %c0_0 = arith.constant 0 : index
    %0 = vector.load %arg2[%c0, %c0_0] : memref<128x512xbf16, #tpu.memory_space<vmem>>, vector<128x512xbf16>
    %c0_1 = arith.constant 0 : index
    %c0_2 = arith.constant 0 : index
    %1 = vector.load %arg3[%c0_1, %c0_2] : memref<128x512xbf16, #tpu.memory_space<vmem>>, vector<128x512xbf16>
    %c0_3 = arith.constant 0 : index
    %c0_4 = arith.constant 0 : index
    %2 = vector.load %arg4[%c0_3, %c0_4] : memref<1x512xf32, #tpu.memory_space<vmem>>, vector<1x512xf32>
    %3 = vector.shape_cast %2 : vector<1x512xf32> to vector<1x512xf32>
    %4 = vector.broadcast %3 : vector<1x512xf32> to vector<16x512xf32>
    %c0_5 = arith.constant 0 : index
    %c0_6 = arith.constant 0 : index
    %5 = vector.load %arg5[%c0_5, %c0_6] : memref<1x128xf32, #tpu.memory_space<vmem>>, vector<1x128xf32>
    %6 = vector.shape_cast %5 : vector<1x128xf32> to vector<1x128xf32>
    %7 = vector.broadcast %6 : vector<1x128xf32> to vector<16x128xf32>
    %cst = arith.constant 0.000000e+00 : f32
    %8 = vector.broadcast %cst : f32 to vector<16x128xf32>
    %cst_7 = arith.constant 0.000000e+00 : f32
    %9 = vector.broadcast %cst_7 : f32 to vector<16x128xf32>
    %cst_8 = arith.constant -1.000000e+30 : f32
    %10 = vector.broadcast %cst_8 : f32 to vector<16x1xf32>
    %cst_9 = arith.constant 0.000000e+00 : f32
    %11 = vector.broadcast %cst_9 : f32 to vector<16x1xf32>
    %cst_10 = arith.constant 0.000000e+00 : f32
    %12 = vector.broadcast %cst_10 : f32 to vector<16x128xf32>
    %c0_i32 = arith.constant 0 : i32
    %c8_i32 = arith.constant 8 : i32
    %13 = arith.addi %c0_i32, %c8_i32 : i32
    %c1_i32 = arith.constant 1 : i32
    %14:5 = scf.for %arg13 = %c0_i32 to %13 step %c1_i32 iter_args(%arg14 = %8, %arg15 = %9, %arg16 = %10, %arg17 = %11, %arg18 = %12) -> (vector<16x128xf32>, vector<16x128xf32>, vector<16x1xf32>, vector<16x1xf32>, vector<16x128xf32>)  : i32 {
      %c0_50 = arith.constant 0 : index
      %97 = arith.index_cast %arg13 : i32 to index
      %c0_51 = arith.constant 0 : index
      %c0_52 = arith.constant 0 : index
      %98 = vector.load %arg1[%c0_50, %97, %c0_51, %c0_52] : memref<1x8x16x128xbf16, #tpu.memory_space<vmem>>, vector<1x1x16x128xbf16>
      %99 = vector.shape_cast %98 : vector<1x1x16x128xbf16> to vector<16x128xbf16>
      %cst_53 = arith.constant dense<0.000000e+00> : vector<16x512xf32>
      %100 = tpu.matmul %99, %0, %cst_53 {dimension_numbers = #tpu.dot_dimension_numbers<[1], [0], [0], [1], [0, 0, 1, 1], [], []>} : vector<16x128xbf16>, vector<128x512xbf16>, vector<16x512xf32> -> vector<16x512xf32>
      %101 = arith.truncf %arg14 : vector<16x128xf32> to vector<16x128xbf16>
      %cst_54 = arith.constant dense<0.000000e+00> : vector<16x512xf32>
      %102 = tpu.matmul %101, %1, %cst_54 {dimension_numbers = #tpu.dot_dimension_numbers<[1], [0], [0], [1], [0, 0, 1, 1], [], []>} : vector<16x128xbf16>, vector<128x512xbf16>, vector<16x512xf32> -> vector<16x512xf32>
      %103 = arith.addf %100, %102 : vector<16x512xf32>
      %104 = arith.addf %103, %4 : vector<16x512xf32>
      %105 = vector.extract_strided_slice %104 {offsets = [0, 0], sizes = [16, 128], strides = [1, 1]} : vector<16x512xf32> to vector<16x128xf32>
      %106 = arith.negf %105 : vector<16x128xf32>
      %107 = math.exp %106 : vector<16x128xf32>
      %cst_55 = arith.constant 1.000000e+00 : f32
      %108 = vector.broadcast %cst_55 : f32 to vector<16x128xf32>
      %109 = arith.addf %108, %107 : vector<16x128xf32>
      %110 = arith.divf %108, %109 : vector<16x128xf32>
      %111 = vector.extract_strided_slice %104 {offsets = [0, 128], sizes = [16, 128], strides = [1, 1]} : vector<16x512xf32> to vector<16x128xf32>
      %112 = arith.negf %111 : vector<16x128xf32>
      %113 = math.exp %112 : vector<16x128xf32>
      %cst_56 = arith.constant 1.000000e+00 : f32
      %114 = vector.broadcast %cst_56 : f32 to vector<16x128xf32>
      %115 = arith.addf %114, %113 : vector<16x128xf32>
      %116 = arith.divf %114, %115 : vector<16x128xf32>
      %117 = vector.extract_strided_slice %104 {offsets = [0, 256], sizes = [16, 128], strides = [1, 1]} : vector<16x512xf32> to vector<16x128xf32>
      %118 = math.tanh %117 : vector<16x128xf32>
      %119 = vector.extract_strided_slice %104 {offsets = [0, 384], sizes = [16, 128], strides = [1, 1]} : vector<16x512xf32> to vector<16x128xf32>
      %120 = arith.negf %119 : vector<16x128xf32>
      %121 = math.exp %120 : vector<16x128xf32>
      %cst_57 = arith.constant 1.000000e+00 : f32
      %122 = vector.broadcast %cst_57 : f32 to vector<16x128xf32>
      %123 = arith.addf %122, %121 : vector<16x128xf32>
      %124 = arith.divf %122, %123 : vector<16x128xf32>
      %125 = arith.mulf %116, %arg15 : vector<16x128xf32>
      %126 = arith.mulf %110, %118 : vector<16x128xf32>
      %127 = arith.addf %125, %126 : vector<16x128xf32>
      %128 = math.tanh %127 : vector<16x128xf32>
      %129 = arith.mulf %124, %128 : vector<16x128xf32>
      %130 = math.tanh %129 : vector<16x128xf32>
      %131 = arith.mulf %130, %7 : vector<16x128xf32>
      %cst_58 = arith.constant dense<0.000000e+00> : vector<16xf32>
      %132 = vector.multi_reduction <add>, %131, %cst_58 [1] : vector<16x128xf32> to vector<16xf32>
      %133 = vector.shape_cast %132 : vector<16xf32> to vector<16x1xf32>
      %134 = arith.maximumf %arg16, %133 : vector<16x1xf32>
      %135 = arith.subf %arg16, %134 : vector<16x1xf32>
      %136 = math.exp %135 : vector<16x1xf32>
      %137 = arith.subf %133, %134 : vector<16x1xf32>
      %138 = math.exp %137 : vector<16x1xf32>
      %139 = arith.mulf %136, %arg17 : vector<16x1xf32>
      %140 = arith.addf %139, %138 : vector<16x1xf32>
      %141 = vector.broadcast %136 : vector<16x1xf32> to vector<16x128xf32>
      %142 = arith.mulf %141, %arg18 : vector<16x128xf32>
      %143 = vector.broadcast %138 : vector<16x1xf32> to vector<16x128xf32>
      %144 = arith.mulf %143, %129 : vector<16x128xf32>
      %145 = arith.addf %142, %144 : vector<16x128xf32>
      scf.yield %129, %127, %134, %140, %145 : vector<16x128xf32>, vector<16x128xf32>, vector<16x1xf32>, vector<16x1xf32>, vector<16x128xf32>
    }
    %c8_i32_11 = arith.constant 8 : i32
    %15 = vector.broadcast %14#3 : vector<16x1xf32> to vector<16x128xf32>
    %16 = arith.divf %14#4, %15 : vector<16x128xf32>
    %17 = math.tanh %16 : vector<16x128xf32>
    %18 = arith.truncf %17 : vector<16x128xf32> to vector<16x128xbf16>
    %c0_12 = arith.constant 0 : index
    %c0_13 = arith.constant 0 : index
    %19 = vector.load %arg6[%c0_12, %c0_13] : memref<128x128xbf16, #tpu.memory_space<vmem>>, vector<128x128xbf16>
    %cst_14 = arith.constant dense<0.000000e+00> : vector<16x128xf32>
    %20 = tpu.matmul %18, %19, %cst_14 {dimension_numbers = #tpu.dot_dimension_numbers<[1], [0], [0], [1], [0, 0, 1, 1], [], []>} : vector<16x128xbf16>, vector<128x128xbf16>, vector<16x128xf32> -> vector<16x128xf32>
    %c0_15 = arith.constant 0 : index
    %c0_16 = arith.constant 0 : index
    %21 = vector.load %arg7[%c0_15, %c0_16] : memref<1x128xf32, #tpu.memory_space<vmem>>, vector<1x128xf32>
    %22 = vector.broadcast %21 : vector<1x128xf32> to vector<16x128xf32>
    %23 = arith.addf %20, %22 : vector<16x128xf32>
    %cst_17 = arith.constant 5.000000e-01 : f32
    %24 = vector.broadcast %cst_17 : f32 to vector<16x128xf32>
    %25 = arith.mulf %24, %23 : vector<16x128xf32>
    %cst_18 = arith.constant 0.707106769 : f32
    %26 = vector.broadcast %cst_18 : f32 to vector<16x128xf32>
    %27 = arith.mulf %23, %26 : vector<16x128xf32>
    %cst_19 = arith.constant 0.000000e+00 : f32
    %28 = vector.broadcast %cst_19 : f32 to vector<16x128xf32>
    %29 = arith.cmpf oge, %27, %28 : vector<16x128xf32>
    %cst_20 = arith.constant 1.000000e+00 : f32
    %cst_21 = arith.constant -1.000000e+00 : f32
    %30 = vector.broadcast %cst_20 : f32 to vector<16x128xf32>
    %31 = vector.broadcast %cst_21 : f32 to vector<16x128xf32>
    %32 = arith.select %29, %30, %31 : vector<16x128xi1>, vector<16x128xf32>
    %33 = math.absf %27 : vector<16x128xf32>
    %cst_22 = arith.constant 0.327591091 : f32
    %34 = vector.broadcast %cst_22 : f32 to vector<16x128xf32>
    %35 = arith.mulf %34, %33 : vector<16x128xf32>
    %cst_23 = arith.constant 1.000000e+00 : f32
    %36 = vector.broadcast %cst_23 : f32 to vector<16x128xf32>
    %37 = arith.addf %36, %35 : vector<16x128xf32>
    %cst_24 = arith.constant 1.000000e+00 : f32
    %38 = vector.broadcast %cst_24 : f32 to vector<16x128xf32>
    %39 = arith.divf %38, %37 : vector<16x128xf32>
    %cst_25 = arith.constant 1.06140542 : f32
    %40 = vector.broadcast %cst_25 : f32 to vector<16x128xf32>
    %41 = arith.mulf %40, %39 : vector<16x128xf32>
    %cst_26 = arith.constant -1.45315206 : f32
    %42 = vector.broadcast %cst_26 : f32 to vector<16x128xf32>
    %43 = arith.addf %41, %42 : vector<16x128xf32>
    %44 = arith.mulf %43, %39 : vector<16x128xf32>
    %cst_27 = arith.constant 1.42141378 : f32
    %45 = vector.broadcast %cst_27 : f32 to vector<16x128xf32>
    %46 = arith.addf %44, %45 : vector<16x128xf32>
    %47 = arith.mulf %46, %39 : vector<16x128xf32>
    %cst_28 = arith.constant -0.284496725 : f32
    %48 = vector.broadcast %cst_28 : f32 to vector<16x128xf32>
    %49 = arith.addf %47, %48 : vector<16x128xf32>
    %50 = arith.mulf %49, %39 : vector<16x128xf32>
    %cst_29 = arith.constant 0.254829586 : f32
    %51 = vector.broadcast %cst_29 : f32 to vector<16x128xf32>
    %52 = arith.addf %50, %51 : vector<16x128xf32>
    %53 = arith.mulf %52, %39 : vector<16x128xf32>
    %cst_30 = arith.constant 0.000000e+00 : f32
    %54 = vector.broadcast %cst_30 : f32 to vector<16x128xf32>
    %55 = arith.subf %54, %33 : vector<16x128xf32>
    %56 = arith.mulf %55, %33 : vector<16x128xf32>
    %57 = math.exp %56 : vector<16x128xf32>
    %58 = arith.mulf %53, %57 : vector<16x128xf32>
    %cst_31 = arith.constant 1.000000e+00 : f32
    %59 = vector.broadcast %cst_31 : f32 to vector<16x128xf32>
    %60 = arith.subf %59, %58 : vector<16x128xf32>
    %61 = arith.mulf %32, %60 : vector<16x128xf32>
    %cst_32 = arith.constant 1.000000e+00 : f32
    %62 = vector.broadcast %cst_32 : f32 to vector<16x128xf32>
    %63 = arith.addf %62, %61 : vector<16x128xf32>
    %64 = arith.mulf %25, %63 : vector<16x128xf32>
    %c0_33 = arith.constant 0 : index
    %c0_34 = arith.constant 0 : index
    %65 = vector.load %arg8[%c0_33, %c0_34] : memref<128x128xf32, #tpu.memory_space<vmem>>, vector<128x128xf32>
    %cst_35 = arith.constant dense<0.000000e+00> : vector<16x128xf32>
    %66 = tpu.matmul %64, %65, %cst_35 {dimension_numbers = #tpu.dot_dimension_numbers<[1], [0], [0], [1], [0, 0, 1, 1], [], []>} : vector<16x128xf32>, vector<128x128xf32>, vector<16x128xf32> -> vector<16x128xf32>
    %c0_36 = arith.constant 0 : index
    %c0_37 = arith.constant 0 : index
    %67 = vector.load %arg9[%c0_36, %c0_37] : memref<1x128xf32, #tpu.memory_space<vmem>>, vector<1x128xf32>
    %68 = vector.broadcast %67 : vector<1x128xf32> to vector<16x128xf32>
    %69 = arith.addf %66, %68 : vector<16x128xf32>
    %c0_38 = arith.constant 0 : index
    %c0_39 = arith.constant 0 : index
    %70 = vector.load %arg12[%c0_38, %c0_39] : memref<16x128xf32, #tpu.memory_space<vmem>>, vector<16x128xf32>
    tpu.vector_store %arg12[%c0_38, %c0_39], %69 {strides = array<i32>} : memref<16x128xf32, #tpu.memory_space<vmem>>, vector<16x128xf32>,
    %71 = tpu.iota {dimensions = array<i32: 1>} : vector<16x128xi32>
    %c2_i32 = arith.constant 2 : i32
    %72 = vector.broadcast %c2_i32 : i32 to vector<16x128xi32>
    %73 = arith.cmpi slt, %71, %72 : vector<16x128xi32>
    %cst_40 = arith.constant -1.000000e+30 : f32
    %74 = vector.broadcast %cst_40 : f32 to vector<16x128xf32>
    %75 = arith.select %73, %69, %74 : vector<16x128xi1>, vector<16x128xf32>
    %cst_41 = arith.constant dense<0xFF800000> : vector<16xf32>
    %76 = vector.multi_reduction <maximumf>, %75, %cst_41 [1] : vector<16x128xf32> to vector<16xf32>
    %77 = vector.shape_cast %76 : vector<16xf32> to vector<16x1xf32>
    %78 = vector.broadcast %77 : vector<16x1xf32> to vector<16x128xf32>
    %79 = arith.subf %75, %78 : vector<16x128xf32>
    %80 = math.exp %79 : vector<16x128xf32>
    %cst_42 = arith.constant dense<0.000000e+00> : vector<16xf32>
    %81 = vector.multi_reduction <add>, %80, %cst_42 [1] : vector<16x128xf32> to vector<16xf32>
    %82 = vector.shape_cast %81 : vector<16xf32> to vector<16x1xf32>
    %83 = math.log %82 : vector<16x1xf32>
    %84 = vector.broadcast %83 : vector<16x1xf32> to vector<16x128xf32>
    %85 = arith.subf %79, %84 : vector<16x128xf32>
    %cst_43 = arith.constant 0.000000e+00 : f32
    %86 = vector.broadcast %cst_43 : f32 to vector<16x128xf32>
    %87 = arith.select %73, %85, %86 : vector<16x128xi1>, vector<16x128xf32>
    %c0_44 = arith.constant 0 : index
    %c0_45 = arith.constant 0 : index
    %88 = vector.load %arg10[%c0_44, %c0_45] : memref<16x128xf32, #tpu.memory_space<vmem>>, vector<16x128xf32>
    %89 = arith.mulf %88, %87 : vector<16x128xf32>
    %cst_46 = arith.constant dense<0.000000e+00> : vector<16xf32>
    %90 = vector.multi_reduction <add>, %89, %cst_46 [1] : vector<16x128xf32> to vector<16xf32>
    %91 = vector.shape_cast %90 : vector<16xf32> to vector<16x1xf32>
    %cst_47 = arith.constant 0.000000e+00 : f32
    %92 = vector.broadcast %cst_47 : f32 to vector<16x1xf32>
    %93 = arith.subf %92, %91 : vector<16x1xf32>
    %94 = vector.shape_cast %93 : vector<16x1xf32> to vector<16x1xf32>
    %95 = vector.broadcast %94 : vector<16x1xf32> to vector<16x128xf32>
    %c0_48 = arith.constant 0 : index
    %c0_49 = arith.constant 0 : index
    %96 = vector.load %arg11[%c0_48, %c0_49] : memref<16x128xf32, #tpu.memory_space<vmem>>, vector<16x128xf32>
    tpu.vector_store %arg11[%c0_48, %c0_49], %95 {strides = array<i32>} : memref<16x128xf32, #tpu.memory_space<vmem>>, vector<16x128xf32>,
    return
  }
  func.func @transform_0(%arg0: i32) -> (i32, i32, i32, i32) {
    %c0_i32 = arith.constant 0 : i32
    %c0_i32_0 = arith.constant 0 : i32
    %c0_i32_1 = arith.constant 0 : i32
    %c0_i32_2 = arith.constant 0 : i32
    return %arg0, %c0_i32, %c0_i32_0, %c0_i32_1 : i32, i32, i32, i32
  }
  func.func @transform_1(%arg0: i32) -> (i32, i32) {
    %c0_i32 = arith.constant 0 : i32
    %c0_i32_0 = arith.constant 0 : i32
    %c0_i32_1 = arith.constant 0 : i32
    return %c0_i32, %c0_i32_0 : i32, i32
  }
  func.func @transform_2(%arg0: i32) -> (i32, i32) {
    %c0_i32 = arith.constant 0 : i32
    %c0_i32_0 = arith.constant 0 : i32
    %c0_i32_1 = arith.constant 0 : i32
    return %c0_i32, %c0_i32_0 : i32, i32
  }
  func.func @transform_3(%arg0: i32) -> (i32, i32) {
    %c0_i32 = arith.constant 0 : i32
    %c0_i32_0 = arith.constant 0 : i32
    %c0_i32_1 = arith.constant 0 : i32
    return %c0_i32, %c0_i32_0 : i32, i32
  }
  func.func @transform_4(%arg0: i32) -> (i32, i32) {
    %c0_i32 = arith.constant 0 : i32
    %c0_i32_0 = arith.constant 0 : i32
    %c0_i32_1 = arith.constant 0 : i32
    return %c0_i32, %c0_i32_0 : i32, i32
  }
  func.func @transform_5(%arg0: i32) -> (i32, i32) {
    %c0_i32 = arith.constant 0 : i32
    %c0_i32_0 = arith.constant 0 : i32
    %c0_i32_1 = arith.constant 0 : i32
    return %c0_i32, %c0_i32_0 : i32, i32
  }
  func.func @transform_6(%arg0: i32) -> (i32, i32) {
    %c0_i32 = arith.constant 0 : i32
    %c0_i32_0 = arith.constant 0 : i32
    %c0_i32_1 = arith.constant 0 : i32
    return %c0_i32, %c0_i32_0 : i32, i32
  }
  func.func @transform_7(%arg0: i32) -> (i32, i32) {
    %c0_i32 = arith.constant 0 : i32
    %c0_i32_0 = arith.constant 0 : i32
    %c0_i32_1 = arith.constant 0 : i32
    return %c0_i32, %c0_i32_0 : i32, i32
  }
  func.func @transform_8(%arg0: i32) -> (i32, i32) {
    %c0_i32 = arith.constant 0 : i32
    %c0_i32_0 = arith.constant 0 : i32
    %c0_i32_1 = arith.constant 0 : i32
    return %c0_i32, %c0_i32_0 : i32, i32
  }
  func.func @transform_9(%arg0: i32) -> (i32, i32) {
    %c0_i32 = arith.constant 0 : i32
    %c0_i32_0 = arith.constant 0 : i32
    return %arg0, %c0_i32 : i32, i32
  }
  func.func @transform_10(%arg0: i32) -> (i32, i32) {
    %c0_i32 = arith.constant 0 : i32
    %c0_i32_0 = arith.constant 0 : i32
    return %arg0, %c0_i32 : i32, i32
  }
  func.func @transform_11(%arg0: i32) -> (i32, i32) {
    %c0_i32 = arith.constant 0 : i32
    %c0_i32_0 = arith.constant 0 : i32
    return %arg0, %c0_i32 : i32, i32
  }
}

module attributes {stable_mosaic.version = 11 : i64} {
  func.func @kernel(%arg0: i32, %arg1: memref<1x8x16x128xbf16, #tpu.memory_space<vmem>>, %arg2: memref<128x512xbf16, #tpu.memory_space<vmem>>, %arg3: memref<128x512xbf16, #tpu.memory_space<vmem>>, %arg4: memref<1x512xf32, #tpu.memory_space<vmem>>, %arg5: memref<1x128xf32, #tpu.memory_space<vmem>>, %arg6: memref<128x128xbf16, #tpu.memory_space<vmem>>, %arg7: memref<1x128xf32, #tpu.memory_space<vmem>>, %arg8: memref<128x128xf32, #tpu.memory_space<vmem>>, %arg9: memref<1x128xf32, #tpu.memory_space<vmem>>, %arg10: memref<16x128xf32, #tpu.memory_space<vmem>>, %arg11: memref<16x128xf32, #tpu.memory_space<vmem>>, %arg12: memref<16x128xf32, #tpu.memory_space<vmem>>) attributes {dimension_semantics = [#tpu.dimension_semantics<parallel>], iteration_bounds = array<i64: 1>, scalar_prefetch = 0 : i64, scratch_operands = 0 : i64, tpu.core_type = #tpu.core_type<tc>, window_params = [{transform_indices = @transform_0, window_bounds = array<i64: 1, 8, 16, 128>}, {pipeline_mode = #tpu.pipeline_mode<synchronous>, transform_indices = @transform_1, window_bounds = array<i64: 128, 512>}, {pipeline_mode = #tpu.pipeline_mode<synchronous>, transform_indices = @transform_2, window_bounds = array<i64: 128, 512>}, {pipeline_mode = #tpu.pipeline_mode<synchronous>, transform_indices = @transform_3, window_bounds = array<i64: 1, 512>}, {pipeline_mode = #tpu.pipeline_mode<synchronous>, transform_indices = @transform_4, window_bounds = array<i64: 1, 128>}, {pipeline_mode = #tpu.pipeline_mode<synchronous>, transform_indices = @transform_5, window_bounds = array<i64: 128, 128>}, {pipeline_mode = #tpu.pipeline_mode<synchronous>, transform_indices = @transform_6, window_bounds = array<i64: 1, 128>}, {pipeline_mode = #tpu.pipeline_mode<synchronous>, transform_indices = @transform_7, window_bounds = array<i64: 128, 128>}, {pipeline_mode = #tpu.pipeline_mode<synchronous>, transform_indices = @transform_8, window_bounds = array<i64: 1, 128>}, {transform_indices = @transform_9, window_bounds = array<i64: 16, 128>}, {transform_indices = @transform_10, window_bounds = array<i64: 16, 128>}, {transform_indices = @transform_11, window_bounds = array<i64: 16, 128>}]} {
    %c0 = arith.constant 0 : index
    %c0_0 = arith.constant 0 : index
    %0 = vector.load %arg2[%c0, %c0_0] : memref<128x512xbf16, #tpu.memory_space<vmem>>, vector<128x512xbf16>
    %c0_1 = arith.constant 0 : index
    %c0_2 = arith.constant 0 : index
    %1 = vector.load %arg3[%c0_1, %c0_2] : memref<128x512xbf16, #tpu.memory_space<vmem>>, vector<128x512xbf16>
    %c0_3 = arith.constant 0 : index
    %c0_4 = arith.constant 0 : index
    %2 = vector.load %arg4[%c0_3, %c0_4] : memref<1x512xf32, #tpu.memory_space<vmem>>, vector<1x512xf32>
    %3 = vector.shape_cast %2 : vector<1x512xf32> to vector<1x512xf32>
    %4 = vector.broadcast %3 : vector<1x512xf32> to vector<16x512xf32>
    %c0_5 = arith.constant 0 : index
    %c0_6 = arith.constant 0 : index
    %5 = vector.load %arg5[%c0_5, %c0_6] : memref<1x128xf32, #tpu.memory_space<vmem>>, vector<1x128xf32>
    %6 = vector.shape_cast %5 : vector<1x128xf32> to vector<1x128xf32>
    %7 = vector.broadcast %6 : vector<1x128xf32> to vector<16x128xf32>
    %cst = arith.constant 0.000000e+00 : f32
    %8 = vector.broadcast %cst : f32 to vector<16x128xf32>
    %cst_7 = arith.constant 0.000000e+00 : f32
    %9 = vector.broadcast %cst_7 : f32 to vector<16x128xf32>
    %cst_8 = arith.constant -1.000000e+30 : f32
    %10 = vector.broadcast %cst_8 : f32 to vector<16x1xf32>
    %cst_9 = arith.constant 0.000000e+00 : f32
    %11 = vector.broadcast %cst_9 : f32 to vector<16x1xf32>
    %cst_10 = arith.constant 0.000000e+00 : f32
    %12 = vector.broadcast %cst_10 : f32 to vector<16x128xf32>
    %c0_i32 = arith.constant 0 : i32
    %c8_i32 = arith.constant 8 : i32
    %13 = arith.addi %c0_i32, %c8_i32 : i32
    %c1_i32 = arith.constant 1 : i32
    %14:5 = scf.for %arg13 = %c0_i32 to %13 step %c1_i32 iter_args(%arg14 = %8, %arg15 = %9, %arg16 = %10, %arg17 = %11, %arg18 = %12) -> (vector<16x128xf32>, vector<16x128xf32>, vector<16x1xf32>, vector<16x1xf32>, vector<16x128xf32>)  : i32 {
      %c0_50 = arith.constant 0 : index
      %97 = arith.index_cast %arg13 : i32 to index
      %c0_51 = arith.constant 0 : index
      %c0_52 = arith.constant 0 : index
      %98 = vector.load %arg1[%c0_50, %97, %c0_51, %c0_52] : memref<1x8x16x128xbf16, #tpu.memory_space<vmem>>, vector<1x1x16x128xbf16>
      %99 = vector.shape_cast %98 : vector<1x1x16x128xbf16> to vector<16x128xbf16>
      %cst_53 = arith.constant dense<0.000000e+00> : vector<16x512xf32>
      %100 = tpu.matmul %99, %0, %cst_53 {dimension_numbers = #tpu.dot_dimension_numbers<[1], [0], [0], [1], [0, 0, 1, 1], [], []>} : vector<16x128xbf16>, vector<128x512xbf16>, vector<16x512xf32> -> vector<16x512xf32>
      %101 = arith.truncf %arg14 : vector<16x128xf32> to vector<16x128xbf16>
      %cst_54 = arith.constant dense<0.000000e+00> : vector<16x512xf32>
      %102 = tpu.matmul %101, %1, %cst_54 {dimension_numbers = #tpu.dot_dimension_numbers<[1], [0], [0], [1], [0, 0, 1, 1], [], []>} : vector<16x128xbf16>, vector<128x512xbf16>, vector<16x512xf32> -> vector<16x512xf32>
      %103 = arith.addf %100, %102 : vector<16x512xf32>
      %104 = arith.addf %103, %4 : vector<16x512xf32>
      %105 = vector.extract_strided_slice %104 {offsets = [0, 0], sizes = [16, 128], strides = [1, 1]} : vector<16x512xf32> to vector<16x128xf32>
      %106 = arith.negf %105 : vector<16x128xf32>
      %107 = math.exp %106 : vector<16x128xf32>
      %cst_55 = arith.constant 1.000000e+00 : f32
      %108 = vector.broadcast %cst_55 : f32 to vector<16x128xf32>
      %109 = arith.addf %108, %107 : vector<16x128xf32>
      %110 = arith.divf %108, %109 : vector<16x128xf32>
      %111 = vector.extract_strided_slice %104 {offsets = [0, 128], sizes = [16, 128], strides = [1, 1]} : vector<16x512xf32> to vector<16x128xf32>
      %112 = arith.negf %111 : vector<16x128xf32>
      %113 = math.exp %112 : vector<16x128xf32>
      %cst_56 = arith.constant 1.000000e+00 : f32
      %114 = vector.broadcast %cst_56 : f32 to vector<16x128xf32>
      %115 = arith.addf %114, %113 : vector<16x128xf32>
      %116 = arith.divf %114, %115 : vector<16x128xf32>
      %117 = vector.extract_strided_slice %104 {offsets = [0, 256], sizes = [16, 128], strides = [1, 1]} : vector<16x512xf32> to vector<16x128xf32>
      %118 = math.tanh %117 : vector<16x128xf32>
      %119 = vector.extract_strided_slice %104 {offsets = [0, 384], sizes = [16, 128], strides = [1, 1]} : vector<16x512xf32> to vector<16x128xf32>
      %120 = arith.negf %119 : vector<16x128xf32>
      %121 = math.exp %120 : vector<16x128xf32>
      %cst_57 = arith.constant 1.000000e+00 : f32
      %122 = vector.broadcast %cst_57 : f32 to vector<16x128xf32>
      %123 = arith.addf %122, %121 : vector<16x128xf32>
      %124 = arith.divf %122, %123 : vector<16x128xf32>
      %125 = arith.mulf %116, %arg15 : vector<16x128xf32>
      %126 = arith.mulf %110, %118 : vector<16x128xf32>
      %127 = arith.addf %125, %126 : vector<16x128xf32>
      %128 = math.tanh %127 : vector<16x128xf32>
      %129 = arith.mulf %124, %128 : vector<16x128xf32>
      %130 = math.tanh %129 : vector<16x128xf32>
      %131 = arith.mulf %130, %7 : vector<16x128xf32>
      %cst_58 = arith.constant dense<0.000000e+00> : vector<16xf32>
      %132 = vector.multi_reduction <add>, %131, %cst_58 [1] : vector<16x128xf32> to vector<16xf32>
      %133 = vector.shape_cast %132 : vector<16xf32> to vector<16x1xf32>
      %134 = arith.maximumf %arg16, %133 : vector<16x1xf32>
      %135 = arith.subf %arg16, %134 : vector<16x1xf32>
      %136 = math.exp %135 : vector<16x1xf32>
      %137 = arith.subf %133, %134 : vector<16x1xf32>
      %138 = math.exp %137 : vector<16x1xf32>
      %139 = arith.mulf %136, %arg17 : vector<16x1xf32>
      %140 = arith.addf %139, %138 : vector<16x1xf32>
      %141 = vector.broadcast %136 : vector<16x1xf32> to vector<16x128xf32>
      %142 = arith.mulf %141, %arg18 : vector<16x128xf32>
      %143 = vector.broadcast %138 : vector<16x1xf32> to vector<16x128xf32>
      %144 = arith.mulf %143, %129 : vector<16x128xf32>
      %145 = arith.addf %142, %144 : vector<16x128xf32>
      scf.yield %129, %127, %134, %140, %145 : vector<16x128xf32>, vector<16x128xf32>, vector<16x1xf32>, vector<16x1xf32>, vector<16x128xf32>
    }
    %c8_i32_11 = arith.constant 8 : i32
    %15 = vector.broadcast %14#3 : vector<16x1xf32> to vector<16x128xf32>
    %16 = arith.divf %14#4, %15 : vector<16x128xf32>
    %17 = math.tanh %16 : vector<16x128xf32>
    %18 = arith.truncf %17 : vector<16x128xf32> to vector<16x128xbf16>
    %c0_12 = arith.constant 0 : index
    %c0_13 = arith.constant 0 : index
    %19 = vector.load %arg6[%c0_12, %c0_13] : memref<128x128xbf16, #tpu.memory_space<vmem>>, vector<128x128xbf16>
    %cst_14 = arith.constant dense<0.000000e+00> : vector<16x128xf32>
    %20 = tpu.matmul %18, %19, %cst_14 {dimension_numbers = #tpu.dot_dimension_numbers<[1], [0], [0], [1], [0, 0, 1, 1], [], []>} : vector<16x128xbf16>, vector<128x128xbf16>, vector<16x128xf32> -> vector<16x128xf32>
    %c0_15 = arith.constant 0 : index
    %c0_16 = arith.constant 0 : index
    %21 = vector.load %arg7[%c0_15, %c0_16] : memref<1x128xf32, #tpu.memory_space<vmem>>, vector<1x128xf32>
    %22 = vector.broadcast %21 : vector<1x128xf32> to vector<16x128xf32>
    %23 = arith.addf %20, %22 : vector<16x128xf32>
    %cst_17 = arith.constant 5.000000e-01 : f32
    %24 = vector.broadcast %cst_17 : f32 to vector<16x128xf32>
    %25 = arith.mulf %24, %23 : vector<16x128xf32>
    %cst_18 = arith.constant 0.707106769 : f32
    %26 = vector.broadcast %cst_18 : f32 to vector<16x128xf32>
    %27 = arith.mulf %23, %26 : vector<16x128xf32>
    %cst_19 = arith.constant 0.000000e+00 : f32
    %28 = vector.broadcast %cst_19 : f32 to vector<16x128xf32>
    %29 = arith.cmpf oge, %27, %28 : vector<16x128xf32>
    %cst_20 = arith.constant 1.000000e+00 : f32
    %cst_21 = arith.constant -1.000000e+00 : f32
    %30 = vector.broadcast %cst_20 : f32 to vector<16x128xf32>
    %31 = vector.broadcast %cst_21 : f32 to vector<16x128xf32>
    %32 = arith.select %29, %30, %31 : vector<16x128xi1>, vector<16x128xf32>
    %33 = math.absf %27 : vector<16x128xf32>
    %cst_22 = arith.constant 0.327591091 : f32
    %34 = vector.broadcast %cst_22 : f32 to vector<16x128xf32>
    %35 = arith.mulf %34, %33 : vector<16x128xf32>
    %cst_23 = arith.constant 1.000000e+00 : f32
    %36 = vector.broadcast %cst_23 : f32 to vector<16x128xf32>
    %37 = arith.addf %36, %35 : vector<16x128xf32>
    %cst_24 = arith.constant 1.000000e+00 : f32
    %38 = vector.broadcast %cst_24 : f32 to vector<16x128xf32>
    %39 = arith.divf %38, %37 : vector<16x128xf32>
    %cst_25 = arith.constant 1.06140542 : f32
    %40 = vector.broadcast %cst_25 : f32 to vector<16x128xf32>
    %41 = arith.mulf %40, %39 : vector<16x128xf32>
    %cst_26 = arith.constant -1.45315206 : f32
    %42 = vector.broadcast %cst_26 : f32 to vector<16x128xf32>
    %43 = arith.addf %41, %42 : vector<16x128xf32>
    %44 = arith.mulf %43, %39 : vector<16x128xf32>
    %cst_27 = arith.constant 1.42141378 : f32
    %45 = vector.broadcast %cst_27 : f32 to vector<16x128xf32>
    %46 = arith.addf %44, %45 : vector<16x128xf32>
    %47 = arith.mulf %46, %39 : vector<16x128xf32>
    %cst_28 = arith.constant -0.284496725 : f32
    %48 = vector.broadcast %cst_28 : f32 to vector<16x128xf32>
    %49 = arith.addf %47, %48 : vector<16x128xf32>
    %50 = arith.mulf %49, %39 : vector<16x128xf32>
    %cst_29 = arith.constant 0.254829586 : f32
    %51 = vector.broadcast %cst_29 : f32 to vector<16x128xf32>
    %52 = arith.addf %50, %51 : vector<16x128xf32>
    %53 = arith.mulf %52, %39 : vector<16x128xf32>
    %cst_30 = arith.constant 0.000000e+00 : f32
    %54 = vector.broadcast %cst_30 : f32 to vector<16x128xf32>
    %55 = arith.subf %54, %33 : vector<16x128xf32>
    %56 = arith.mulf %55, %33 : vector<16x128xf32>
    %57 = math.exp %56 : vector<16x128xf32>
    %58 = arith.mulf %53, %57 : vector<16x128xf32>
    %cst_31 = arith.constant 1.000000e+00 : f32
    %59 = vector.broadcast %cst_31 : f32 to vector<16x128xf32>
    %60 = arith.subf %59, %58 : vector<16x128xf32>
    %61 = arith.mulf %32, %60 : vector<16x128xf32>
    %cst_32 = arith.constant 1.000000e+00 : f32
    %62 = vector.broadcast %cst_32 : f32 to vector<16x128xf32>
    %63 = arith.addf %62, %61 : vector<16x128xf32>
    %64 = arith.mulf %25, %63 : vector<16x128xf32>
    %c0_33 = arith.constant 0 : index
    %c0_34 = arith.constant 0 : index
    %65 = vector.load %arg8[%c0_33, %c0_34] : memref<128x128xf32, #tpu.memory_space<vmem>>, vector<128x128xf32>
    %cst_35 = arith.constant dense<0.000000e+00> : vector<16x128xf32>
    %66 = tpu.matmul %64, %65, %cst_35 {dimension_numbers = #tpu.dot_dimension_numbers<[1], [0], [0], [1], [0, 0, 1, 1], [], []>} : vector<16x128xf32>, vector<128x128xf32>, vector<16x128xf32> -> vector<16x128xf32>
    %c0_36 = arith.constant 0 : index
    %c0_37 = arith.constant 0 : index
    %67 = vector.load %arg9[%c0_36, %c0_37] : memref<1x128xf32, #tpu.memory_space<vmem>>, vector<1x128xf32>
    %68 = vector.broadcast %67 : vector<1x128xf32> to vector<16x128xf32>
    %69 = arith.addf %66, %68 : vector<16x128xf32>
    %c0_38 = arith.constant 0 : index
    %c0_39 = arith.constant 0 : index
    %70 = vector.load %arg12[%c0_38, %c0_39] : memref<16x128xf32, #tpu.memory_space<vmem>>, vector<16x128xf32>
    tpu.vector_store %arg12[%c0_38, %c0_39], %69 {strides = array<i32>} : memref<16x128xf32, #tpu.memory_space<vmem>>, vector<16x128xf32>,
    %71 = tpu.iota {dimensions = array<i32: 1>} : vector<16x128xi32>
    %c2_i32 = arith.constant 2 : i32
    %72 = vector.broadcast %c2_i32 : i32 to vector<16x128xi32>
    %73 = arith.cmpi slt, %71, %72 : vector<16x128xi32>
    %cst_40 = arith.constant -1.000000e+30 : f32
    %74 = vector.broadcast %cst_40 : f32 to vector<16x128xf32>
    %75 = arith.select %73, %69, %74 : vector<16x128xi1>, vector<16x128xf32>
    %cst_41 = arith.constant dense<0xFF800000> : vector<16xf32>
    %76 = vector.multi_reduction <maximumf>, %75, %cst_41 [1] : vector<16x128xf32> to vector<16xf32>
    %77 = vector.shape_cast %76 : vector<16xf32> to vector<16x1xf32>
    %78 = vector.broadcast %77 : vector<16x1xf32> to vector<16x128xf32>
    %79 = arith.subf %75, %78 : vector<16x128xf32>
    %80 = math.exp %79 : vector<16x128xf32>
    %cst_42 = arith.constant dense<0.000000e+00> : vector<16xf32>
    %81 = vector.multi_reduction <add>, %80, %cst_42 [1] : vector<16x128xf32> to vector<16xf32>
    %82 = vector.shape_cast %81 : vector<16xf32> to vector<16x1xf32>
    %83 = math.log %82 : vector<16x1xf32>
    %84 = vector.broadcast %83 : vector<16x1xf32> to vector<16x128xf32>
    %85 = arith.subf %79, %84 : vector<16x128xf32>
    %cst_43 = arith.constant 0.000000e+00 : f32
    %86 = vector.broadcast %cst_43 : f32 to vector<16x128xf32>
    %87 = arith.select %73, %85, %86 : vector<16x128xi1>, vector<16x128xf32>
    %c0_44 = arith.constant 0 : index
    %c0_45 = arith.constant 0 : index
    %88 = vector.load %arg10[%c0_44, %c0_45] : memref<16x128xf32, #tpu.memory_space<vmem>>, vector<16x128xf32>
    %89 = arith.mulf %88, %87 : vector<16x128xf32>
    %cst_46 = arith.constant dense<0.000000e+00> : vector<16xf32>
    %90 = vector.multi_reduction <add>, %89, %cst_46 [1] : vector<16x128xf32> to vector<16xf32>
    %91 = vector.shape_cast %90 : vector<16xf32> to vector<16x1xf32>
    %cst_47 = arith.constant 0.000000e+00 : f32
    %92 = vector.broadcast %cst_47 : f32 to vector<16x1xf32>
    %93 = arith.subf %92, %91 : vector<16x1xf32>
    %94 = vector.shape_cast %93 : vector<16x1xf32> to vector<16x1xf32>
    %95 = vector.broadcast %94 : vector<16x1xf32> to vector<16x128xf32>
    %c0_48 = arith.constant 0 : index
    %c0_49 = arith.constant 0 : index
    %96 = vector.load %arg11[%c0_48, %c0_49] : memref<16x128xf32, #tpu.memory_space<vmem>>, vector<16x128xf32>
    tpu.vector_store %arg11[%c0_48, %c0_49], %95 {strides = array<i32>} : memref<16x128xf32, #tpu.memory_space<vmem>>, vector<16x128xf32>,
    return
  }
  func.func @transform_0(%arg0: i32) -> (i32, i32, i32, i32) {
    %c0_i32 = arith.constant 0 : i32
    %c0_i32_0 = arith.constant 0 : i32
    %c0_i32_1 = arith.constant 0 : i32
    %c0_i32_2 = arith.constant 0 : i32
    return %arg0, %c0_i32, %c0_i32_0, %c0_i32_1 : i32, i32, i32, i32
  }
  func.func @transform_1(%arg0: i32) -> (i32, i32) {
    %c0_i32 = arith.constant 0 : i32
    %c0_i32_0 = arith.constant 0 : i32
    %c0_i32_1 = arith.constant 0 : i32
    return %c0_i32, %c0_i32_0 : i32, i32
  }
  func.func @transform_2(%arg0: i32) -> (i32, i32) {
    %c0_i32 = arith.constant 0 : i32
    %c0_i32_0 = arith.constant 0 : i32
    %c0_i32_1 = arith.constant 0 : i32
    return %c0_i32, %c0_i32_0 : i32, i32
  }
  func.func @transform_3(%arg0: i32) -> (i32, i32) {
    %c0_i32 = arith.constant 0 : i32
    %c0_i32_0 = arith.constant 0 : i32
    %c0_i32_1 = arith.constant 0 : i32
    return %c0_i32, %c0_i32_0 : i32, i32
  }
  func.func @transform_4(%arg0: i32) -> (i32, i32) {
    %c0_i32 = arith.constant 0 : i32
    %c0_i32_0 = arith.constant 0 : i32
    %c0_i32_1 = arith.constant 0 : i32
    return %c0_i32, %c0_i32_0 : i32, i32
  }
  func.func @transform_5(%arg0: i32) -> (i32, i32) {
    %c0_i32 = arith.constant 0 : i32
    %c0_i32_0 = arith.constant 0 : i32
    %c0_i32_1 = arith.constant 0 : i32
    return %c0_i32, %c0_i32_0 : i32, i32
  }
  func.func @transform_6(%arg0: i32) -> (i32, i32) {
    %c0_i32 = arith.constant 0 : i32
    %c0_i32_0 = arith.constant 0 : i32
    %c0_i32_1 = arith.constant 0 : i32
    return %c0_i32, %c0_i32_0 : i32, i32
  }
  func.func @transform_7(%arg0: i32) -> (i32, i32) {
    %c0_i32 = arith.constant 0 : i32
    %c0_i32_0 = arith.constant 0 : i32
    %c0_i32_1 = arith.constant 0 : i32
    return %c0_i32, %c0_i32_0 : i32, i32
  }
  func.func @transform_8(%arg0: i32) -> (i32, i32) {
    %c0_i32 = arith.constant 0 : i32
    %c0_i32_0 = arith.constant 0 : i32
    %c0_i32_1 = arith.constant 0 : i32
    return %c0_i32, %c0_i32_0 : i32, i32
  }
  func.func @transform_9(%arg0: i32) -> (i32, i32) {
    %c0_i32 = arith.constant 0 : i32
    %c0_i32_0 = arith.constant 0 : i32
    return %arg0, %c0_i32 : i32, i32
  }
  func.func @transform_10(%arg0: i32) -> (i32, i32) {
    %c0_i32 = arith.constant 0 : i32
    %c0_i32_0 = arith.constant 0 : i32
    return %arg0, %c0_i32 : i32, i32
  }
  func.func @transform_11(%arg0: i32) -> (i32, i32) {
    %c0_i32 = arith.constant 0 : i32
    %c0_i32_0 = arith.constant 0 : i32
    return %arg0, %c0_i32 : i32, i32
  }
}

</mosaic_0001>

<bundles_post_ra>
// kernel: _forward_impl.1
= control target key start
LH: loop header
LB: loop body
LE: loop exit
PB: predicated region body
PF: predicated region fallthrough
CT: control target
= control target key end

     0   :  { %s2807_s0 = inlined_call_operand.vmem [shape: bf16[1,8,16,128], index: 0, kind: input, shape index: {}]   ;;  %s2808_s1 = inlined_call_operand.vmem [shape: bf16[128,512], index: 1, kind: input, shape index: {}]   ;;  %s2809_s5 = inlined_call_operand.vmem [shape: bf16[128,128], index: 5, kind: input, shape index: {}]   ;;  %s2810_s6 = inlined_call_operand.vmem [shape: f32[1,128], index: 6, kind: input, shape index: {}]   ;;  %s2811_s7 = inlined_call_operand.vmem [shape: f32[128,128], index: 7, kind: input, shape index: {}]   ;;  %s2812_s8 = inlined_call_operand.vmem [shape: f32[1,128], index: 8, kind: input, shape index: {}]   ;;  %s2813_s9 = inlined_call_operand.vmem [shape: f32[16,128], index: 9, kind: input, shape index: {}]   ;;  %s2814_s10 = inlined_call_operand.vmem [shape: f32[16,128], index: 10, kind: output, shape index: {0}]   ;;  %s2815_s11 = inlined_call_operand.vmem [shape: f32[16,128], index: 11, kind: output, shape index: {1}]   ;;  %s2816_s2 = inlined_call_operand.vmem [shape: bf16[128,512], index: 2, kind: input, shape index: {}]   ;;  %s2817_s3 = inlined_call_operand.vmem [shape: f32[1,512], index: 3, kind: input, shape index: {}]   ;;  %s2818_s4 = inlined_call_operand.vmem [shape: f32[1,128], index: 4, kind: input, shape index: {}]  }
   0x1   :  { %v1751_v0 = vld [vmem:[%s2808_s1 + $0x4] sm:$0xf]  ;;  %v1756_v1 = vld [vmem:[%s2808_s1] sm:$0xf]  ;;  %v1761_v2 = vld [vmem:[%s2808_s1 + $0xc] sm:$0xf] }
   0x2   :  { %2824 = vst [vmem:[#allocation2_spill] sm:$0xff] %v1751_v0  ;;  %v1766_v3 = vld [vmem:[%s2808_s1 + $0x8] sm:$0xf]  ;;  %v1771_v4 = vld [vmem:[%s2808_s1 + $0x10] sm:$0xf0] }
   0x3   :  { %2825 = vst [vmem:[#allocation3_spill] sm:$0xff] %v1756_v1  ;;  %v1776_v5 = vld [vmem:[%s2808_s1 + $0xc] sm:$0xf0]  ;;  %v1781_v6 = vld [vmem:[%s2808_s1 + $0x18] sm:$0xf0] }
   0x4   :  { %2826 = vst [vmem:[#allocation4_spill] sm:$0xff] %v1761_v2  ;;  %v1786_v7 = vld [vmem:[%s2808_s1 + $0x14] sm:$0xf0]  ;;  %v1791_v8 = vld [vmem:[%s2808_s1 + $0x24] sm:$0xf] }
   0x5   :  { %2827 = vst [vmem:[#allocation5_spill] sm:$0xff] %v1766_v3  ;;  %v1796_v9 = vld [vmem:[%s2808_s1 + $0x20] sm:$0xf]  ;;  %v1801_v10 = vld [vmem:[%s2808_s1 + $0x2c] sm:$0xf] }
   0x6   :  { %2828 = vst [vmem:[#allocation6_spill] sm:$0xff] %v1771_v4  ;;  %v1806_v11 = vld [vmem:[%s2808_s1 + $0x28] sm:$0xf]  ;;  %v1811_v12 = vld [vmem:[%s2808_s1 + $0x30] sm:$0xf0] }
   0x7   :  { %2829 = vst [vmem:[#allocation7_spill] sm:$0xff] %v1776_v5  ;;  %v1816_v13 = vld [vmem:[%s2808_s1 + $0x2c] sm:$0xf0]  ;;  %v1821_v14 = vld [vmem:[%s2808_s1 + $0x38] sm:$0xf0] }
   0x8   :  { %2830 = vst [vmem:[#allocation8_spill] sm:$0xff] %v1781_v6  ;;  %v1826_v15 = vld [vmem:[%s2808_s1 + $0x34] sm:$0xf0]  ;;  %v1831_v16 = vld [vmem:[%s2808_s1 + $0x44] sm:$0xf] }
   0x9   :  { %2831 = vst [vmem:[#allocation9_spill] sm:$0xff] %v1786_v7  ;;  %v1836_v17 = vld [vmem:[%s2808_s1 + $0x40] sm:$0xf]  ;;  %v1841_v18 = vld [vmem:[%s2808_s1 + $0x4c] sm:$0xf] }
   0xa   :  { %2832 = vst [vmem:[#allocation10_spill] sm:$0xff] %v1791_v8  ;;  %v1846_v19 = vld [vmem:[%s2808_s1 + $0x48] sm:$0xf]  ;;  %v1851_v20 = vld [vmem:[%s2808_s1 + $0x50] sm:$0xf0] }
   0xb   :  { %2833 = vst [vmem:[#allocation11_spill] sm:$0xff] %v1796_v9  ;;  %v1856_v21 = vld [vmem:[%s2808_s1 + $0x4c] sm:$0xf0]  ;;  %v1861_v22 = vld [vmem:[%s2808_s1 + $0x58] sm:$0xf0] }
   0xc   :  { %2834 = vst [vmem:[#allocation12_spill] sm:$0xff] %v1801_v10  ;;  %v1866_v23 = vld [vmem:[%s2808_s1 + $0x54] sm:$0xf0]  ;;  %v1871_v24 = vld [vmem:[%s2808_s1 + $0x64] sm:$0xf] }
   0xd   :  { %2835 = vst [vmem:[#allocation13_spill] sm:$0xff] %v1806_v11  ;;  %v1876_v25 = vld [vmem:[%s2808_s1 + $0x60] sm:$0xf]  ;;  %v1881_v26 = vld [vmem:[%s2808_s1 + $0x6c] sm:$0xf] }
   0xe   :  { %2836 = vst [vmem:[#allocation14_spill] sm:$0xff] %v1811_v12  ;;  %v1886_v27 = vld [vmem:[%s2808_s1 + $0x68] sm:$0xf]  ;;  %v1891_v28 = vld [vmem:[%s2808_s1 + $0x70] sm:$0xf0] }
   0xf   :  { %2837 = vst [vmem:[#allocation15_spill] sm:$0xff] %v1816_v13  ;;  %v1896_v29 = vld [vmem:[%s2808_s1 + $0x6c] sm:$0xf0]  ;;  %v1901_v30 = vld [vmem:[%s2808_s1 + $0x78] sm:$0xf0] }
  0x10   :  { %2838 = vst [vmem:[#allocation16_spill] sm:$0xff] %v1821_v14  ;;  %v1906_v31 = vld [vmem:[%s2808_s1 + $0x74] sm:$0xf0]  ;;  %v1911_v32 = vld [vmem:[%s2808_s1 + $0x84] sm:$0xf] }
  0x11   :  { %2839 = vst [vmem:[#allocation17_spill] sm:$0xff] %v1826_v15  ;;  %v1916_v33 = vld [vmem:[%s2808_s1 + $0x80] sm:$0xf]  ;;  %v1921_v34 = vld [vmem:[%s2808_s1 + $0x8c] sm:$0xf] }
  0x12   :  { %2840 = vst [vmem:[#allocation18_spill] sm:$0xff] %v1831_v16  ;;  %v1926_v35 = vld [vmem:[%s2808_s1 + $0x88] sm:$0xf]  ;;  %v1931_v36 = vld [vmem:[%s2808_s1 + $0x90] sm:$0xf0] }
  0x13   :  { %2841 = vst [vmem:[#allocation19_spill] sm:$0xff] %v1836_v17  ;;  %v1936_v37 = vld [vmem:[%s2808_s1 + $0x8c] sm:$0xf0]  ;;  %v1941_v38 = vld [vmem:[%s2808_s1 + $0x98] sm:$0xf0] }
  0x14   :  { %2842 = vst [vmem:[#allocation20_spill] sm:$0xff] %v1841_v18  ;;  %v1946_v39 = vld [vmem:[%s2808_s1 + $0x94] sm:$0xf0]  ;;  %v1951_v40 = vld [vmem:[%s2808_s1 + $0xa4] sm:$0xf] }
  0x15   :  { %2843 = vst [vmem:[#allocation21_spill] sm:$0xff] %v1846_v19  ;;  %v1956_v41 = vld [vmem:[%s2808_s1 + $0xa0] sm:$0xf]  ;;  %v1961_v42 = vld [vmem:[%s2808_s1 + $0xac] sm:$0xf] }
  0x16   :  { %2844 = vst [vmem:[#allocation22_spill] sm:$0xff] %v1851_v20  ;;  %v1966_v43 = vld [vmem:[%s2808_s1 + $0xa8] sm:$0xf]  ;;  %v1971_v44 = vld [vmem:[%s2808_s1 + $0xb0] sm:$0xf0] }
  0x17   :  { %2845 = vst [vmem:[#allocation23_spill] sm:$0xff] %v1856_v21  ;;  %v1976_v45 = vld [vmem:[%s2808_s1 + $0xac] sm:$0xf0]  ;;  %v1981_v46 = vld [vmem:[%s2808_s1 + $0xb8] sm:$0xf0] }
  0x18   :  { %2846 = vst [vmem:[#allocation24_spill] sm:$0xff] %v1861_v22  ;;  %v1986_v47 = vld [vmem:[%s2808_s1 + $0xb4] sm:$0xf0]  ;;  %v1991_v48 = vld [vmem:[%s2808_s1 + $0xc4] sm:$0xf] }
  0x19   :  { %2847 = vst [vmem:[#allocation25_spill] sm:$0xff] %v1866_v23  ;;  %v1996_v49 = vld [vmem:[%s2808_s1 + $0xc0] sm:$0xf]  ;;  %v2001_v50 = vld [vmem:[%s2808_s1 + $0xcc] sm:$0xf] }
  0x1a   :  { %2848 = vst [vmem:[#allocation26_spill] sm:$0xff] %v1871_v24  ;;  %v2006_v51 = vld [vmem:[%s2808_s1 + $0xc8] sm:$0xf]  ;;  %v2011_v52 = vld [vmem:[%s2808_s1 + $0xd0] sm:$0xf0] }
  0x1b   :  { %2849 = vst [vmem:[#allocation27_spill] sm:$0xff] %v1876_v25  ;;  %v2016_v53 = vld [vmem:[%s2808_s1 + $0xcc] sm:$0xf0]  ;;  %v2021_v54 = vld [vmem:[%s2808_s1 + $0xd8] sm:$0xf0] }
  0x1c   :  { %2850 = vst [vmem:[#allocation28_spill] sm:$0xff] %v1881_v26  ;;  %v2026_v55 = vld [vmem:[%s2808_s1 + $0xd4] sm:$0xf0]  ;;  %v2031_v56 = vld [vmem:[%s2808_s1 + $0xe4] sm:$0xf] }
  0x1d   :  { %2851 = vst [vmem:[#allocation29_spill] sm:$0xff] %v1886_v27  ;;  %v2036_v57 = vld [vmem:[%s2808_s1 + $0xe0] sm:$0xf]  ;;  %v2041_v58 = vld [vmem:[%s2808_s1 + $0xec] sm:$0xf] }
  0x1e   :  { %2852 = vst [vmem:[#allocation30_spill] sm:$0xff] %v1891_v28  ;;  %v2046_v59 = vld [vmem:[%s2808_s1 + $0xe8] sm:$0xf]  ;;  %v2051_v60 = vld [vmem:[%s2808_s1 + $0xf0] sm:$0xf0] }
  0x1f   :  { %2853 = vst [vmem:[#allocation31_spill] sm:$0xff] %v1896_v29  ;;  %v2056_v61 = vld [vmem:[%s2808_s1 + $0xec] sm:$0xf0]  ;;  %v2061_v62 = vld [vmem:[%s2808_s1 + $0xf8] sm:$0xf0] }
  0x20   :  { %2854 = vst [vmem:[#allocation32_spill] sm:$0xff] %v1901_v30  ;;  %v2066_v63 = vld [vmem:[%s2808_s1 + $0xf4] sm:$0xf0]  ;;  %v2071_v2 = vld [vmem:[%s2816_s2 + $0x4] sm:$0xf] }
  0x21   :  { %2855 = vst [vmem:[#allocation33_spill] sm:$0xff] %v1906_v31  ;;  %v2076_v6 = vld [vmem:[%s2816_s2] sm:$0xf]  ;;  %v2081_v7 = vld [vmem:[%s2816_s2 + $0xc] sm:$0xf] }
  0x22   :  { %2856 = vst [vmem:[#allocation34_spill] sm:$0xff] %v1911_v32  ;;  %v2086_v3 = vld [vmem:[%s2816_s2 + $0x8] sm:$0xf]  ;;  %v2091_v0 = vld [vmem:[%s2816_s2 + $0x10] sm:$0xf0] }
  0x23   :  { %2857 = vst [vmem:[#allocation35_spill] sm:$0xff] %v1916_v33  ;;  %v2096_v4 = vld [vmem:[%s2816_s2 + $0xc] sm:$0xf0]  ;;  %v2101_v5 = vld [vmem:[%s2816_s2 + $0x18] sm:$0xf0] }
  0x24   :  { %2858 = vst [vmem:[#allocation36_spill] sm:$0xff] %v1921_v34  ;;  %v2106_v1 = vld [vmem:[%s2816_s2 + $0x14] sm:$0xf0]  ;;  %v2111_v10 = vld [vmem:[%s2816_s2 + $0x24] sm:$0xf] }
  0x25   :  { %2859 = vst [vmem:[#allocation37_spill] sm:$0xff] %v1926_v35  ;;  %v2116_v14 = vld [vmem:[%s2816_s2 + $0x20] sm:$0xf]  ;;  %v2121_v15 = vld [vmem:[%s2816_s2 + $0x2c] sm:$0xf] }
  0x26   :  { %2860 = vst [vmem:[#allocation38_spill] sm:$0xff] %v1931_v36  ;;  %v2126_v11 = vld [vmem:[%s2816_s2 + $0x28] sm:$0xf]  ;;  %v2131_v8 = vld [vmem:[%s2816_s2 + $0x30] sm:$0xf0] }
  0x27   :  { %2861 = vst [vmem:[#allocation39_spill] sm:$0xff] %v1936_v37  ;;  %v2136_v12 = vld [vmem:[%s2816_s2 + $0x2c] sm:$0xf0]  ;;  %v2141_v13 = vld [vmem:[%s2816_s2 + $0x38] sm:$0xf0] }
  0x28   :  { %2862 = vst [vmem:[#allocation40_spill] sm:$0xff] %v1941_v38  ;;  %v2146_v9 = vld [vmem:[%s2816_s2 + $0x34] sm:$0xf0]  ;;  %v2151_v18 = vld [vmem:[%s2816_s2 + $0x44] sm:$0xf] }
  0x29   :  { %2863 = vst [vmem:[#allocation41_spill] sm:$0xff] %v1946_v39  ;;  %v2156_v22 = vld [vmem:[%s2816_s2 + $0x40] sm:$0xf]  ;;  %v2161_v23 = vld [vmem:[%s2816_s2 + $0x4c] sm:$0xf] }
  0x2a   :  { %2864 = vst [vmem:[#allocation42_spill] sm:$0xff] %v1951_v40  ;;  %v2166_v19 = vld [vmem:[%s2816_s2 + $0x48] sm:$0xf]  ;;  %v2171_v16 = vld [vmem:[%s2816_s2 + $0x50] sm:$0xf0] }
  0x2b   :  { %2865 = vst [vmem:[#allocation43_spill] sm:$0xff] %v1956_v41  ;;  %v2176_v20 = vld [vmem:[%s2816_s2 + $0x4c] sm:$0xf0]  ;;  %v2181_v21 = vld [vmem:[%s2816_s2 + $0x58] sm:$0xf0] }
  0x2c   :  { %2866 = vst [vmem:[#allocation44_spill] sm:$0xff] %v1961_v42  ;;  %v2186_v17 = vld [vmem:[%s2816_s2 + $0x54] sm:$0xf0]  ;;  %v2191_v26 = vld [vmem:[%s2816_s2 + $0x64] sm:$0xf] }
  0x2d   :  { %2867 = vst [vmem:[#allocation45_spill] sm:$0xff] %v1966_v43  ;;  %v2196_v30 = vld [vmem:[%s2816_s2 + $0x60] sm:$0xf]  ;;  %v2201_v31 = vld [vmem:[%s2816_s2 + $0x6c] sm:$0xf] }
  0x2e   :  { %2868 = vst [vmem:[#allocation46_spill] sm:$0xff] %v1971_v44  ;;  %v2206_v27 = vld [vmem:[%s2816_s2 + $0x68] sm:$0xf]  ;;  %v2211_v24 = vld [vmem:[%s2816_s2 + $0x70] sm:$0xf0] }
  0x2f   :  { %2869 = vst [vmem:[#allocation47_spill] sm:$0xff] %v1976_v45  ;;  %v2216_v28 = vld [vmem:[%s2816_s2 + $0x6c] sm:$0xf0]  ;;  %v2221_v29 = vld [vmem:[%s2816_s2 + $0x78] sm:$0xf0] }
  0x30   :  { %2870 = vst [vmem:[#allocation48_spill] sm:$0xff] %v1981_v46  ;;  %v2226_v25 = vld [vmem:[%s2816_s2 + $0x74] sm:$0xf0]  ;;  %v2231_v34 = vld [vmem:[%s2816_s2 + $0x84] sm:$0xf] }
  0x31   :  { %2871 = vst [vmem:[#allocation49_spill] sm:$0xff] %v1986_v47  ;;  %v2236_v38 = vld [vmem:[%s2816_s2 + $0x80] sm:$0xf]  ;;  %v2241_v39 = vld [vmem:[%s2816_s2 + $0x8c] sm:$0xf] }
  0x32   :  { %2872 = vst [vmem:[#allocation50_spill] sm:$0xff] %v1991_v48  ;;  %v2246_v35 = vld [vmem:[%s2816_s2 + $0x88] sm:$0xf]  ;;  %v2251_v32 = vld [vmem:[%s2816_s2 + $0x90] sm:$0xf0] }
  0x33   :  { %2873 = vst [vmem:[#allocation51_spill] sm:$0xff] %v1996_v49  ;;  %v2256_v36 = vld [vmem:[%s2816_s2 + $0x8c] sm:$0xf0]  ;;  %v2261_v37 = vld [vmem:[%s2816_s2 + $0x98] sm:$0xf0] }
  0x34   :  { %2874 = vst [vmem:[#allocation52_spill] sm:$0xff] %v2001_v50  ;;  %v2266_v33 = vld [vmem:[%s2816_s2 + $0x94] sm:$0xf0]  ;;  %v2271_v42 = vld [vmem:[%s2816_s2 + $0xa4] sm:$0xf] }
  0x35   :  { %2875 = vst [vmem:[#allocation53_spill] sm:$0xff] %v2006_v51  ;;  %v2276_v46 = vld [vmem:[%s2816_s2 + $0xa0] sm:$0xf]  ;;  %v2281_v47 = vld [vmem:[%s2816_s2 + $0xac] sm:$0xf] }
  0x36   :  { %2876 = vst [vmem:[#allocation54_spill] sm:$0xff] %v2011_v52  ;;  %v2286_v43 = vld [vmem:[%s2816_s2 + $0xa8] sm:$0xf]  ;;  %v2291_v40 = vld [vmem:[%s2816_s2 + $0xb0] sm:$0xf0] }
  0x37   :  { %2877 = vst [vmem:[#allocation55_spill] sm:$0xff] %v2016_v53  ;;  %v2296_v44 = vld [vmem:[%s2816_s2 + $0xac] sm:$0xf0]  ;;  %v2301_v45 = vld [vmem:[%s2816_s2 + $0xb8] sm:$0xf0] }
  0x38   :  { %2878 = vst [vmem:[#allocation56_spill] sm:$0xff] %v2021_v54  ;;  %v2306_v41 = vld [vmem:[%s2816_s2 + $0xb4] sm:$0xf0]  ;;  %v2311_v50 = vld [vmem:[%s2816_s2 + $0xc4] sm:$0xf] }
  0x39   :  { %2879 = vst [vmem:[#allocation57_spill] sm:$0xff] %v2026_v55  ;;  %v2316_v54 = vld [vmem:[%s2816_s2 + $0xc0] sm:$0xf]  ;;  %v2321_v55 = vld [vmem:[%s2816_s2 + $0xcc] sm:$0xf] }
  0x3a   :  { %2880 = vst [vmem:[#allocation58_spill] sm:$0xff] %v2031_v56  ;;  %v2326_v51 = vld [vmem:[%s2816_s2 + $0xc8] sm:$0xf]  ;;  %v2331_v48 = vld [vmem:[%s2816_s2 + $0xd0] sm:$0xf0] }
  0x3b   :  { %2881 = vst [vmem:[#allocation59_spill] sm:$0xff] %v2036_v57  ;;  %v2336_v52 = vld [vmem:[%s2816_s2 + $0xcc] sm:$0xf0]  ;;  %v2341_v53 = vld [vmem:[%s2816_s2 + $0xd8] sm:$0xf0] }
  0x3c   :  { %2882 = vst [vmem:[#allocation60_spill] sm:$0xff] %v2041_v58  ;;  %v2346_v49 = vld [vmem:[%s2816_s2 + $0xd4] sm:$0xf0]  ;;  %v2351_v58 = vld [vmem:[%s2816_s2 + $0xe4] sm:$0xf] }
  0x3d   :  { %2883 = vst [vmem:[#allocation61_spill] sm:$0xff] %v2046_v59  ;;  %v2366_v59 = vld [vmem:[%s2816_s2 + $0xe8] sm:$0xf]  ;;  %v2371_v56 = vld [vmem:[%s2816_s2 + $0xf0] sm:$0xf0] }
  0x3e   :  { %2884 = vst [vmem:[#allocation62_spill] sm:$0xff] %v2051_v60  ;;  %v2376_v60 = vld [vmem:[%s2816_s2 + $0xec] sm:$0xf0]  ;;  %v2386_v57 = vld [vmem:[%s2816_s2 + $0xf4] sm:$0xf0] }
  0x3f   :  { %2885 = vst [vmem:[#allocation63_spill] sm:$0xff] %v2056_v61  ;;  %v2381_v61 = vld [vmem:[%s2816_s2 + $0xf8] sm:$0xf0] }
  0x40   :  { %2886 = vst [vmem:[#allocation64_spill] sm:$0xff] %v2061_v62  ;;  %v2356_v62 = vld [vmem:[%s2816_s2 + $0xe0] sm:$0xf] }
  0x41   :  { %2887 = vst [vmem:[#allocation65_spill] sm:$0xff] %v2066_v63  ;;  %v2361_v63 = vld [vmem:[%s2816_s2 + $0xec] sm:$0xf]  ;;  %s2422_s2 = smov 0  }
  0x42   :  { %2888 = vst [vmem:[#allocation66_spill] sm:$0xff] %v2071_v2  ;;  %v2416_v2 = vmov 0.0  }
  0x43   :  { %2889 = vst [vmem:[#allocation67_spill] sm:$0xff] %v2076_v6  ;;  %v2404_v6 = vmov 0.0  }
  0x44   :  { %2890 = vst [vmem:[#allocation68_spill] sm:$0xff] %v2081_v7  ;;  %v2391_v7 = vld [vmem:[%s2817_s3] sm:$0xf] }
  0x45   :  { %2891 = vst [vmem:[#allocation69_spill] sm:$0xff] %v2086_v3  ;;  %v2414_v3 = vmov 0.0  }
  0x46   :  { %2892 = vst [vmem:[#allocation70_spill] sm:$0xff] %v2091_v0  ;;  %v2400_v0 = vld [vmem:[%s2818_s4] ss:$0 sm:$0xff] }
  0x47   :  { %2893 = vst [vmem:[#allocation71_spill] sm:$0xff] %v2096_v4  ;;  %v2402_v4 = vmov 0.0  }
  0x48   :  { %2894 = vst [vmem:[#allocation72_spill] sm:$0xff] %v2101_v5  ;;  %v2410_v5 = vmov -1e+30  }
  0x49   :  { %2895 = vst [vmem:[#allocation73_spill] sm:$0xff] %v2106_v1  ;;  %v2412_v1 = vmov -1e+30  }
  0x4a   :  { %2896 = vst [vmem:[#allocation74_spill] sm:$0xff] %v2111_v10 }
  0x4b   :  { %2897 = vst [vmem:[#allocation75_spill] sm:$0xff] %v2116_v14 }
  0x4c   :  { %2898 = vst [vmem:[#allocation76_spill] sm:$0xff] %v2121_v15  ;;  %v2406_v15 = vmov 0.0  }
  0x4d   :  { %2899 = vst [vmem:[#allocation77_spill] sm:$0xff] %v2126_v11 }
  0x4e   :  { %2900 = vst [vmem:[#allocation78_spill] sm:$0xff] %v2131_v8 }
  0x4f   :  { %2901 = vst [vmem:[#allocation79_spill] sm:$0xff] %v2136_v12 }
  0x50   :  { %2902 = vst [vmem:[#allocation80_spill] sm:$0xff] %v2141_v13  ;;  %v2408_v13 = vmov 0.0  }
  0x51   :  { %2903 = vst [vmem:[#allocation81_spill] sm:$0xff] %v2146_v9  ;;  %v2420_v9 = vmov 0.0  }
  0x52   :  { %2904 = vst [vmem:[#allocation82_spill] sm:$0xff] %v2151_v18 }
  0x53   :  { %2905 = vst [vmem:[#allocation83_spill] sm:$0xff] %v2156_v22 }
  0x54   :  { %2906 = vst [vmem:[#allocation84_spill] sm:$0xff] %v2161_v23 }
  0x55   :  { %2907 = vst [vmem:[#allocation85_spill] sm:$0xff] %v2166_v19 }
  0x56   :  { %2908 = vst [vmem:[#allocation86_spill] sm:$0xff] %v2171_v16 }
  0x57   :  { %2909 = vst [vmem:[#allocation87_spill] sm:$0xff] %v2176_v20 }
  0x58   :  { %2910 = vst [vmem:[#allocation88_spill] sm:$0xff] %v2181_v21 }
  0x59   :  { %2911 = vst [vmem:[#allocation89_spill] sm:$0xff] %v2186_v17 }
  0x5a   :  { %2912 = vst [vmem:[#allocation90_spill] sm:$0xff] %v2191_v26 }
  0x5b   :  { %2913 = vst [vmem:[#allocation91_spill] sm:$0xff] %v2206_v27 }
  0x5c   :  { %2914 = vst [vmem:[#allocation92_spill] sm:$0xff] %v2211_v24 }
  0x5d   :  { %2915 = vst [vmem:[#allocation93_spill] sm:$0xff] %v2216_v28 }
  0x5e   :  { %2916 = vst [vmem:[#allocation94_spill] sm:$0xff] %v2221_v29 }
  0x5f   :  { %2917 = vst [vmem:[#allocation95_spill] sm:$0xff] %v2226_v25 }
  0x60   :  { %2918 = vst [vmem:[#allocation96_spill] sm:$0xff] %v2371_v56 }
  0x61   :  { %2919 = vst [vmem:[#allocation97_spill] sm:$0xff] %v2376_v60 }
  0x62   :  { %2920 = vst [vmem:[#allocation98_spill] sm:$0xff] %v2391_v7  ;;  %v2418_v7 = vmov 0.0  }
  0x63 LB: > { %2921 = vst [vmem:[#allocation99_spill] sm:$0xff] %v1645_v4  ;;  %v2930_v24 = vld [vmem:[#allocation92_spill] sm:$0xff]  ;;  %v2931_v26 = vld [vmem:[#allocation90_spill] sm:$0xff]  ;;  %v2932_v27 = vld [vmem:[#allocation91_spill] sm:$0xff]  ;;  %s1429_s3 = sshll.u32 %s1685_s2, 3  ;;  %s120_s2 = sadd.s32 1, %s1685_s2   ;;  %s1685_s2 = sphi %s2422_s2, %s120_s2   ;;  %v1681_v9 = vphi %v2420_v9, %v3046_v9   ;;  %v1677_v7 = vphi %v2418_v7, %v708_v7   ;;  %v1673_v2 = vphi %v2416_v2, %v2627_v2   ;;  %v1669_v3 = vphi %v2414_v3, %v704_v3   ;;  %v1665_v1 = vphi %v2412_v1, %v717_v1   ;;  %v1661_v5 = vphi %v2410_v5, %v718_v5   ;;  %v1657_v13 = vphi %v2408_v13, %v3045_v13   ;;  %v1653_v15 = vphi %v2406_v15, %v3044_v15   ;;  %v1649_v6 = vphi %v2404_v6, %v3043_v6   ;;  %v1645_v4 = vphi %v2402_v4, %v3042_v4  }
  0x64   : > { %2922 = vst [vmem:[#allocation100_spill] sm:$0xff] %v1649_v6  ;;  %v1190_v6 = vor.u32 %v2386_v57, %v2366_v59  ;;  %v2929_v28 = vld [vmem:[#allocation93_spill] sm:$0xff]  ;;  %v2935_v22 = vld [vmem:[#allocation83_spill] sm:$0xff]  ;;  %v2937_v16 = vld [vmem:[#allocation86_spill] sm:$0xff]  ;;  %s133_s24 = scalar_lea.vmem %s2807_s0, %s1429_s3  ;;  %p117_p0 = scmp.ge.s32.totalorder %s120_s2, 8  }
  0x65   : > { %2923 = vst [vmem:[#allocation101_spill] sm:$0xff] %v1653_v15  ;;  %v2934_v29 = vld [vmem:[#allocation94_spill] sm:$0xff]  ;;  %v2936_v20 = vld [vmem:[#allocation87_spill] sm:$0xff]  ;;  %v2939_v19 = vld [vmem:[#allocation85_spill] sm:$0xff] }
  0x66   : > { %2924 = vst [vmem:[#allocation102_spill] sm:$0xff] %v1657_v13  ;;  %v1194_v13 = vor.u32 %v2361_v63, %v2381_v61  ;;  %325 = vmatpush.bf16.msra.mxu2 %v1190_v6  ;;  %v1158_v6 = vor.u32 %v2306_v41, %v2286_v43  ;;  %v2933_v25 = vld [vmem:[#allocation95_spill] sm:$0xff]  ;;  %v2938_v18 = vld [vmem:[#allocation82_spill] sm:$0xff]  ;;  %v2940_v17 = vld [vmem:[#allocation89_spill] sm:$0xff] }
  0x67   : > { %2925 = vst [vmem:[#allocation103_spill] sm:$0xff] %v1661_v5  ;;  %v2928_v56 = vld [vmem:[#allocation96_spill] sm:$0xff]  ;;  %v1166_v5 = vor.u32 %v2336_v52, %v2316_v54  ;;  %v2943_v14 = vld [vmem:[#allocation75_spill] sm:$0xff]  ;;  %v2945_v8 = vld [vmem:[#allocation78_spill] sm:$0xff] }
  0x68   : > { %2926 = vst [vmem:[#allocation104_spill] sm:$0xff] %v1665_v1  ;;  %v2927_v60 = vld [vmem:[#allocation97_spill] sm:$0xff]  ;;  %v1186_v15 = vor.u32 %v2351_v58, %v2928_v56  ;;  %v1170_v1 = vor.u32 %v2311_v50, %v2331_v48  ;;  %339 = vmatpush.bf16.msra.mxu3 %v1194_v13  ;;  %v1178_v56 = vor.u32 %v2321_v55, %v2341_v53  ;;  %v2941_v21 = vld [vmem:[#allocation88_spill] sm:$0xff]  ;;  %v2944_v12 = vld [vmem:[#allocation79_spill] sm:$0xff] }
  0x69   : > { %v1182_v4 = vor.u32 %v2927_v60, %v2356_v62  ;;  %v1174_v60 = vor.u32 %v2346_v49, %v2326_v51  ;;  %v1162_v13 = vor.u32 %v2281_v47, %v2301_v45  ;;  %v2942_v23 = vld [vmem:[#allocation84_spill] sm:$0xff]  ;;  %v2946_v10 = vld [vmem:[#allocation74_spill] sm:$0xff]  ;;  %v2947_v11 = vld [vmem:[#allocation77_spill] sm:$0xff] }
  0x6a   : > { %311 = vmatpush.bf16.msra.mxu1 %v1186_v15  ;;  %v1154_v15 = vor.u32 %v2271_v42, %v2291_v40  ;;  %v1434_v40 = vld [vmem:[%s2809_s5 + $0x18] sm:$0xff] (%p117_p0)  ;;  %v1433_v47 = vld [vmem:[%s2809_s5 + $0x10] sm:$0xff] (%p117_p0)  ;;  %v1432_v49 = vld [vmem:[%s2809_s5 + $0x8] sm:$0xff] (%p117_p0) }
  0x6b   : > { %297 = vmatpush.bf16.msra.mxu0 %v1182_v4  ;;  %v1150_v4 = vor.u32 %v2296_v44, %v2276_v46  ;;  %326 = vmatpush.bf16.msra.mxu2 %v1174_v60  ;;  %v1142_v60 = vor.u32 %v2266_v33, %v2246_v35  ;;  %v1431_v52 = vld [vmem:[%s2809_s5] sm:$0xff] (%p117_p0)  ;;  %v951_v54 = vld [vmem:[%s2811_s7 + $0x78] sm:$0xff] (%p117_p0)  ;;  %v950_v55 = vld [vmem:[%s2811_s7 + $0x70] sm:$0xff] (%p117_p0) }
  0x6c   : > { %340 = vmatpush.bf16.msra.mxu3 %v1178_v56  ;;  %v1146_v56 = vor.u32 %v2241_v39, %v2261_v37  ;;  %v949_v57 = vld [vmem:[%s2811_s7 + $0x68] sm:$0xff] (%p117_p0)  ;;  %v948_v58 = vld [vmem:[%s2811_s7 + $0x60] sm:$0xff] (%p117_p0)  ;;  %v947_v61 = vld [vmem:[%s2811_s7 + $0x58] sm:$0xff] (%p117_p0) }
  0x6d   :  { %v1573_v59 = vld [vmem:[%s2810_s6] ss:$0 sm:$0xff] (%p117_p0)  ;;  %v946_v63 = vld [vmem:[%s2811_s7 + $0x50] sm:$0xff] (%p117_p0) }
  0x6e   : > { %312 = vmatpush.bf16.msra.mxu1 %v1170_v1  ;;  %v1138_v1 = vor.u32 %v2231_v34, %v2251_v32  ;;  %v1435_v32 = vld [vmem:[%s2809_s5 + $0x20] sm:$0xff] (%p117_p0) }
  0x6f   : > { %298 = vmatpush.bf16.msra.mxu0 %v1166_v5  ;;  %v1134_v5 = vor.u32 %v2256_v36, %v2236_v38  ;;  %327 = vmatpush.bf16.msra.mxu2 %v1158_v6  ;;  %v1126_v6 = vor.u32 %v2933_v25, %v2932_v27  ;;  %v2966_v25 = vld [vmem:[#allocation60_spill] sm:$0xff] }
  0x70   : > { %341 = vmatpush.bf16.msra.mxu3 %v1162_v13  ;;  %v1130_v13 = vor.u32 %v2201_v31, %v2934_v29 }
  0x72   : > { %313 = vmatpush.bf16.msra.mxu1 %v1154_v15  ;;  %v1122_v15 = vor.u32 %v2931_v26, %v2930_v24  ;;  %v2964_v24 = vld [vmem:[#allocation65_spill] sm:$0xff] }
  0x73   : > { %299 = vmatpush.bf16.msra.mxu0 %v1150_v4  ;;  %v1118_v4 = vor.u32 %v2929_v28, %v2196_v30  ;;  %328 = vmatpush.bf16.msra.mxu2 %v1142_v60  ;;  %v1110_v60 = vor.u32 %v2940_v17, %v2939_v19  ;;  %v2951_v17 = vld [vmem:[#allocation67_spill] sm:$0xff] }
  0x74   : > { %342 = vmatpush.bf16.msra.mxu3 %v1146_v56  ;;  %v1114_v56 = vor.u32 %v2942_v23, %v2941_v21  ;;  %v2952_v19 = vld [vmem:[#allocation71_spill] sm:$0xff]  ;;  %v2954_v21 = vld [vmem:[#allocation66_spill] sm:$0xff] }
  0x76   : > { %314 = vmatpush.bf16.msra.mxu1 %v1138_v1  ;;  %v1106_v1 = vor.u32 %v2938_v18, %v2937_v16  ;;  %v2948_v16 = vld [vmem:[#allocation81_spill] sm:$0xff]  ;;  %v2950_v18 = vld [vmem:[#allocation76_spill] sm:$0xff] }
  0x77   : > { %300 = vmatpush.bf16.msra.mxu0 %v1134_v5  ;;  %v1102_v5 = vor.u32 %v2936_v20, %v2935_v22  ;;  %329 = vmatpush.bf16.msra.mxu2 %v1126_v6  ;;  %v1094_v6 = vor.u32 %v2948_v16, %v2947_v11  ;;  %v2959_v16 = vld [vmem:[#allocation59_spill] sm:$0xff] }
  0x78   : > { %343 = vmatpush.bf16.msra.mxu3 %v1130_v13  ;;  %v2949_v13 = vld [vmem:[#allocation80_spill] sm:$0xff]  ;;  %v2960_v11 = vld [vmem:[#allocation63_spill] sm:$0xff] }
  0x79   : > { %v1098_v20 = vor.u32 %v2950_v18, %v2949_v13  ;;  %v1314_v23 = vor.u32 %v2960_v11, %v2959_v16  ;;  %v2961_v18 = vld [vmem:[#allocation62_spill] sm:$0xff]  ;;  %v2963_v13 = vld [vmem:[#allocation61_spill] sm:$0xff]  ;;  %v2968_v11 = vld [vmem:[#allocation55_spill] sm:$0xff] }
  0x7a   : > { %315 = vmatpush.bf16.msra.mxu1 %v1122_v15  ;;  %v1090_v15 = vor.u32 %v2946_v10, %v2945_v8  ;;  %v2956_v8 = vld [vmem:[#allocation73_spill] sm:$0xff]  ;;  %v2958_v10 = vld [vmem:[#allocation68_spill] sm:$0xff] }
  0x7b   : > { %301 = vmatpush.bf16.msra.mxu0 %v1118_v4  ;;  %v1086_v4 = vor.u32 %v2944_v12, %v2943_v14  ;;  %330 = vmatpush.bf16.msra.mxu2 %v1110_v60  ;;  %v2955_v12 = vld [vmem:[#allocation69_spill] sm:$0xff] }
  0x7c   : > { %344 = vmatpush.bf16.msra.mxu3 %v1114_v56  ;;  %v1078_v60 = vor.u32 %v2956_v8, %v2955_v12  ;;  %v2957_v56 = vld [vmem:[#allocation72_spill] sm:$0xff]  ;;  %v136_v8 = vpack.c.bf16 %v1677_v7, %v1681_v9  ;;  %v2975_v7 = vld [vmem:[#allocation43_spill] sm:$0xff] }
  0x7d   : > { %v1082_v14 = vor.u32 %v2958_v10, %v2957_v56  ;;  %v2967_v10 = vld [vmem:[#allocation51_spill] sm:$0xff]  ;;  %v2972_v56 = vld [vmem:[#allocation57_spill] sm:$0xff] }
  0x7e   : > { %316 = vmatpush.bf16.msra.mxu1 %v1106_v1  ;;  %v2953_v1 = vld [vmem:[#allocation70_spill] sm:$0xff]  ;;  %v1298_v12 = vor.u32 %v2968_v11, %v2967_v10  ;;  %v2976_v9 = vld [vmem:[#allocation47_spill] sm:$0xff] }
  0x7f   : > { %302 = vmatpush.bf16.msra.mxu0 %v1102_v5  ;;  %v1070_v5 = vor.u32 %v2952_v19, %v2951_v17  ;;  %v1074_v22 = vor.u32 %v2954_v21, %v2953_v1  ;;  %331 = vmatpush.bf16.msra.mxu2 %v1094_v6  ;;  %v1322_v17 = vor.u32 %v2964_v24, %v2963_v13  ;;  %v2965_v19 = vld [vmem:[#allocation64_spill] sm:$0xff]  ;;  %v2970_v6 = vld [vmem:[#allocation50_spill] sm:$0xff]  ;;  %v2971_v24 = vld [vmem:[#allocation53_spill] sm:$0xff] }
  0x80   : > { %345 = vmatpush.bf16.msra.mxu3 %v1098_v20  ;;  %v1326_v21 = vor.u32 %v2966_v25, %v2965_v19  ;;  %v2969_v20 = vld [vmem:[#allocation54_spill] sm:$0xff]  ;;  %v1306_v25 = vor.u32 %v2972_v56, %v2971_v24  ;;  %v2982_v19 = vld [vmem:[#allocation44_spill] sm:$0xff]  ;;  %v2983_v10 = vld [vmem:[#allocation35_spill] sm:$0xff] }
  0x81   : > { %v1302_v1 = vor.u32 %v2970_v6, %v2969_v20  ;;  %v2986_v20 = vld [vmem:[#allocation34_spill] sm:$0xff]  ;;  %v2988_v24 = vld [vmem:[#allocation41_spill] sm:$0xff] }
  0x82   : > { %317 = vmatpush.bf16.msra.mxu1 %v1090_v15 }
  0x83   : > { %303 = vmatpush.bf16.msra.mxu0 %v1086_v4  ;;  %v2962_v4 = vld [vmem:[#allocation58_spill] sm:$0xff]  ;;  %332 = vmatpush.bf16.msra.mxu2 %v1078_v60 }
  0x84   : > { %v1318_v15 = vor.u32 %v2962_v4, %v2961_v18  ;;  %346 = vmatpush.bf16.msra.mxu3 %v1082_v14  ;;  %v1282_v14 = vor.u32 %v2976_v9, %v2975_v7  ;;  %v2978_v60 = vld [vmem:[#allocation42_spill] sm:$0xff]  ;;  %v2979_v4 = vld [vmem:[#allocation45_spill] sm:$0xff]  ;;  %v2992_v7 = vld [vmem:[#allocation31_spill] sm:$0xff] }
  0x86   : > { %318 = vmatpush.bf16.msra.mxu1 %v1074_v22  ;;  %v2974_v22 = vld [vmem:[#allocation52_spill] sm:$0xff]  ;;  %333 = vmatmul.bf16.vlgmr.msra.gmra.mxu2 %v136_v8 }
  0x87   : > { %304 = vmatpush.bf16.msra.mxu0 %v1070_v5  ;;  %547 = vmatpush.bf16.msrb.mxu2 %v1322_v17  ;;  %v2973_v5 = vld [vmem:[#allocation56_spill] sm:$0xff] }
  0x88   : > { %561 = vmatpush.bf16.msrb.mxu3 %v1326_v21  ;;  %v1310_v16 = vor.u32 %v2974_v22, %v2973_v5  ;;  %v2981_v17 = vld [vmem:[#allocation48_spill] sm:$0xff] }
  0x89   : > { %319 = vmatmul.bf16.vlgmr.msra.gmra.mxu1 %v136_v8  ;;  %347 = vmatmul.bf16.vlgmr.msra.gmra.mxu3 %v136_v8  ;;  %v1294_v21 = vor.u32 %v2982_v19, %v2981_v17  ;;  %v2990_v5 = vld [vmem:[#allocation36_spill] sm:$0xff] }
  0x8a   : > { %533 = vmatpush.bf16.msrb.mxu1 %v1318_v15  ;;  %305 = vmatmul.bf16.vlgmr.msra.gmra.mxu0 %v136_v8  ;;  %v2980_v15 = vld [vmem:[#allocation49_spill] sm:$0xff]  ;;  %v2984_v8 = vld [vmem:[#allocation39_spill] sm:$0xff]  ;;  %v2998_v17 = vld [vmem:[#allocation28_spill] sm:$0xff] }
  0x8b   : > { %519 = vmatpush.bf16.msrb.mxu0 %v1314_v23  ;;  %v2977_v23 = vld [vmem:[#allocation46_spill] sm:$0xff]  ;;  %548 = vmatpush.bf16.msrb.mxu2 %v1306_v25  ;;  %v1290_v13 = vor.u32 %v2980_v15, %v2979_v4  ;;  %v1266_v11 = vor.u32 %v2984_v8, %v2983_v10  ;;  %v2989_v25 = vld [vmem:[#allocation40_spill] sm:$0xff]  ;;  %v2996_v4 = vld [vmem:[#allocation33_spill] sm:$0xff] }
  0x8c   : > { %v1286_v18 = vor.u32 %v2978_v60, %v2977_v23  ;;  %562 = vmatpush.bf16.msrb.mxu3 %v1310_v16  ;;  %v1278_v22 = vor.u32 %v2990_v5, %v2989_v25  ;;  %v2991_v16 = vld [vmem:[#allocation27_spill] sm:$0xff]  ;;  %v2994_v23 = vld [vmem:[#allocation26_spill] sm:$0xff]  ;;  %v3006_v25 = vld [vmem:[#allocation20_spill] sm:$0xff] }
  0x8d   : > { %v1250_v9 = vor.u32 %v2992_v7, %v2991_v16  ;;  %v3000_v10 = vld [vmem:[#allocation23_spill] sm:$0xff] }
  0x8e   : > { %534 = vmatpush.bf16.msrb.mxu1 %v1302_v1  ;;  %v2987_v1 = vld [vmem:[#allocation37_spill] sm:$0xff]  ;;  %v3008_v16 = vld [vmem:[#allocation15_spill] sm:$0xff] }
  0x8f   : > { %520 = vmatpush.bf16.msrb.mxu0 %v1298_v12  ;;  %v2985_v12 = vld [vmem:[#allocation38_spill] sm:$0xff]  ;;  %549 = vmatpush.bf16.msrb.mxu2 %v1290_v13  ;;  %v1274_v56 = vor.u32 %v2988_v24, %v2987_v1  ;;  %v2997_v13 = vld [vmem:[#allocation32_spill] sm:$0xff]  ;;  %v3004_v1 = vld [vmem:[#allocation25_spill] sm:$0xff] }
  0x90   : > { %v1270_v6 = vor.u32 %v2986_v20, %v2985_v12  ;;  %563 = vmatpush.bf16.msrb.mxu3 %v1294_v21  ;;  %v1262_v19 = vor.u32 %v2998_v17, %v2997_v13  ;;  %v2999_v21 = vld [vmem:[#allocation19_spill] sm:$0xff]  ;;  %v3002_v12 = vld [vmem:[#allocation18_spill] sm:$0xff]  ;;  %v3014_v13 = vld [vmem:[#allocation12_spill] sm:$0xff] }
  0x91   : > { %v1234_v8 = vor.u32 %v3000_v10, %v2999_v21  ;;  %v3016_v21 = vld [vmem:[#allocation7_spill] sm:$0xff] }
  0x92   : > { %535 = vmatpush.bf16.msrb.mxu1 %v1286_v18  ;;  %v2995_v18 = vld [vmem:[#allocation29_spill] sm:$0xff] }
  0x93   : > { %521 = vmatpush.bf16.msrb.mxu0 %v1282_v14  ;;  %v2993_v14 = vld [vmem:[#allocation30_spill] sm:$0xff]  ;;  %550 = vmatpush.bf16.msrb.mxu2 %v1274_v56  ;;  %v1258_v15 = vor.u32 %v2996_v4, %v2995_v18  ;;  %v3005_v56 = vld [vmem:[#allocation24_spill] sm:$0xff]  ;;  %v3012_v18 = vld [vmem:[#allocation17_spill] sm:$0xff] }
  0x94   : > { %v1254_v60 = vor.u32 %v2994_v23, %v2993_v14  ;;  %564 = vmatpush.bf16.msrb.mxu3 %v1278_v22  ;;  %v1246_v5 = vor.u32 %v3006_v25, %v3005_v56  ;;  %v3007_v22 = vld [vmem:[#allocation11_spill] sm:$0xff]  ;;  %v3010_v14 = vld [vmem:[#allocation10_spill] sm:$0xff]  ;;  %v3022_v56 = vld [vmem:[#allocation4_spill] sm:$0xff] }
  0x95   : > { %v1218_v7 = vor.u32 %v3008_v16, %v3007_v22 }
  0x96   : > { %536 = vmatpush.bf16.msrb.mxu1 %v1270_v6  ;;  %v3003_v6 = vld [vmem:[#allocation21_spill] sm:$0xff] }
  0x97   : > { %522 = vmatpush.bf16.msrb.mxu0 %v1266_v11  ;;  %v3001_v11 = vld [vmem:[#allocation22_spill] sm:$0xff]  ;;  %551 = vmatpush.bf16.msrb.mxu2 %v1258_v15  ;;  %v1242_v24 = vor.u32 %v3004_v1, %v3003_v6  ;;  %v3013_v15 = vld [vmem:[#allocation16_spill] sm:$0xff]  ;;  %v3020_v6 = vld [vmem:[#allocation9_spill] sm:$0xff] }
  0x98   : > { %v1238_v20 = vor.u32 %v3002_v12, %v3001_v11  ;;  %565 = vmatpush.bf16.msrb.mxu3 %v1262_v19  ;;  %v1230_v17 = vor.u32 %v3014_v13, %v3013_v15  ;;  %v3015_v19 = vld [vmem:[#allocation3_spill] sm:$0xff]  ;;  %v3018_v11 = vld [vmem:[#allocation2_spill] sm:$0xff] }
  0x99   : > { %v1202_v10 = vor.u32 %v3016_v21, %v3015_v19  ;;  %v3023_v19 = vld [vmem:[#allocation98_spill] sm:$0xff] }
  0x9a   : > { %537 = vmatpush.bf16.msrb.mxu1 %v1254_v60  ;;  %v3011_v60 = vld [vmem:[#allocation13_spill] sm:$0xff]  ;;  %v3024_v21 = vperm.slane %v3023_v19, 0 }
  0x9b   : > { %523 = vmatpush.bf16.msrb.mxu0 %v1250_v9  ;;  %v3009_v9 = vld [vmem:[#allocation14_spill] sm:$0xff]  ;;  %552 = vmatpush.bf16.msrb.mxu2 %v1242_v24  ;;  %v1226_v4 = vor.u32 %v3012_v18, %v3011_v60  ;;  %v3021_v24 = vld [vmem:[#allocation8_spill] sm:$0xff] }
  0x9c   : > { %v1222_v23 = vor.u32 %v3010_v14, %v3009_v9  ;;  %566 = vmatpush.bf16.msrb.mxu3 %v1246_v5  ;;  %v1214_v25 = vor.u32 %v3022_v56, %v3021_v24  ;;  %v1430_v5 = vld [vmem:[%s133_s24] sm:$0xff] }
  0x9e   : > { %538 = vmatpush.bf16.msrb.mxu1 %v1238_v20  ;;  %v3019_v20 = vld [vmem:[#allocation5_spill] sm:$0xff] }
  0x9f   : > { %524 = vmatpush.bf16.msrb.mxu0 %v1234_v8  ;;  %v3017_v8 = vld [vmem:[#allocation6_spill] sm:$0xff]  ;;  %553 = vmatpush.bf16.msrb.mxu2 %v1226_v4  ;;  %v1210_v1 = vor.u32 %v3020_v6, %v3019_v20 }
  0xa0   : > { %v1206_v12 = vor.u32 %v3018_v11, %v3017_v8  ;;  %567 = vmatpush.bf16.msrb.mxu3 %v1230_v17  ;;  %v3025_v8 = vperm.slane %v3023_v19, 1 }
  0xa2   : > { %539 = vmatpush.bf16.msrb.mxu1 %v1222_v23 }
  0xa3   : > { %525 = vmatpush.bf16.msrb.mxu0 %v1218_v7  ;;  %554 = vmatpush.bf16.msrb.mxu2 %v1210_v1 }
  0xa4   : > { %568 = vmatpush.bf16.msrb.mxu3 %v1214_v25 }
  0xa6   : > { %540 = vmatpush.bf16.msrb.mxu1 %v1206_v12  ;;  %555 = vmatmul.bf16.vlgmr.msrb.gmra.mxu2 %v1430_v5 }
  0xa7   : > { %526 = vmatpush.bf16.msrb.mxu0 %v1202_v10  ;;  %569 = vmatmul.bf16.vlgmr.msrb.gmra.mxu3 %v1430_v5 }
  0xa9   : > { %541 = vmatmul.bf16.vlgmr.msrb.gmra.mxu1 %v1430_v5 }
  0xaa   : > { %527 = vmatmul.bf16.vlgmr.msrb.gmra.mxu0 %v1430_v5  ;;  %956 = vmatpush.msra.mxu1 (%p117_p0), %v951_v54 }
  0xac   :  { %957 = vmatpush.msra.mxu1 (%p117_p0), %v950_v55 }
  0xae   :  { %958 = vmatpush.msra.mxu1 (%p117_p0), %v949_v57 }
  0xb0   :  { %959 = vmatpush.msra.mxu1 (%p117_p0), %v948_v58 }
  0xb2   :  { %960 = vmatpush.msra.mxu1 (%p117_p0), %v947_v61 }
  0xb4   :  { %961 = vmatpush.msra.mxu1 (%p117_p0), %v946_v63 }
 0x106   : > { %v320_v16 = vpop.f32.mrf.mxu1 }
 0x107   : > { %v306_v22 = vpop.f32.mrf.mxu0 }
 0x109   : > { %v334_v9 = vpop.f32.mrf.mxu2 }
 0x10c   : > { %v348_v7 = vpop.f32.mrf.mxu3 }
 0x10e   : > { %v322_v23 = vpop.f32.mrf.mxu1 }
 0x10f   : > { %v308_v14 = vpop.f32.mrf.mxu0 }
 0x111   : > { %v336_v18 = vpop.f32.mrf.mxu2 }
 0x114   : > { %v350_v60 = vpop.f32.mrf.mxu3 }
 0x126   : > { %v542_v15 = vpop.f32.mrf.mxu1 }
 0x127   : > { %v528_v4 = vpop.f32.mrf.mxu0  ;;  %v543_v17 = vadd.f32 %v542_v15, %v320_v16 }
 0x128   : > { %v529_v13 = vadd.f32 %v528_v4, %v306_v22  ;;  %v3026_v22 = vperm.slane %v3023_v19, 3  ;;  %v3027_v4 = vmov %v3024_v21 }
 0x129   : > { %v576_v11 = vadd.f32 %v543_v17, %v3025_v8  ;;  %v556_v26 = vpop.f32.mrf.mxu2 }
 0x12a   : > { %v575_v10 = vadd.f32 %v529_v13, %v3024_v21  ;;  %v570_v6 = vpop.f32.mrf.mxu3  ;;  %v3028_v13 = vmov %v3025_v8 }
 0x12b   : > { %v1329_v20 = vmul.f32 -1.442695, %v576_v11  ;;  %v571_v1 = vadd.f32 %v570_v6, %v348_v7  ;;  %v557_v7 = vadd.f32 %v556_v26, %v334_v9  ;;  %v3029_v6 = vperm.slane %v3023_v19, 2 }
 0x12c   : > { %v1327_v12 = vmul.f32 -1.442695, %v575_v10 }
 0x12d   : > { %v578_v16 = vadd.f32 %v571_v1, %v3026_v22  ;;  %v577_v1 = vadd.f32 %v557_v7, %v3029_v6 }
 0x12e   : > { %1529 = vpow2.f32 %v1327_v12  ;;  %v544_v56 = vpop.f32.mrf.mxu1 }
 0x12f   : > { %1531 = vpow2.f32 %v1329_v20  ;;  %v530_v24 = vpop.f32.mrf.mxu0  ;;  %v545_v5 = vadd.f32 %v544_v56, %v322_v23  ;;  %v1331_v21 = vmul.f32 -1.442695, %v578_v16  ;;  %v3030_v16 = vperm.slane %v3023_v19, 3 }
 0x130   : > { %v531_v25 = vadd.f32 %v530_v24, %v308_v14 }
 0x131   : > { %v580_v17 = vadd.f32 %v545_v5, %v3028_v13  ;;  %1533 = vpow2.f32 %v1331_v21 }
 0x132   : > { %v579_v15 = vadd.f32 %v531_v25, %v3027_v4  ;;  %v572_v23 = vpop.f32.mrf.mxu3  ;;  %v558_v25 = vpop.f32.mrf.mxu2 }
 0x133   : > { %v1330_v20 = vmul.f32 -1.442695, %v580_v17  ;;  %v573_v24 = vadd.f32 %v572_v23, %v350_v60  ;;  %v559_v17 = vadd.f32 %v558_v25, %v336_v18  ;;  %v3031_v18 = vperm.slane %v3023_v19, 2 }
 0x134   : > { %v1530_v10 = vpop.eup %1529  ;;  %v1328_v8 = vmul.f32 -1.442695, %v579_v15 }
 0x135   : > { %v1532_v11 = vpop.eup %1531  ;;  %v589_v12 = vadd.f32 1.0, %v1530_v10  ;;  %v582_v26 = vadd.f32 %v573_v24, %v3030_v16 }
 0x136   : > { %v627_v14 = vadd.f32 1.0, %v1532_v11  ;;  %1535 = vpow2.f32 %v1328_v8 }
 0x137   : > { %1537 = vrcp.f32 %v589_v12  ;;  %v1534_v56 = vpop.eup %1533  ;;  %v1332_v21 = vmul.f32 -1.442695, %v582_v26  ;;  %v600_v11 = vand.u32 2147483647, %v589_v12  ;;  %v602_v7 = vand.u32 2147483648, %v589_v12 }
 0x138   : > { %1539 = vrcp.f32 %v627_v14  ;;  %v2603_v22 = vadd.f32 1.0, %v1534_v56  ;;  %v640_v6 = vand.u32 2147483648, %v627_v14  ;;  %v581_v56 = vadd.f32 %v559_v17, %v3031_v18 }
 0x139   : > { %1541 = vpow2.f32 %v1330_v20  ;;  %vm634_vm2 = vweird.f32 %v627_v14  ;;  %vm596_vm3 = vweird.f32 %v589_v12  ;;  %vm601_vm4 = vcmp.eq.f32.partialorder %v600_v11, 8.507059e+37 }
 0x13a   : > { %1543 = vtanh.f32 %v577_v1  ;;  %v638_v1 = vand.u32 2147483647, %v627_v14  ;;  %vm674_vm14 = vweird.f32 %v2603_v22 }
 0x13b   : > { %1545 = vrcp.f32 %v2603_v22 }
 0x13c   : > { %v1536_v5 = vpop.eup %1535  ;;  %vm639_vm7 = vcmp.eq.f32.partialorder %v638_v1, 8.507059e+37 }
 0x13d   : > { %v1538_v9 = vpop.eup %1537  ;;  %v2607_v4 = vadd.f32 1.0, %v1536_v5 }
 0x13e   : > { %v1540_v15 = vpop.eup %1539  ;;  %v592_v13 = vmul.f32 %v1538_v9, %v589_v12  ;;  %vm597_vm0 = vweird.f32 %v1538_v9 }
 0x13f   : > { %v1542_v10 = vpop.eup %1541  ;;  %v630_v60 = vmul.f32 %v1540_v15, %v627_v14  ;;  %1547 = vrcp.f32 %v2607_v4  ;;  %vm635_vm1 = vweird.f32 %v1540_v15  ;;  %vm598_vm5 = vmor %vm596_vm3, %vm597_vm0  ;;  %v617_v12 = vand.u32 2147483648, %v2607_v4 }
 0x140   : > { %v593_v8 = vsub.f32 1.0, %v592_v13  ;;  %v2611_v20 = vadd.f32 1.0, %v1542_v10  ;;  %1549 = vpow2.f32 %v1332_v21  ;;  %v1544_v25 = vpop.eup %1543  ;;  %v641_v10 = vor.u32 1.1754944e-38, %v640_v6  ;;  %vm636_vm6 = vmor %vm634_vm2, %vm635_vm1 }
 0x141   : > { %v631_v23 = vsub.f32 1.0, %v630_v60  ;;  %v2616_v16 = vpop.eup %1545  ;;  %v603_v21 = vor.u32 1.1754944e-38, %v602_v7  ;;  %vm611_vm8 = vweird.f32 %v2607_v4 }
 0x142   : > { %v594_v24 = vmul.f32 %v1538_v9, %v593_v8  ;;  %1551 = vrcp.f32 %v2611_v20  ;;  %v670_v8 = vmul.f32 %v2616_v16, %v2603_v22  ;;  %vm675_vm10 = vweird.f32 %v2616_v16 }
 0x143   : > { %v632_v5 = vmul.f32 %v1540_v15, %v631_v23  ;;  %1553 = vtanh.f32 %v581_v56  ;;  %v655_v56 = vand.u32 2147483648, %v2611_v20  ;;  %vm649_vm15 = vweird.f32 %v2611_v20  ;;  %vm2640_vm0 = vmor %vm674_vm14, %vm675_vm10 }
 0x144   : > { %v595_v26 = vadd.f32 %v1538_v9, %v594_v24  ;;  %v671_v11 = vsub.f32 1.0, %v670_v8 }
 0x145   : > { %v1548_v13 = vpop.eup %1547  ;;  %v633_v60 = vadd.f32 %v1540_v15, %v632_v5 }
 0x146   : > { %v599_v19 = vsel %vm598_vm5, %v1538_v9, %v595_v26  ;;  %v607_v17 = vmul.f32 %v1548_v13, %v2607_v4  ;;  %v1550_v23 = vpop.eup %1549  ;;  %v672_v9 = vmul.f32 %v2616_v16, %v671_v11  ;;  %vm612_vm9 = vweird.f32 %v1548_v13 }
 0x147   : > { %v604_v18 = vsel %vm601_vm4, %v603_v21, %v599_v19  ;;  %v637_v14 = vsel %vm636_vm6, %v1540_v15, %v633_v60  ;;  %v668_v5 = vadd.f32 1.0, %v1550_v23  ;;  %v615_v19 = vand.u32 2147483647, %v2607_v4  ;;  %vm613_vm12 = vmor %vm611_vm8, %vm612_vm9 }
 0x148   : > { %v1552_v24 = vpop.eup %1551  ;;  %v642_v6 = vsel %vm639_vm7, %v641_v10, %v637_v14  ;;  %v701_v27 = vmul.f32 %v1544_v25, %v604_v18  ;;  %v608_v7 = vsub.f32 1.0, %v607_v17  ;;  %v618_v25 = vor.u32 1.1754944e-38, %v617_v12  ;;  %v3035_v18 = vld [vmem:[#allocation104_spill] sm:$0xff] }
 0x149   : > { %v699_v28 = vmul.f32 %v1673_v2, %v642_v6  ;;  %v645_v29 = vmul.f32 %v1552_v24, %v2611_v20  ;;  %1555 = vrcp.f32 %v668_v5  ;;  %v1554_v26 = vpop.eup %1553  ;;  %v653_v21 = vand.u32 2147483647, %v2611_v20 }
 0x14a   : > { %v609_v1 = vmul.f32 %v1548_v13, %v608_v7  ;;  %v673_v60 = vadd.f32 %v2616_v16, %v672_v9  ;;  %vm650_vm11 = vweird.f32 %v1552_v24  ;;  %vm616_vm13 = vcmp.eq.f32.partialorder %v615_v19, 8.507059e+37 }
 0x14b   : > { %v2627_v2 = vadd.f32 %v701_v27, %v699_v28   ;;  %v646_v15 = vsub.f32 1.0, %v645_v29  ;;  %v680_v27 = vand.u32 2147483648, %v2603_v22  ;;  %v678_v29 = vand.u32 2147483647, %v2603_v22  ;;  %vm651_vm1 = vmor %vm649_vm15, %vm650_vm11 }
 0x14c   : > { %v610_v10 = vadd.f32 %v1548_v13, %v609_v1  ;;  %v656_v14 = vor.u32 1.1754944e-38, %v655_v56  ;;  %vm654_vm2 = vcmp.eq.f32.partialorder %v653_v21, 8.507059e+37  ;;  %vm689_vm5 = vweird.f32 %v668_v5 }
 0x14d   : > { %v647_v8 = vmul.f32 %v1552_v24, %v646_v15  ;;  %1557 = vtanh.f32 %v2627_v2  ;;  %v681_v22 = vor.u32 1.1754944e-38, %v680_v27  ;;  %vm679_vm3 = vcmp.eq.f32.partialorder %v678_v29, 8.507059e+37 }
 0x14e   : > { %v614_v28 = vsel %vm613_vm12, %v1548_v13, %v610_v10  ;;  %v677_v13 = vsel %vm2640_vm0, %v2616_v16, %v673_v60 }
 0x14f   : > { %v619_v17 = vsel %vm616_vm13, %v618_v25, %v614_v28  ;;  %v648_v23 = vadd.f32 %v1552_v24, %v647_v8  ;;  %v1556_v4 = vpop.eup %1555  ;;  %v682_v19 = vsel %vm679_vm3, %v681_v22, %v677_v13 }
 0x150   : > { %v702_v11 = vmul.f32 %v1554_v26, %v619_v17  ;;  %v685_v6 = vmul.f32 %v1556_v4, %v668_v5  ;;  %vm690_vm4 = vweird.f32 %v1556_v4  ;;  %v693_v26 = vand.u32 2147483647, %v668_v5 }
 0x151   : > { %v652_v12 = vsel %vm651_vm1, %v1552_v24, %v648_v23  ;;  %v695_v24 = vand.u32 2147483648, %v668_v5  ;;  %vm691_vm6 = vmor %vm689_vm5, %vm690_vm4 }
 0x152   : > { %v657_v7 = vsel %vm654_vm2, %v656_v14, %v652_v12  ;;  %v686_v1 = vsub.f32 1.0, %v685_v6  ;;  %vm694_vm7 = vcmp.eq.f32.partialorder %v693_v26, 8.507059e+37 }
 0x153   : > { %v1558_v20 = vpop.eup %1557  ;;  %v700_v9 = vmul.f32 %v1669_v3, %v657_v7  ;;  %v696_v21 = vor.u32 1.1754944e-38, %v695_v24 }
 0x154   : > { %v2648_v15 = vmul.f32 %v1558_v20, %v682_v19   ;;  %v687_v56 = vmul.f32 %v1556_v4, %v686_v1  ;;  %v3037_v19 = vld [vmem:[#allocation102_spill] sm:$0xff] }
 0x155   : > { %v704_v3 = vadd.f32 %v702_v11, %v700_v9   ;;  %v3036_v11 = vld [vmem:[#allocation103_spill] sm:$0xff] }
 0x156   : > { %v3034_v25 = vmov %v2648_v15  ;;  %v688_v16 = vadd.f32 %v1556_v4, %v687_v56  ;;  %v3038_v56 = vld [vmem:[#allocation100_spill] sm:$0xff] }
 0x157   : > { %1559 = vtanh.f32 %v3034_v25 }
 0x158   : > { %1561 = vtanh.f32 %v704_v3  ;;  %v692_v10 = vsel %vm691_vm6, %v1556_v4, %v688_v16 }
 0x159   : > { %v697_v28 = vsel %vm694_vm7, %v696_v21, %v692_v10 }
 0x15d   : > { %v1560_v60 = vpop.eup %1559 }
 0x15e   : > { %v1562_v8 = vpop.eup %1561  ;;  %v711_v27 = vmul.f32 %v1560_v60, %v2400_v0 }
 0x15f   : > { %v708_v7 = vmul.f32 %v1562_v8, %v697_v28   ;;  %v3040_v28 = vld [vmem:[#allocation101_spill] sm:$0xff] }
 0x160   : > { %713 = vadd.xlane.f32.xlu0 %v711_v27 }
 0x161   : > { %1563 = vtanh.f32 %v708_v7 }
 0x167   : > { %v1564_v29 = vpop.eup %1563 }
 0x168   : > { %v712_v17 = vmul.f32 %v1564_v29, %v2400_v0 }
 0x16a   : > { %715 = vadd.xlane.f32.xlu0 %v712_v17  ;;  %v3041_v17 = vld [vmem:[#allocation99_spill] sm:$0xff] }
 0x1d3   : > { %v714_v23 = vpop.xlane.xlu0 %713 }
 0x1d4   : > { %v717_v1 = vmax.f32 %v3035_v18, %v714_v23  }
 0x1d6   : > { %v719_v5 = vsub.f32 %v3035_v18, %v717_v1  ;;  %v725_v4 = vsub.f32 %v714_v23, %v717_v1  ;;  %v945_v1 = vld [vmem:[%s2811_s7 + $0x48] sm:$0xff] (%p117_p0) }
 0x1d7   :  { %962 = vmatpush.msra.mxu1 (%p117_p0), %v945_v1 }
 0x1d8   : > { %v721_v14 = vmul.f32 1.442695, %v719_v5  ;;  %v727_v13 = vmul.f32 1.442695, %v725_v4 }
 0x1da   : > { %1565 = vpow2.f32 %v721_v14 }
 0x1db   : > { %1567 = vpow2.f32 %v727_v13 }
 0x1dd   : > { %v716_v12 = vpop.xlane.xlu0 %715 }
 0x1de   : > { %v718_v5 = vmax.f32 %v3036_v11, %v716_v12  }
 0x1e0   : > { %v1566_v6 = vpop.eup %1565  ;;  %v720_v22 = vsub.f32 %v3036_v11, %v718_v5  ;;  %v726_v20 = vsub.f32 %v716_v12, %v718_v5  ;;  %v1438_v11 = vld [vmem:[%s2809_s5 + $0x38] sm:$0xff] (%p117_p0) }
 0x1e1   : > { %v1568_v9 = vpop.eup %1567  ;;  %v731_v15 = vmul.f32 %v3037_v19, %v1566_v6  ;;  %v735_v16 = vmul.f32 %v3038_v56, %v1566_v6  ;;  %842 = vmatpush.bf16.msra.mxu0 (%p117_p0), %v1438_v11  ;;  %v936_v11 = vld [vmem:[%s2811_s7] sm:$0xff] (%p117_p0) }
 0x1e2   : > { %v737_v24 = vmul.f32 %v1568_v9, %v3034_v25  ;;  %v723_v26 = vmul.f32 1.442695, %v720_v22  ;;  %v729_v10 = vmul.f32 1.442695, %v726_v20  ;;  %v1437_v22 = vld [vmem:[%s2809_s5 + $0x30] sm:$0xff] (%p117_p0) }
 0x1e3   : > { %v733_v21 = vadd.f32 %v1568_v9, %v731_v15   ;;  %v3046_v9 = vmov %v3034_v25  ;;  %v1436_v25 = vld [vmem:[%s2809_s5 + $0x28] sm:$0xff] (%p117_p0) }
 0x1e4   : > { %v2660_v6 = vadd.f32 %v737_v24, %v735_v16   ;;  %1569 = vpow2.f32 %v723_v26  ;;  %v942_v16 = vld [vmem:[%s2811_s7 + $0x30] sm:$0xff] (%p117_p0) }
 0x1e5   : > { %1571 = vpow2.f32 %v729_v10  ;;  %v3045_v13 = vmov %v733_v21  ;;  %843 = vmatpush.bf16.msra.mxu0 (%p117_p0), %v1437_v22  ;;  %vm746_vm8 = vweird.f32 (%p117_p0), %v733_v21  ;;  %v752_v0 = vand.u32 (%p117_p0), 2147483648, %v733_v21  ;;  %v941_v10 = vld [vmem:[%s2811_s7 + $0x28] sm:$0xff] (%p117_p0) }
 0x1e6   : > { %v3039_v60 = vmov %v2660_v6  ;;  %1575 = vrcp.f32 (%p117_p0), %v733_v21  ;;  %v750_v30 = vand.u32 (%p117_p0), 2147483647, %v733_v21 }
 0x1e7   : > { %v3043_v6 = vmov %v3039_v60  ;;  %v753_v36 = vor.u32 (%p117_p0), 1.1754944e-38, %v752_v0 }
 0x1e8   :  { %vm751_vm13 = vcmp.eq.f32.partialorder (%p117_p0), %v750_v30, 8.507059e+37  ;;  %v943_v6 = vld [vmem:[%s2811_s7 + $0x38] sm:$0xff] (%p117_p0) }
 0x1e9   :  { %844 = vmatpush.bf16.msra.mxu0 (%p117_p0), %v1436_v25 }
 0x1ea   : > { %v1570_v8 = vpop.eup %1569 }
 0x1eb   : > { %v1572_v27 = vpop.eup %1571  ;;  %v732_v29 = vmul.f32 %v3040_v28, %v1570_v8  ;;  %v736_v23 = vmul.f32 %v3041_v17, %v1570_v8 }
 0x1ec   : > { %v738_v18 = vmul.f32 %v1572_v27, %v708_v7  ;;  %119 = sbr.rel (!%p117_p0) target bundleno = 99 (0x63), region = 76  ;;  %v1576_v20 = vpop.eup (%p117_p0), %1575 }
 0x1ed   : > { %v734_v14 = vadd.f32 %v1572_v27, %v732_v29   ;;  %v742_v19 = vmul.f32 (%p117_p0), %v1576_v20, %v733_v21  ;;  %vm747_vm9 = vweird.f32 (%p117_p0), %v1576_v20  ;;  %845 = vmatpush.bf16.msra.mxu0 (%p117_p0), %v1435_v32  ;;  %v939_v27 = vld [vmem:[%s2811_s7 + $0x18] sm:$0xff] (%p117_p0)  ;;  %v938_v29 = vld [vmem:[%s2811_s7 + $0x10] sm:$0xff] (%p117_p0) }
 0x1ee   : > { %v740_v12 = vadd.f32 %v738_v18, %v736_v23   ;;  %vm748_vm12 = vmor (%p117_p0), %vm746_vm8, %vm747_vm9 }
 0x1ef   : > { %v3044_v15 = vmov %v734_v14  ;;  %1577 = vrcp.f32 (%p117_p0), %v734_v14  ;;  %v743_v3 = vsub.f32 (%p117_p0), 1.0, %v742_v19  ;;  %v767_v31 = vand.u32 (%p117_p0), 2147483648, %v734_v14 }
 0x1f0   : > { %v3042_v4 = vmov %v740_v12  ;;  %vm761_vm10 = vweird.f32 (%p117_p0), %v734_v14  ;;  %v765_v34 = vand.u32 (%p117_p0), 2147483647, %v734_v14 }
 0x1f1   :  { %v744_v35 = vmul.f32 %v1576_v20, %v743_v3  ;;  %v768_v39 = vor.u32 1.1754944e-38, %v767_v31  ;;  %846 = vmatpush.bf16.msra.mxu0 %v1434_v40  ;;  %v944_v4 = vld [vmem:[%s2811_s7 + $0x40] sm:$0xff] }
 0x1f2   :  { %vm766_vm15 = vcmp.eq.f32.partialorder %v765_v34, 8.507059e+37  ;;  %963 = vmatpush.msra.mxu1 %v944_v4 }
 0x1f3   :  { %v745_v38 = vadd.f32 %v1576_v20, %v744_v35 }
 0x1f4   :  { %964 = vmatpush.msra.mxu1 %v943_v6 }
 0x1f5   :  { %v1578_v9 = vpop.eup %1577  ;;  %v749_v42 = vsel %vm748_vm12, %v1576_v20, %v745_v38  ;;  %847 = vmatpush.bf16.msra.mxu0 %v1433_v47 }
 0x1f6   :  { %v757_v2 = vmul.f32 %v1578_v9, %v734_v14  ;;  %vm762_vm11 = vweird.f32 %v1578_v9  ;;  %v754_v43 = vsel %vm751_vm13, %v753_v36, %v749_v42  ;;  %965 = vmatpush.msra.mxu1 %v942_v16  ;;  %v937_v14 = vld [vmem:[%s2811_s7 + $0x8] sm:$0xff] }
 0x1f7   :  { %vm763_vm14 = vmor %vm761_vm10, %vm762_vm11  ;;  %v755_v45 = vmul.f32 %v754_v43, %v3039_v60  ;;  %v940_v60 = vld [vmem:[%s2811_s7 + $0x20] sm:$0xff] }
 0x1f8   :  { %v758_v33 = vsub.f32 1.0, %v757_v2  ;;  %966 = vmatpush.msra.mxu1 %v941_v10 }
 0x1f9   :  { %1579 = vtanh.f32 %v755_v45  ;;  %848 = vmatpush.bf16.msra.mxu0 %v1432_v49 }
 0x1fa   :  { %v759_v37 = vmul.f32 %v1578_v9, %v758_v33  ;;  %967 = vmatpush.msra.mxu1 %v940_v60 }
 0x1fc   :  { %v760_v41 = vadd.f32 %v1578_v9, %v759_v37  ;;  %968 = vmatpush.msra.mxu1 %v939_v27 }
 0x1fd   :  { %849 = vmatpush.bf16.msra.mxu0 %v1431_v52 }
 0x1fe   :  { %v764_v44 = vsel %vm763_vm14, %v1578_v9, %v760_v41  ;;  %969 = vmatpush.msra.mxu1 %v938_v29 }
 0x1ff   :  { %v769_v46 = vsel %vm766_vm15, %v768_v39, %v764_v44  ;;  %v1580_v50 = vpop.eup %1579 }
 0x200   :  { %v770_v48 = vmul.f32 %v769_v46, %v740_v12  ;;  %970 = vmatpush.msra.mxu1 %v937_v14  ;;  %v981_v14 = vlaneseq }
 0x202   :  { %1581 = vtanh.f32 %v770_v48  ;;  %971 = vmatpush.msra.mxu1 %v936_v11 }
 0x208   :  { %v1582_v51 = vpop.eup %1581 }
 0x209   :  { %v773_v53 = vpack.c.bf16 %v1582_v51, %v1580_v50 }
 0x20b   :  { %850 = vmatmul.bf16.vlgmr.msra.gmra.mxu0 %v773_v53 }
 0x288   :  { %v851_v62 = vpop.f32.mrf.mxu0 }
 0x289   :  { %v2736_v7 = vadd.f32 %v1573_v59, %v851_v62 }
 0x28b   :  { %v2742_v5 = vmul.f32 0.70710677, %v2736_v7  ;;  %v856_v16 = vmul.f32 0.5, %v2736_v7  ;;  %v1574_v7 = vld [vmem:[%s2812_s8] ss:$0 sm:$0xff] }
 0x28d   :  { %v864_v13 = vand.u32 2147483647, %v2742_v5  ;;  %vm860_vm8 = vcmp.ge.f32.partialorder %v2742_v5, 0.0 }
 0x28f   :  { %v866_v15 = vmul.f32 0.3275911, %v864_v13  ;;  %v918_v30 = vsub.f32 0.0, %v864_v13 }
 0x290   :  { %v853_v56 = vpop.f32.mrf.mxu0 }
 0x291   :  { %v868_v24 = vadd.f32 1.0, %v866_v15  ;;  %v2754_v26 = vadd.f32 %v1573_v59, %v853_v56  ;;  %v920_v38 = vmul.f32 %v918_v30, %v864_v13  ;;  %v1687_v13 = vmov -1.0  }
 0x292   :  { %v862_v6 = vsel %vm860_vm8, 1.0, %v1687_v13 }
 0x293   :  { %1583 = vrcp.f32 %v868_v24  ;;  %v2760_v21 = vmul.f32 0.70710677, %v2754_v26  ;;  %v881_v22 = vand.u32 2147483648, %v868_v24  ;;  %v879_v25 = vand.u32 2147483647, %v868_v24 }
 0x294   :  { %vm875_vm1 = vweird.f32 %v868_v24  ;;  %v922_v44 = vmul.f32 1.442695, %v920_v38  ;;  %v1008_v38 = vld [vmem:[%s2813_s9] sm:$0xff] }
 0x295   :  { %v865_v8 = vand.u32 2147483647, %v2760_v21  ;;  %v882_v0 = vor.u32 1.1754944e-38, %v881_v22  ;;  %vm880_vm3 = vcmp.eq.f32.partialorder %v879_v25, 8.507059e+37  ;;  %vm861_vm9 = vcmp.ge.f32.partialorder %v2760_v21, 0.0 }
 0x297   :  { %v867_v28 = vmul.f32 0.3275911, %v865_v8  ;;  %v919_v45 = vsub.f32 0.0, %v865_v8 }
 0x299   :  { %v1584_v17 = vpop.eup %1583  ;;  %v869_v23 = vadd.f32 1.0, %v867_v28  ;;  %v921_v51 = vmul.f32 %v919_v45, %v865_v8  ;;  %v863_v28 = vsel %vm861_vm9, 1.0, %v1687_v13 }
 0x29a   :  { %v871_v18 = vmul.f32 %v1584_v17, %v868_v24  ;;  %vm876_vm0 = vweird.f32 %v1584_v17 }
 0x29b   :  { %1585 = vrcp.f32 %v869_v23  ;;  %vm877_vm2 = vmor %vm875_vm1, %vm876_vm0  ;;  %v896_v34 = vand.u32 2147483648, %v869_v23  ;;  %v894_v37 = vand.u32 2147483647, %v869_v23  ;;  %vm890_vm5 = vweird.f32 %v869_v23 }
 0x29c   :  { %v872_v12 = vsub.f32 1.0, %v871_v18  ;;  %1587 = vpow2.f32 %v922_v44  ;;  %v924_v57 = vmul.f32 1.442695, %v921_v51  ;;  %v1009_v44 = vld [vmem:[%s2813_s9 + $0x8] sm:$0xff] }
 0x29d   :  { %v897_v41 = vor.u32 1.1754944e-38, %v896_v34  ;;  %vm895_vm7 = vcmp.eq.f32.partialorder %v894_v37, 8.507059e+37 }
 0x29e   :  { %v873_v20 = vmul.f32 %v1584_v17, %v872_v12  ;;  %1589 = vpow2.f32 %v924_v57  ;;  %v982_v12 = vand.u32 127, %v981_v14 }
 0x2a0   :  { %v874_v9 = vadd.f32 %v1584_v17, %v873_v20  ;;  %vm983_vm10 = vcmp.lt.s32.totalorder %v982_v12, 2 }
 0x2a1   :  { %v1586_v19 = vpop.eup %1585 }
 0x2a2   :  { %v886_v2 = vmul.f32 %v1586_v19, %v869_v23  ;;  %v878_v3 = vsel %vm877_vm2, %v1584_v17, %v874_v9  ;;  %vm891_vm4 = vweird.f32 %v1586_v19  ;;  %v1588_v61 = vpop.eup %1587  ;;  %v857_v17 = vmul.f32 0.5, %v2754_v26 }
 0x2a3   :  { %v883_v31 = vsel %vm880_vm3, %v882_v0, %v878_v3  ;;  %vm892_vm6 = vmor %vm890_vm5, %vm891_vm4 }
 0x2a4   :  { %v887_v32 = vsub.f32 1.0, %v886_v2  ;;  %v900_v33 = vmul.f32 1.0614054, %v883_v31  ;;  %v1590_v60 = vpop.eup %1589 }
 0x2a6   :  { %v902_v35 = vadd.f32 -1.4531521, %v900_v33  ;;  %v888_v36 = vmul.f32 %v1586_v19, %v887_v32 }
 0x2a8   :  { %v904_v39 = vmul.f32 %v902_v35, %v883_v31  ;;  %v889_v40 = vadd.f32 %v1586_v19, %v888_v36 }
 0x2aa   :  { %v906_v42 = vadd.f32 1.4214138, %v904_v39  ;;  %v893_v43 = vsel %vm892_vm6, %v1586_v19, %v889_v40 }
 0x2ab   :  { %v898_v46 = vsel %vm895_vm7, %v897_v41, %v893_v43 }
 0x2ac   :  { %v908_v47 = vmul.f32 %v906_v42, %v883_v31  ;;  %v901_v48 = vmul.f32 1.0614054, %v898_v46 }
 0x2ae   :  { %v910_v49 = vadd.f32 -0.28449672, %v908_v47  ;;  %v903_v50 = vadd.f32 -1.4531521, %v901_v48 }
 0x2b0   :  { %v912_v52 = vmul.f32 %v910_v49, %v883_v31  ;;  %v905_v53 = vmul.f32 %v903_v50, %v898_v46 }
 0x2b2   :  { %v914_v54 = vadd.f32 0.2548296, %v912_v52  ;;  %v907_v55 = vadd.f32 1.4214138, %v905_v53 }
 0x2b4   :  { %v916_v58 = vmul.f32 %v914_v54, %v883_v31  ;;  %v909_v59 = vmul.f32 %v907_v55, %v898_v46 }
 0x2b6   :  { %v926_v62 = vmul.f32 %v1588_v61, %v916_v58  ;;  %v911_v63 = vadd.f32 -0.28449672, %v909_v59 }
 0x2b8   :  { %v928_v1 = vsub.f32 1.0, %v926_v62  ;;  %v913_v4 = vmul.f32 %v911_v63, %v898_v46 }
 0x2ba   :  { %v930_v15 = vmul.f32 %v928_v1, %v862_v6  ;;  %v915_v56 = vadd.f32 0.2548296, %v913_v4 }
 0x2bc   :  { %v932_v24 = vadd.f32 1.0, %v930_v15  ;;  %v917_v10 = vmul.f32 %v915_v56, %v898_v46 }
 0x2be   :  { %v934_v8 = vmul.f32 %v932_v24, %v856_v16  ;;  %v927_v27 = vmul.f32 %v1590_v60, %v917_v10 }
 0x2c0   :  { %972 = vmatmul.f32.vlgmr.msra.gmra.mxu1 %v934_v8  ;;  %v929_v5 = vsub.f32 1.0, %v927_v27 }
 0x2c2   :  { %v931_v29 = vmul.f32 %v929_v5, %v863_v28 }
 0x2c4   :  { %v933_v23 = vadd.f32 1.0, %v931_v29 }
 0x2c6   :  { %v935_v18 = vmul.f32 %v933_v23, %v857_v17 }
 0x2c8   :  { %975 = vmatmul.f32.gmra.mxu1 %v935_v18 }
 0x33d   :  { %v973_v11 = vpop.f32.mrf.mxu1 }
 0x33e   :  { %v974_v21 = vadd.f32 %v1574_v7, %v973_v11 }
 0x340   :  { %979 = vst [vmem:[%s2815_s11] sm:$0xff] %v974_v21  ;;  %v984_v22 = vsel %vm983_vm10, %v974_v21, -1e+30 }
 0x341   :  { %986 = vmax.xlane.f32.xlu0 %v984_v22 }
 0x345   :  { %v976_v26 = vpop.f32.mrf.mxu1 }
 0x346   :  { %v977_v20 = vadd.f32 %v1574_v7, %v976_v26 }
 0x348   :  { %980 = vst [vmem:[%s2815_s11 + $0x8] sm:$0xff] %v977_v20  ;;  %v985_v25 = vsel %vm983_vm10, %v977_v20, -1e+30 }
 0x349   :  { %988 = vmax.xlane.f32.xlu0 %v985_v25 }
 0x3b4   :  { %v987_v9 = vpop.xlane.xlu0 %986 }
 0x3b5   :  { %v990_v19 = vsub.f32 %v984_v22, %v987_v9 }
 0x3b7   :  { %v992_v0 = vmul.f32 1.442695, %v990_v19 }
 0x3b9   :  { %1591 = vpow2.f32 %v992_v0 }
 0x3bc   :  { %v989_v2 = vpop.xlane.xlu0 %988 }
 0x3bd   :  { %v991_v3 = vsub.f32 %v985_v25, %v989_v2 }
 0x3bf   :  { %v1592_v30 = vpop.eup %1591  ;;  %v994_v31 = vmul.f32 1.442695, %v991_v3 }
 0x3c0   :  { %996 = vadd.xlane.f32.xlu1 %v1592_v30 }
 0x3c1   :  { %1593 = vpow2.f32 %v994_v31 }
 0x3c7   :  { %v1594_v32 = vpop.eup %1593 }
 0x3c8   :  { %998 = vadd.xlane.f32.xlu1 %v1594_v32 }
 0x433   :  { %v997_v33 = vpop.xlane.xlu1 %996 }
 0x434   :  { %1595 = vlog2.f32 %v997_v33 }
 0x43a   :  { %v1596_v34 = vpop.eup %1595 }
 0x43b   :  { %v1001_v35 = vmul.f32 0.6931472, %v1596_v34  ;;  %v999_v36 = vpop.xlane.xlu1 %998 }
 0x43c   :  { %1597 = vlog2.f32 %v999_v36 }
 0x43d   :  { %v1004_v37 = vsub.f32 %v990_v19, %v1001_v35 }
 0x43f   :  { %v1006_v39 = vsel %vm983_vm10, %v1004_v37, 0.0 }
 0x440   :  { %v1010_v40 = vmul.f32 %v1008_v38, %v1006_v39 }
 0x442   :  { %v1598_v41 = vpop.eup %1597  ;;  %1012 = vadd.xlane.f32.xlu2 %v1010_v40 }
 0x443   :  { %v1003_v42 = vmul.f32 0.6931472, %v1598_v41 }
 0x445   :  { %v1005_v43 = vsub.f32 %v991_v3, %v1003_v42 }
 0x447   :  { %v1007_v45 = vsel %vm983_vm10, %v1005_v43, 0.0 }
 0x448   :  { %v1011_v46 = vmul.f32 %v1009_v44, %v1007_v45 }
 0x44a   :  { %1014 = vadd.xlane.f32.xlu2 %v1011_v46 }
 0x4b5   :  { %v1013_v47 = vpop.xlane.xlu2 %1012 }
 0x4b6   :  { %v1016_v48 = vsub.f32 0.0, %v1013_v47 }
 0x4b8   :  { %1018 = vst [vmem:[%s2814_s10] sm:$0xff] %v1016_v48 }
 0x4bd   :  { %v1015_v49 = vpop.xlane.xlu2 %1014 }
 0x4be   :  { %v1017_v50 = vsub.f32 0.0, %v1015_v49 }
 0x4c0   :  { %1019 = vst [vmem:[%s2814_s10 + $0x8] sm:$0xff] %v1017_v50 }

// kernel: _forward_impl.1
= control target key start
LH: loop header
LB: loop body
LE: loop exit
PB: predicated region body
PF: predicated region fallthrough
CT: control target
= control target key end

     0   :  { %s2807_s0 = inlined_call_operand.vmem [shape: bf16[1,8,16,128], index: 0, kind: input, shape index: {}]   ;;  %s2808_s1 = inlined_call_operand.vmem [shape: bf16[128,512], index: 1, kind: input, shape index: {}]   ;;  %s2809_s5 = inlined_call_operand.vmem [shape: bf16[128,128], index: 5, kind: input, shape index: {}]   ;;  %s2810_s6 = inlined_call_operand.vmem [shape: f32[1,128], index: 6, kind: input, shape index: {}]   ;;  %s2811_s7 = inlined_call_operand.vmem [shape: f32[128,128], index: 7, kind: input, shape index: {}]   ;;  %s2812_s8 = inlined_call_operand.vmem [shape: f32[1,128], index: 8, kind: input, shape index: {}]   ;;  %s2813_s9 = inlined_call_operand.vmem [shape: f32[16,128], index: 9, kind: input, shape index: {}]   ;;  %s2814_s10 = inlined_call_operand.vmem [shape: f32[16,128], index: 10, kind: output, shape index: {0}]   ;;  %s2815_s11 = inlined_call_operand.vmem [shape: f32[16,128], index: 11, kind: output, shape index: {1}]   ;;  %s2816_s2 = inlined_call_operand.vmem [shape: bf16[128,512], index: 2, kind: input, shape index: {}]   ;;  %s2817_s3 = inlined_call_operand.vmem [shape: f32[1,512], index: 3, kind: input, shape index: {}]   ;;  %s2818_s4 = inlined_call_operand.vmem [shape: f32[1,128], index: 4, kind: input, shape index: {}]  }
   0x1   :  { %v1751_v0 = vld [vmem:[%s2808_s1 + $0x4] sm:$0xf]  ;;  %v1756_v1 = vld [vmem:[%s2808_s1] sm:$0xf]  ;;  %v1761_v2 = vld [vmem:[%s2808_s1 + $0xc] sm:$0xf] }
   0x2   :  { %2824 = vst [vmem:[#allocation2_spill] sm:$0xff] %v1751_v0  ;;  %v1766_v3 = vld [vmem:[%s2808_s1 + $0x8] sm:$0xf]  ;;  %v1771_v4 = vld [vmem:[%s2808_s1 + $0x10] sm:$0xf0] }
   0x3   :  { %2825 = vst [vmem:[#allocation3_spill] sm:$0xff] %v1756_v1  ;;  %v1776_v5 = vld [vmem:[%s2808_s1 + $0xc] sm:$0xf0]  ;;  %v1781_v6 = vld [vmem:[%s2808_s1 + $0x18] sm:$0xf0] }
   0x4   :  { %2826 = vst [vmem:[#allocation4_spill] sm:$0xff] %v1761_v2  ;;  %v1786_v7 = vld [vmem:[%s2808_s1 + $0x14] sm:$0xf0]  ;;  %v1791_v8 = vld [vmem:[%s2808_s1 + $0x24] sm:$0xf] }
   0x5   :  { %2827 = vst [vmem:[#allocation5_spill] sm:$0xff] %v1766_v3  ;;  %v1796_v9 = vld [vmem:[%s2808_s1 + $0x20] sm:$0xf]  ;;  %v1801_v10 = vld [vmem:[%s2808_s1 + $0x2c] sm:$0xf] }
   0x6   :  { %2828 = vst [vmem:[#allocation6_spill] sm:$0xff] %v1771_v4  ;;  %v1806_v11 = vld [vmem:[%s2808_s1 + $0x28] sm:$0xf]  ;;  %v1811_v12 = vld [vmem:[%s2808_s1 + $0x30] sm:$0xf0] }
   0x7   :  { %2829 = vst [vmem:[#allocation7_spill] sm:$0xff] %v1776_v5  ;;  %v1816_v13 = vld [vmem:[%s2808_s1 + $0x2c] sm:$0xf0]  ;;  %v1821_v14 = vld [vmem:[%s2808_s1 + $0x38] sm:$0xf0] }
   0x8   :  { %2830 = vst [vmem:[#allocation8_spill] sm:$0xff] %v1781_v6  ;;  %v1826_v15 = vld [vmem:[%s2808_s1 + $0x34] sm:$0xf0]  ;;  %v1831_v16 = vld [vmem:[%s2808_s1 + $0x44] sm:$0xf] }
   0x9   :  { %2831 = vst [vmem:[#allocation9_spill] sm:$0xff] %v1786_v7  ;;  %v1836_v17 = vld [vmem:[%s2808_s1 + $0x40] sm:$0xf]  ;;  %v1841_v18 = vld [vmem:[%s2808_s1 + $0x4c] sm:$0xf] }
   0xa   :  { %2832 = vst [vmem:[#allocation10_spill] sm:$0xff] %v1791_v8  ;;  %v1846_v19 = vld [vmem:[%s2808_s1 + $0x48] sm:$0xf]  ;;  %v1851_v20 = vld [vmem:[%s2808_s1 + $0x50] sm:$0xf0] }
   0xb   :  { %2833 = vst [vmem:[#allocation11_spill] sm:$0xff] %v1796_v9  ;;  %v1856_v21 = vld [vmem:[%s2808_s1 + $0x4c] sm:$0xf0]  ;;  %v1861_v22 = vld [vmem:[%s2808_s1 + $0x58] sm:$0xf0] }
   0xc   :  { %2834 = vst [vmem:[#allocation12_spill] sm:$0xff] %v1801_v10  ;;  %v1866_v23 = vld [vmem:[%s2808_s1 + $0x54] sm:$0xf0]  ;;  %v1871_v24 = vld [vmem:[%s2808_s1 + $0x64] sm:$0xf] }
   0xd   :  { %2835 = vst [vmem:[#allocation13_spill] sm:$0xff] %v1806_v11  ;;  %v1876_v25 = vld [vmem:[%s2808_s1 + $0x60] sm:$0xf]  ;;  %v1881_v26 = vld [vmem:[%s2808_s1 + $0x6c] sm:$0xf] }
   0xe   :  { %2836 = vst [vmem:[#allocation14_spill] sm:$0xff] %v1811_v12  ;;  %v1886_v27 = vld [vmem:[%s2808_s1 + $0x68] sm:$0xf]  ;;  %v1891_v28 = vld [vmem:[%s2808_s1 + $0x70] sm:$0xf0] }
   0xf   :  { %2837 = vst [vmem:[#allocation15_spill] sm:$0xff] %v1816_v13  ;;  %v1896_v29 = vld [vmem:[%s2808_s1 + $0x6c] sm:$0xf0]  ;;  %v1901_v30 = vld [vmem:[%s2808_s1 + $0x78] sm:$0xf0] }
  0x10   :  { %2838 = vst [vmem:[#allocation16_spill] sm:$0xff] %v1821_v14  ;;  %v1906_v31 = vld [vmem:[%s2808_s1 + $0x74] sm:$0xf0]  ;;  %v1911_v32 = vld [vmem:[%s2808_s1 + $0x84] sm:$0xf] }
  0x11   :  { %2839 = vst [vmem:[#allocation17_spill] sm:$0xff] %v1826_v15  ;;  %v1916_v33 = vld [vmem:[%s2808_s1 + $0x80] sm:$0xf]  ;;  %v1921_v34 = vld [vmem:[%s2808_s1 + $0x8c] sm:$0xf] }
  0x12   :  { %2840 = vst [vmem:[#allocation18_spill] sm:$0xff] %v1831_v16  ;;  %v1926_v35 = vld [vmem:[%s2808_s1 + $0x88] sm:$0xf]  ;;  %v1931_v36 = vld [vmem:[%s2808_s1 + $0x90] sm:$0xf0] }
  0x13   :  { %2841 = vst [vmem:[#allocation19_spill] sm:$0xff] %v1836_v17  ;;  %v1936_v37 = vld [vmem:[%s2808_s1 + $0x8c] sm:$0xf0]  ;;  %v1941_v38 = vld [vmem:[%s2808_s1 + $0x98] sm:$0xf0] }
  0x14   :  { %2842 = vst [vmem:[#allocation20_spill] sm:$0xff] %v1841_v18  ;;  %v1946_v39 = vld [vmem:[%s2808_s1 + $0x94] sm:$0xf0]  ;;  %v1951_v40 = vld [vmem:[%s2808_s1 + $0xa4] sm:$0xf] }
  0x15   :  { %2843 = vst [vmem:[#allocation21_spill] sm:$0xff] %v1846_v19  ;;  %v1956_v41 = vld [vmem:[%s2808_s1 + $0xa0] sm:$0xf]  ;;  %v1961_v42 = vld [vmem:[%s2808_s1 + $0xac] sm:$0xf] }
  0x16   :  { %2844 = vst [vmem:[#allocation22_spill] sm:$0xff] %v1851_v20  ;;  %v1966_v43 = vld [vmem:[%s2808_s1 + $0xa8] sm:$0xf]  ;;  %v1971_v44 = vld [vmem:[%s2808_s1 + $0xb0] sm:$0xf0] }
  0x17   :  { %2845 = vst [vmem:[#allocation23_spill] sm:$0xff] %v1856_v21  ;;  %v1976_v45 = vld [vmem:[%s2808_s1 + $0xac] sm:$0xf0]  ;;  %v1981_v46 = vld [vmem:[%s2808_s1 + $0xb8] sm:$0xf0] }
  0x18   :  { %2846 = vst [vmem:[#allocation24_spill] sm:$0xff] %v1861_v22  ;;  %v1986_v47 = vld [vmem:[%s2808_s1 + $0xb4] sm:$0xf0]  ;;  %v1991_v48 = vld [vmem:[%s2808_s1 + $0xc4] sm:$0xf] }
  0x19   :  { %2847 = vst [vmem:[#allocation25_spill] sm:$0xff] %v1866_v23  ;;  %v1996_v49 = vld [vmem:[%s2808_s1 + $0xc0] sm:$0xf]  ;;  %v2001_v50 = vld [vmem:[%s2808_s1 + $0xcc] sm:$0xf] }
  0x1a   :  { %2848 = vst [vmem:[#allocation26_spill] sm:$0xff] %v1871_v24  ;;  %v2006_v51 = vld [vmem:[%s2808_s1 + $0xc8] sm:$0xf]  ;;  %v2011_v52 = vld [vmem:[%s2808_s1 + $0xd0] sm:$0xf0] }
  0x1b   :  { %2849 = vst [vmem:[#allocation27_spill] sm:$0xff] %v1876_v25  ;;  %v2016_v53 = vld [vmem:[%s2808_s1 + $0xcc] sm:$0xf0]  ;;  %v2021_v54 = vld [vmem:[%s2808_s1 + $0xd8] sm:$0xf0] }
  0x1c   :  { %2850 = vst [vmem:[#allocation28_spill] sm:$0xff] %v1881_v26  ;;  %v2026_v55 = vld [vmem:[%s2808_s1 + $0xd4] sm:$0xf0]  ;;  %v2031_v56 = vld [vmem:[%s2808_s1 + $0xe4] sm:$0xf] }
  0x1d   :  { %2851 = vst [vmem:[#allocation29_spill] sm:$0xff] %v1886_v27  ;;  %v2036_v57 = vld [vmem:[%s2808_s1 + $0xe0] sm:$0xf]  ;;  %v2041_v58 = vld [vmem:[%s2808_s1 + $0xec] sm:$0xf] }
  0x1e   :  { %2852 = vst [vmem:[#allocation30_spill] sm:$0xff] %v1891_v28  ;;  %v2046_v59 = vld [vmem:[%s2808_s1 + $0xe8] sm:$0xf]  ;;  %v2051_v60 = vld [vmem:[%s2808_s1 + $0xf0] sm:$0xf0] }
  0x1f   :  { %2853 = vst [vmem:[#allocation31_spill] sm:$0xff] %v1896_v29  ;;  %v2056_v61 = vld [vmem:[%s2808_s1 + $0xec] sm:$0xf0]  ;;  %v2061_v62 = vld [vmem:[%s2808_s1 + $0xf8] sm:$0xf0] }
  0x20   :  { %2854 = vst [vmem:[#allocation32_spill] sm:$0xff] %v1901_v30  ;;  %v2066_v63 = vld [vmem:[%s2808_s1 + $0xf4] sm:$0xf0]  ;;  %v2071_v2 = vld [vmem:[%s2816_s2 + $0x4] sm:$0xf] }
  0x21   :  { %2855 = vst [vmem:[#allocation33_spill] sm:$0xff] %v1906_v31  ;;  %v2076_v6 = vld [vmem:[%s2816_s2] sm:$0xf]  ;;  %v2081_v7 = vld [vmem:[%s2816_s2 + $0xc] sm:$0xf] }
  0x22   :  { %2856 = vst [vmem:[#allocation34_spill] sm:$0xff] %v1911_v32  ;;  %v2086_v3 = vld [vmem:[%s2816_s2 + $0x8] sm:$0xf]  ;;  %v2091_v0 = vld [vmem:[%s2816_s2 + $0x10] sm:$0xf0] }
  0x23   :  { %2857 = vst [vmem:[#allocation35_spill] sm:$0xff] %v1916_v33  ;;  %v2096_v4 = vld [vmem:[%s2816_s2 + $0xc] sm:$0xf0]  ;;  %v2101_v5 = vld [vmem:[%s2816_s2 + $0x18] sm:$0xf0] }
  0x24   :  { %2858 = vst [vmem:[#allocation36_spill] sm:$0xff] %v1921_v34  ;;  %v2106_v1 = vld [vmem:[%s2816_s2 + $0x14] sm:$0xf0]  ;;  %v2111_v10 = vld [vmem:[%s2816_s2 + $0x24] sm:$0xf] }
  0x25   :  { %2859 = vst [vmem:[#allocation37_spill] sm:$0xff] %v1926_v35  ;;  %v2116_v14 = vld [vmem:[%s2816_s2 + $0x20] sm:$0xf]  ;;  %v2121_v15 = vld [vmem:[%s2816_s2 + $0x2c] sm:$0xf] }
  0x26   :  { %2860 = vst [vmem:[#allocation38_spill] sm:$0xff] %v1931_v36  ;;  %v2126_v11 = vld [vmem:[%s2816_s2 + $0x28] sm:$0xf]  ;;  %v2131_v8 = vld [vmem:[%s2816_s2 + $0x30] sm:$0xf0] }
  0x27   :  { %2861 = vst [vmem:[#allocation39_spill] sm:$0xff] %v1936_v37  ;;  %v2136_v12 = vld [vmem:[%s2816_s2 + $0x2c] sm:$0xf0]  ;;  %v2141_v13 = vld [vmem:[%s2816_s2 + $0x38] sm:$0xf0] }
  0x28   :  { %2862 = vst [vmem:[#allocation40_spill] sm:$0xff] %v1941_v38  ;;  %v2146_v9 = vld [vmem:[%s2816_s2 + $0x34] sm:$0xf0]  ;;  %v2151_v18 = vld [vmem:[%s2816_s2 + $0x44] sm:$0xf] }
  0x29   :  { %2863 = vst [vmem:[#allocation41_spill] sm:$0xff] %v1946_v39  ;;  %v2156_v22 = vld [vmem:[%s2816_s2 + $0x40] sm:$0xf]  ;;  %v2161_v23 = vld [vmem:[%s2816_s2 + $0x4c] sm:$0xf] }
  0x2a   :  { %2864 = vst [vmem:[#allocation42_spill] sm:$0xff] %v1951_v40  ;;  %v2166_v19 = vld [vmem:[%s2816_s2 + $0x48] sm:$0xf]  ;;  %v2171_v16 = vld [vmem:[%s2816_s2 + $0x50] sm:$0xf0] }
  0x2b   :  { %2865 = vst [vmem:[#allocation43_spill] sm:$0xff] %v1956_v41  ;;  %v2176_v20 = vld [vmem:[%s2816_s2 + $0x4c] sm:$0xf0]  ;;  %v2181_v21 = vld [vmem:[%s2816_s2 + $0x58] sm:$0xf0] }
  0x2c   :  { %2866 = vst [vmem:[#allocation44_spill] sm:$0xff] %v1961_v42  ;;  %v2186_v17 = vld [vmem:[%s2816_s2 + $0x54] sm:$0xf0]  ;;  %v2191_v26 = vld [vmem:[%s2816_s2 + $0x64] sm:$0xf] }
  0x2d   :  { %2867 = vst [vmem:[#allocation45_spill] sm:$0xff] %v1966_v43  ;;  %v2196_v30 = vld [vmem:[%s2816_s2 + $0x60] sm:$0xf]  ;;  %v2201_v31 = vld [vmem:[%s2816_s2 + $0x6c] sm:$0xf] }
  0x2e   :  { %2868 = vst [vmem:[#allocation46_spill] sm:$0xff] %v1971_v44  ;;  %v2206_v27 = vld [vmem:[%s2816_s2 + $0x68] sm:$0xf]  ;;  %v2211_v24 = vld [vmem:[%s2816_s2 + $0x70] sm:$0xf0] }
  0x2f   :  { %2869 = vst [vmem:[#allocation47_spill] sm:$0xff] %v1976_v45  ;;  %v2216_v28 = vld [vmem:[%s2816_s2 + $0x6c] sm:$0xf0]  ;;  %v2221_v29 = vld [vmem:[%s2816_s2 + $0x78] sm:$0xf0] }
  0x30   :  { %2870 = vst [vmem:[#allocation48_spill] sm:$0xff] %v1981_v46  ;;  %v2226_v25 = vld [vmem:[%s2816_s2 + $0x74] sm:$0xf0]  ;;  %v2231_v34 = vld [vmem:[%s2816_s2 + $0x84] sm:$0xf] }
  0x31   :  { %2871 = vst [vmem:[#allocation49_spill] sm:$0xff] %v1986_v47  ;;  %v2236_v38 = vld [vmem:[%s2816_s2 + $0x80] sm:$0xf]  ;;  %v2241_v39 = vld [vmem:[%s2816_s2 + $0x8c] sm:$0xf] }
  0x32   :  { %2872 = vst [vmem:[#allocation50_spill] sm:$0xff] %v1991_v48  ;;  %v2246_v35 = vld [vmem:[%s2816_s2 + $0x88] sm:$0xf]  ;;  %v2251_v32 = vld [vmem:[%s2816_s2 + $0x90] sm:$0xf0] }
  0x33   :  { %2873 = vst [vmem:[#allocation51_spill] sm:$0xff] %v1996_v49  ;;  %v2256_v36 = vld [vmem:[%s2816_s2 + $0x8c] sm:$0xf0]  ;;  %v2261_v37 = vld [vmem:[%s2816_s2 + $0x98] sm:$0xf0] }
  0x34   :  { %2874 = vst [vmem:[#allocation52_spill] sm:$0xff] %v2001_v50  ;;  %v2266_v33 = vld [vmem:[%s2816_s2 + $0x94] sm:$0xf0]  ;;  %v2271_v42 = vld [vmem:[%s2816_s2 + $0xa4] sm:$0xf] }
  0x35   :  { %2875 = vst [vmem:[#allocation53_spill] sm:$0xff] %v2006_v51  ;;  %v2276_v46 = vld [vmem:[%s2816_s2 + $0xa0] sm:$0xf]  ;;  %v2281_v47 = vld [vmem:[%s2816_s2 + $0xac] sm:$0xf] }
  0x36   :  { %2876 = vst [vmem:[#allocation54_spill] sm:$0xff] %v2011_v52  ;;  %v2286_v43 = vld [vmem:[%s2816_s2 + $0xa8] sm:$0xf]  ;;  %v2291_v40 = vld [vmem:[%s2816_s2 + $0xb0] sm:$0xf0] }
  0x37   :  { %2877 = vst [vmem:[#allocation55_spill] sm:$0xff] %v2016_v53  ;;  %v2296_v44 = vld [vmem:[%s2816_s2 + $0xac] sm:$0xf0]  ;;  %v2301_v45 = vld [vmem:[%s2816_s2 + $0xb8] sm:$0xf0] }
  0x38   :  { %2878 = vst [vmem:[#allocation56_spill] sm:$0xff] %v2021_v54  ;;  %v2306_v41 = vld [vmem:[%s2816_s2 + $0xb4] sm:$0xf0]  ;;  %v2311_v50 = vld [vmem:[%s2816_s2 + $0xc4] sm:$0xf] }
  0x39   :  { %2879 = vst [vmem:[#allocation57_spill] sm:$0xff] %v2026_v55  ;;  %v2316_v54 = vld [vmem:[%s2816_s2 + $0xc0] sm:$0xf]  ;;  %v2321_v55 = vld [vmem:[%s2816_s2 + $0xcc] sm:$0xf] }
  0x3a   :  { %2880 = vst [vmem:[#allocation58_spill] sm:$0xff] %v2031_v56  ;;  %v2326_v51 = vld [vmem:[%s2816_s2 + $0xc8] sm:$0xf]  ;;  %v2331_v48 = vld [vmem:[%s2816_s2 + $0xd0] sm:$0xf0] }
  0x3b   :  { %2881 = vst [vmem:[#allocation59_spill] sm:$0xff] %v2036_v57  ;;  %v2336_v52 = vld [vmem:[%s2816_s2 + $0xcc] sm:$0xf0]  ;;  %v2341_v53 = vld [vmem:[%s2816_s2 + $0xd8] sm:$0xf0] }
  0x3c   :  { %2882 = vst [vmem:[#allocation60_spill] sm:$0xff] %v2041_v58  ;;  %v2346_v49 = vld [vmem:[%s2816_s2 + $0xd4] sm:$0xf0]  ;;  %v2351_v58 = vld [vmem:[%s2816_s2 + $0xe4] sm:$0xf] }
  0x3d   :  { %2883 = vst [vmem:[#allocation61_spill] sm:$0xff] %v2046_v59  ;;  %v2366_v59 = vld [vmem:[%s2816_s2 + $0xe8] sm:$0xf]  ;;  %v2371_v56 = vld [vmem:[%s2816_s2 + $0xf0] sm:$0xf0] }
  0x3e   :  { %2884 = vst [vmem:[#allocation62_spill] sm:$0xff] %v2051_v60  ;;  %v2376_v60 = vld [vmem:[%s2816_s2 + $0xec] sm:$0xf0]  ;;  %v2386_v57 = vld [vmem:[%s2816_s2 + $0xf4] sm:$0xf0] }
  0x3f   :  { %2885 = vst [vmem:[#allocation63_spill] sm:$0xff] %v2056_v61  ;;  %v2381_v61 = vld [vmem:[%s2816_s2 + $0xf8] sm:$0xf0] }
  0x40   :  { %2886 = vst [vmem:[#allocation64_spill] sm:$0xff] %v2061_v62  ;;  %v2356_v62 = vld [vmem:[%s2816_s2 + $0xe0] sm:$0xf] }
  0x41   :  { %2887 = vst [vmem:[#allocation65_spill] sm:$0xff] %v2066_v63  ;;  %v2361_v63 = vld [vmem:[%s2816_s2 + $0xec] sm:$0xf]  ;;  %s2422_s2 = smov 0  }
  0x42   :  { %2888 = vst [vmem:[#allocation66_spill] sm:$0xff] %v2071_v2  ;;  %v2416_v2 = vmov 0.0  }
  0x43   :  { %2889 = vst [vmem:[#allocation67_spill] sm:$0xff] %v2076_v6  ;;  %v2404_v6 = vmov 0.0  }
  0x44   :  { %2890 = vst [vmem:[#allocation68_spill] sm:$0xff] %v2081_v7  ;;  %v2391_v7 = vld [vmem:[%s2817_s3] sm:$0xf] }
  0x45   :  { %2891 = vst [vmem:[#allocation69_spill] sm:$0xff] %v2086_v3  ;;  %v2414_v3 = vmov 0.0  }
  0x46   :  { %2892 = vst [vmem:[#allocation70_spill] sm:$0xff] %v2091_v0  ;;  %v2400_v0 = vld [vmem:[%s2818_s4] ss:$0 sm:$0xff] }
  0x47   :  { %2893 = vst [vmem:[#allocation71_spill] sm:$0xff] %v2096_v4  ;;  %v2402_v4 = vmov 0.0  }
  0x48   :  { %2894 = vst [vmem:[#allocation72_spill] sm:$0xff] %v2101_v5  ;;  %v2410_v5 = vmov -1e+30  }
  0x49   :  { %2895 = vst [vmem:[#allocation73_spill] sm:$0xff] %v2106_v1  ;;  %v2412_v1 = vmov -1e+30  }
  0x4a   :  { %2896 = vst [vmem:[#allocation74_spill] sm:$0xff] %v2111_v10 }
  0x4b   :  { %2897 = vst [vmem:[#allocation75_spill] sm:$0xff] %v2116_v14 }
  0x4c   :  { %2898 = vst [vmem:[#allocation76_spill] sm:$0xff] %v2121_v15  ;;  %v2406_v15 = vmov 0.0  }
  0x4d   :  { %2899 = vst [vmem:[#allocation77_spill] sm:$0xff] %v2126_v11 }
  0x4e   :  { %2900 = vst [vmem:[#allocation78_spill] sm:$0xff] %v2131_v8 }
  0x4f   :  { %2901 = vst [vmem:[#allocation79_spill] sm:$0xff] %v2136_v12 }
  0x50   :  { %2902 = vst [vmem:[#allocation80_spill] sm:$0xff] %v2141_v13  ;;  %v2408_v13 = vmov 0.0  }
  0x51   :  { %2903 = vst [vmem:[#allocation81_spill] sm:$0xff] %v2146_v9  ;;  %v2420_v9 = vmov 0.0  }
  0x52   :  { %2904 = vst [vmem:[#allocation82_spill] sm:$0xff] %v2151_v18 }
  0x53   :  { %2905 = vst [vmem:[#allocation83_spill] sm:$0xff] %v2156_v22 }
  0x54   :  { %2906 = vst [vmem:[#allocation84_spill] sm:$0xff] %v2161_v23 }
  0x55   :  { %2907 = vst [vmem:[#allocation85_spill] sm:$0xff] %v2166_v19 }
  0x56   :  { %2908 = vst [vmem:[#allocation86_spill] sm:$0xff] %v2171_v16 }
  0x57   :  { %2909 = vst [vmem:[#allocation87_spill] sm:$0xff] %v2176_v20 }
  0x58   :  { %2910 = vst [vmem:[#allocation88_spill] sm:$0xff] %v2181_v21 }
  0x59   :  { %2911 = vst [vmem:[#allocation89_spill] sm:$0xff] %v2186_v17 }
  0x5a   :  { %2912 = vst [vmem:[#allocation90_spill] sm:$0xff] %v2191_v26 }
  0x5b   :  { %2913 = vst [vmem:[#allocation91_spill] sm:$0xff] %v2206_v27 }
  0x5c   :  { %2914 = vst [vmem:[#allocation92_spill] sm:$0xff] %v2211_v24 }
  0x5d   :  { %2915 = vst [vmem:[#allocation93_spill] sm:$0xff] %v2216_v28 }
  0x5e   :  { %2916 = vst [vmem:[#allocation94_spill] sm:$0xff] %v2221_v29 }
  0x5f   :  { %2917 = vst [vmem:[#allocation95_spill] sm:$0xff] %v2226_v25 }
  0x60   :  { %2918 = vst [vmem:[#allocation96_spill] sm:$0xff] %v2371_v56 }
  0x61   :  { %2919 = vst [vmem:[#allocation97_spill] sm:$0xff] %v2376_v60 }
  0x62   :  { %2920 = vst [vmem:[#allocation98_spill] sm:$0xff] %v2391_v7  ;;  %v2418_v7 = vmov 0.0  }
  0x63 LB: > { %2921 = vst [vmem:[#allocation99_spill] sm:$0xff] %v1645_v4  ;;  %v2930_v24 = vld [vmem:[#allocation92_spill] sm:$0xff]  ;;  %v2931_v26 = vld [vmem:[#allocation90_spill] sm:$0xff]  ;;  %v2932_v27 = vld [vmem:[#allocation91_spill] sm:$0xff]  ;;  %s1429_s3 = sshll.u32 %s1685_s2, 3  ;;  %s120_s2 = sadd.s32 1, %s1685_s2   ;;  %s1685_s2 = sphi %s2422_s2, %s120_s2   ;;  %v1681_v9 = vphi %v2420_v9, %v3046_v9   ;;  %v1677_v7 = vphi %v2418_v7, %v708_v7   ;;  %v1673_v2 = vphi %v2416_v2, %v2627_v2   ;;  %v1669_v3 = vphi %v2414_v3, %v704_v3   ;;  %v1665_v1 = vphi %v2412_v1, %v717_v1   ;;  %v1661_v5 = vphi %v2410_v5, %v718_v5   ;;  %v1657_v13 = vphi %v2408_v13, %v3045_v13   ;;  %v1653_v15 = vphi %v2406_v15, %v3044_v15   ;;  %v1649_v6 = vphi %v2404_v6, %v3043_v6   ;;  %v1645_v4 = vphi %v2402_v4, %v3042_v4  }
  0x64   : > { %2922 = vst [vmem:[#allocation100_spill] sm:$0xff] %v1649_v6  ;;  %v1190_v6 = vor.u32 %v2386_v57, %v2366_v59  ;;  %v2929_v28 = vld [vmem:[#allocation93_spill] sm:$0xff]  ;;  %v2935_v22 = vld [vmem:[#allocation83_spill] sm:$0xff]  ;;  %v2937_v16 = vld [vmem:[#allocation86_spill] sm:$0xff]  ;;  %s133_s24 = scalar_lea.vmem %s2807_s0, %s1429_s3  ;;  %p117_p0 = scmp.ge.s32.totalorder %s120_s2, 8  }
  0x65   : > { %2923 = vst [vmem:[#allocation101_spill] sm:$0xff] %v1653_v15  ;;  %v2934_v29 = vld [vmem:[#allocation94_spill] sm:$0xff]  ;;  %v2936_v20 = vld [vmem:[#allocation87_spill] sm:$0xff]  ;;  %v2939_v19 = vld [vmem:[#allocation85_spill] sm:$0xff] }
  0x66   : > { %2924 = vst [vmem:[#allocation102_spill] sm:$0xff] %v1657_v13  ;;  %v1194_v13 = vor.u32 %v2361_v63, %v2381_v61  ;;  %325 = vmatpush.bf16.msra.mxu2 %v1190_v6  ;;  %v1158_v6 = vor.u32 %v2306_v41, %v2286_v43  ;;  %v2933_v25 = vld [vmem:[#allocation95_spill] sm:$0xff]  ;;  %v2938_v18 = vld [vmem:[#allocation82_spill] sm:$0xff]  ;;  %v2940_v17 = vld [vmem:[#allocation89_spill] sm:$0xff] }
  0x67   : > { %2925 = vst [vmem:[#allocation103_spill] sm:$0xff] %v1661_v5  ;;  %v2928_v56 = vld [vmem:[#allocation96_spill] sm:$0xff]  ;;  %v1166_v5 = vor.u32 %v2336_v52, %v2316_v54  ;;  %v2943_v14 = vld [vmem:[#allocation75_spill] sm:$0xff]  ;;  %v2945_v8 = vld [vmem:[#allocation78_spill] sm:$0xff] }
  0x68   : > { %2926 = vst [vmem:[#allocation104_spill] sm:$0xff] %v1665_v1  ;;  %v2927_v60 = vld [vmem:[#allocation97_spill] sm:$0xff]  ;;  %v1186_v15 = vor.u32 %v2351_v58, %v2928_v56  ;;  %v1170_v1 = vor.u32 %v2311_v50, %v2331_v48  ;;  %339 = vmatpush.bf16.msra.mxu3 %v1194_v13  ;;  %v1178_v56 = vor.u32 %v2321_v55, %v2341_v53  ;;  %v2941_v21 = vld [vmem:[#allocation88_spill] sm:$0xff]  ;;  %v2944_v12 = vld [vmem:[#allocation79_spill] sm:$0xff] }
  0x69   : > { %v1182_v4 = vor.u32 %v2927_v60, %v2356_v62  ;;  %v1174_v60 = vor.u32 %v2346_v49, %v2326_v51  ;;  %v1162_v13 = vor.u32 %v2281_v47, %v2301_v45  ;;  %v2942_v23 = vld [vmem:[#allocation84_spill] sm:$0xff]  ;;  %v2946_v10 = vld [vmem:[#allocation74_spill] sm:$0xff]  ;;  %v2947_v11 = vld [vmem:[#allocation77_spill] sm:$0xff] }
  0x6a   : > { %311 = vmatpush.bf16.msra.mxu1 %v1186_v15  ;;  %v1154_v15 = vor.u32 %v2271_v42, %v2291_v40  ;;  %v1434_v40 = vld [vmem:[%s2809_s5 + $0x18] sm:$0xff] (%p117_p0)  ;;  %v1433_v47 = vld [vmem:[%s2809_s5 + $0x10] sm:$0xff] (%p117_p0)  ;;  %v1432_v49 = vld [vmem:[%s2809_s5 + $0x8] sm:$0xff] (%p117_p0) }
  0x6b   : > { %297 = vmatpush.bf16.msra.mxu0 %v1182_v4  ;;  %v1150_v4 = vor.u32 %v2296_v44, %v2276_v46  ;;  %326 = vmatpush.bf16.msra.mxu2 %v1174_v60  ;;  %v1142_v60 = vor.u32 %v2266_v33, %v2246_v35  ;;  %v1431_v52 = vld [vmem:[%s2809_s5] sm:$0xff] (%p117_p0)  ;;  %v951_v54 = vld [vmem:[%s2811_s7 + $0x78] sm:$0xff] (%p117_p0)  ;;  %v950_v55 = vld [vmem:[%s2811_s7 + $0x70] sm:$0xff] (%p117_p0) }
  0x6c   : > { %340 = vmatpush.bf16.msra.mxu3 %v1178_v56  ;;  %v1146_v56 = vor.u32 %v2241_v39, %v2261_v37  ;;  %v949_v57 = vld [vmem:[%s2811_s7 + $0x68] sm:$0xff] (%p117_p0)  ;;  %v948_v58 = vld [vmem:[%s2811_s7 + $0x60] sm:$0xff] (%p117_p0)  ;;  %v947_v61 = vld [vmem:[%s2811_s7 + $0x58] sm:$0xff] (%p117_p0) }
  0x6d   :  { %v1573_v59 = vld [vmem:[%s2810_s6] ss:$0 sm:$0xff] (%p117_p0)  ;;  %v946_v63 = vld [vmem:[%s2811_s7 + $0x50] sm:$0xff] (%p117_p0) }
  0x6e   : > { %312 = vmatpush.bf16.msra.mxu1 %v1170_v1  ;;  %v1138_v1 = vor.u32 %v2231_v34, %v2251_v32  ;;  %v1435_v32 = vld [vmem:[%s2809_s5 + $0x20] sm:$0xff] (%p117_p0) }
  0x6f   : > { %298 = vmatpush.bf16.msra.mxu0 %v1166_v5  ;;  %v1134_v5 = vor.u32 %v2256_v36, %v2236_v38  ;;  %327 = vmatpush.bf16.msra.mxu2 %v1158_v6  ;;  %v1126_v6 = vor.u32 %v2933_v25, %v2932_v27  ;;  %v2966_v25 = vld [vmem:[#allocation60_spill] sm:$0xff] }
  0x70   : > { %341 = vmatpush.bf16.msra.mxu3 %v1162_v13  ;;  %v1130_v13 = vor.u32 %v2201_v31, %v2934_v29 }
  0x72   : > { %313 = vmatpush.bf16.msra.mxu1 %v1154_v15  ;;  %v1122_v15 = vor.u32 %v2931_v26, %v2930_v24  ;;  %v2964_v24 = vld [vmem:[#allocation65_spill] sm:$0xff] }
  0x73   : > { %299 = vmatpush.bf16.msra.mxu0 %v1150_v4  ;;  %v1118_v4 = vor.u32 %v2929_v28, %v2196_v30  ;;  %328 = vmatpush.bf16.msra.mxu2 %v1142_v60  ;;  %v1110_v60 = vor.u32 %v2940_v17, %v2939_v19  ;;  %v2951_v17 = vld [vmem:[#allocation67_spill] sm:$0xff] }
  0x74   : > { %342 = vmatpush.bf16.msra.mxu3 %v1146_v56  ;;  %v1114_v56 = vor.u32 %v2942_v23, %v2941_v21  ;;  %v2952_v19 = vld [vmem:[#allocation71_spill] sm:$0xff]  ;;  %v2954_v21 = vld [vmem:[#allocation66_spill] sm:$0xff] }
  0x76   : > { %314 = vmatpush.bf16.msra.mxu1 %v1138_v1  ;;  %v1106_v1 = vor.u32 %v2938_v18, %v2937_v16  ;;  %v2948_v16 = vld [vmem:[#allocation81_spill] sm:$0xff]  ;;  %v2950_v18 = vld [vmem:[#allocation76_spill] sm:$0xff] }
  0x77   : > { %300 = vmatpush.bf16.msra.mxu0 %v1134_v5  ;;  %v1102_v5 = vor.u32 %v2936_v20, %v2935_v22  ;;  %329 = vmatpush.bf16.msra.mxu2 %v1126_v6  ;;  %v1094_v6 = vor.u32 %v2948_v16, %v2947_v11  ;;  %v2959_v16 = vld [vmem:[#allocation59_spill] sm:$0xff] }
  0x78   : > { %343 = vmatpush.bf16.msra.mxu3 %v1130_v13  ;;  %v2949_v13 = vld [vmem:[#allocation80_spill] sm:$0xff]  ;;  %v2960_v11 = vld [vmem:[#allocation63_spill] sm:$0xff] }
  0x79   : > { %v1098_v20 = vor.u32 %v2950_v18, %v2949_v13  ;;  %v1314_v23 = vor.u32 %v2960_v11, %v2959_v16  ;;  %v2961_v18 = vld [vmem:[#allocation62_spill] sm:$0xff]  ;;  %v2963_v13 = vld [vmem:[#allocation61_spill] sm:$0xff]  ;;  %v2968_v11 = vld [vmem:[#allocation55_spill] sm:$0xff] }
  0x7a   : > { %315 = vmatpush.bf16.msra.mxu1 %v1122_v15  ;;  %v1090_v15 = vor.u32 %v2946_v10, %v2945_v8  ;;  %v2956_v8 = vld [vmem:[#allocation73_spill] sm:$0xff]  ;;  %v2958_v10 = vld [vmem:[#allocation68_spill] sm:$0xff] }
  0x7b   : > { %301 = vmatpush.bf16.msra.mxu0 %v1118_v4  ;;  %v1086_v4 = vor.u32 %v2944_v12, %v2943_v14  ;;  %330 = vmatpush.bf16.msra.mxu2 %v1110_v60  ;;  %v2955_v12 = vld [vmem:[#allocation69_spill] sm:$0xff] }
  0x7c   : > { %344 = vmatpush.bf16.msra.mxu3 %v1114_v56  ;;  %v1078_v60 = vor.u32 %v2956_v8, %v2955_v12  ;;  %v2957_v56 = vld [vmem:[#allocation72_spill] sm:$0xff]  ;;  %v136_v8 = vpack.c.bf16 %v1677_v7, %v1681_v9  ;;  %v2975_v7 = vld [vmem:[#allocation43_spill] sm:$0xff] }
  0x7d   : > { %v1082_v14 = vor.u32 %v2958_v10, %v2957_v56  ;;  %v2967_v10 = vld [vmem:[#allocation51_spill] sm:$0xff]  ;;  %v2972_v56 = vld [vmem:[#allocation57_spill] sm:$0xff] }
  0x7e   : > { %316 = vmatpush.bf16.msra.mxu1 %v1106_v1  ;;  %v2953_v1 = vld [vmem:[#allocation70_spill] sm:$0xff]  ;;  %v1298_v12 = vor.u32 %v2968_v11, %v2967_v10  ;;  %v2976_v9 = vld [vmem:[#allocation47_spill] sm:$0xff] }
  0x7f   : > { %302 = vmatpush.bf16.msra.mxu0 %v1102_v5  ;;  %v1070_v5 = vor.u32 %v2952_v19, %v2951_v17  ;;  %v1074_v22 = vor.u32 %v2954_v21, %v2953_v1  ;;  %331 = vmatpush.bf16.msra.mxu2 %v1094_v6  ;;  %v1322_v17 = vor.u32 %v2964_v24, %v2963_v13  ;;  %v2965_v19 = vld [vmem:[#allocation64_spill] sm:$0xff]  ;;  %v2970_v6 = vld [vmem:[#allocation50_spill] sm:$0xff]  ;;  %v2971_v24 = vld [vmem:[#allocation53_spill] sm:$0xff] }
  0x80   : > { %345 = vmatpush.bf16.msra.mxu3 %v1098_v20  ;;  %v1326_v21 = vor.u32 %v2966_v25, %v2965_v19  ;;  %v2969_v20 = vld [vmem:[#allocation54_spill] sm:$0xff]  ;;  %v1306_v25 = vor.u32 %v2972_v56, %v2971_v24  ;;  %v2982_v19 = vld [vmem:[#allocation44_spill] sm:$0xff]  ;;  %v2983_v10 = vld [vmem:[#allocation35_spill] sm:$0xff] }
  0x81   : > { %v1302_v1 = vor.u32 %v2970_v6, %v2969_v20  ;;  %v2986_v20 = vld [vmem:[#allocation34_spill] sm:$0xff]  ;;  %v2988_v24 = vld [vmem:[#allocation41_spill] sm:$0xff] }
  0x82   : > { %317 = vmatpush.bf16.msra.mxu1 %v1090_v15 }
  0x83   : > { %303 = vmatpush.bf16.msra.mxu0 %v1086_v4  ;;  %v2962_v4 = vld [vmem:[#allocation58_spill] sm:$0xff]  ;;  %332 = vmatpush.bf16.msra.mxu2 %v1078_v60 }
  0x84   : > { %v1318_v15 = vor.u32 %v2962_v4, %v2961_v18  ;;  %346 = vmatpush.bf16.msra.mxu3 %v1082_v14  ;;  %v1282_v14 = vor.u32 %v2976_v9, %v2975_v7  ;;  %v2978_v60 = vld [vmem:[#allocation42_spill] sm:$0xff]  ;;  %v2979_v4 = vld [vmem:[#allocation45_spill] sm:$0xff]  ;;  %v2992_v7 = vld [vmem:[#allocation31_spill] sm:$0xff] }
  0x86   : > { %318 = vmatpush.bf16.msra.mxu1 %v1074_v22  ;;  %v2974_v22 = vld [vmem:[#allocation52_spill] sm:$0xff]  ;;  %333 = vmatmul.bf16.vlgmr.msra.gmra.mxu2 %v136_v8 }
  0x87   : > { %304 = vmatpush.bf16.msra.mxu0 %v1070_v5  ;;  %547 = vmatpush.bf16.msrb.mxu2 %v1322_v17  ;;  %v2973_v5 = vld [vmem:[#allocation56_spill] sm:$0xff] }
  0x88   : > { %561 = vmatpush.bf16.msrb.mxu3 %v1326_v21  ;;  %v1310_v16 = vor.u32 %v2974_v22, %v2973_v5  ;;  %v2981_v17 = vld [vmem:[#allocation48_spill] sm:$0xff] }
  0x89   : > { %319 = vmatmul.bf16.vlgmr.msra.gmra.mxu1 %v136_v8  ;;  %347 = vmatmul.bf16.vlgmr.msra.gmra.mxu3 %v136_v8  ;;  %v1294_v21 = vor.u32 %v2982_v19, %v2981_v17  ;;  %v2990_v5 = vld [vmem:[#allocation36_spill] sm:$0xff] }
  0x8a   : > { %533 = vmatpush.bf16.msrb.mxu1 %v1318_v15  ;;  %305 = vmatmul.bf16.vlgmr.msra.gmra.mxu0 %v136_v8  ;;  %v2980_v15 = vld [vmem:[#allocation49_spill] sm:$0xff]  ;;  %v2984_v8 = vld [vmem:[#allocation39_spill] sm:$0xff]  ;;  %v2998_v17 = vld [vmem:[#allocation28_spill] sm:$0xff] }
  0x8b   : > { %519 = vmatpush.bf16.msrb.mxu0 %v1314_v23  ;;  %v2977_v23 = vld [vmem:[#allocation46_spill] sm:$0xff]  ;;  %548 = vmatpush.bf16.msrb.mxu2 %v1306_v25  ;;  %v1290_v13 = vor.u32 %v2980_v15, %v2979_v4  ;;  %v1266_v11 = vor.u32 %v2984_v8, %v2983_v10  ;;  %v2989_v25 = vld [vmem:[#allocation40_spill] sm:$0xff]  ;;  %v2996_v4 = vld [vmem:[#allocation33_spill] sm:$0xff] }
  0x8c   : > { %v1286_v18 = vor.u32 %v2978_v60, %v2977_v23  ;;  %562 = vmatpush.bf16.msrb.mxu3 %v1310_v16  ;;  %v1278_v22 = vor.u32 %v2990_v5, %v2989_v25  ;;  %v2991_v16 = vld [vmem:[#allocation27_spill] sm:$0xff]  ;;  %v2994_v23 = vld [vmem:[#allocation26_spill] sm:$0xff]  ;;  %v3006_v25 = vld [vmem:[#allocation20_spill] sm:$0xff] }
  0x8d   : > { %v1250_v9 = vor.u32 %v2992_v7, %v2991_v16  ;;  %v3000_v10 = vld [vmem:[#allocation23_spill] sm:$0xff] }
  0x8e   : > { %534 = vmatpush.bf16.msrb.mxu1 %v1302_v1  ;;  %v2987_v1 = vld [vmem:[#allocation37_spill] sm:$0xff]  ;;  %v3008_v16 = vld [vmem:[#allocation15_spill] sm:$0xff] }
  0x8f   : > { %520 = vmatpush.bf16.msrb.mxu0 %v1298_v12  ;;  %v2985_v12 = vld [vmem:[#allocation38_spill] sm:$0xff]  ;;  %549 = vmatpush.bf16.msrb.mxu2 %v1290_v13  ;;  %v1274_v56 = vor.u32 %v2988_v24, %v2987_v1  ;;  %v2997_v13 = vld [vmem:[#allocation32_spill] sm:$0xff]  ;;  %v3004_v1 = vld [vmem:[#allocation25_spill] sm:$0xff] }
  0x90   : > { %v1270_v6 = vor.u32 %v2986_v20, %v2985_v12  ;;  %563 = vmatpush.bf16.msrb.mxu3 %v1294_v21  ;;  %v1262_v19 = vor.u32 %v2998_v17, %v2997_v13  ;;  %v2999_v21 = vld [vmem:[#allocation19_spill] sm:$0xff]  ;;  %v3002_v12 = vld [vmem:[#allocation18_spill] sm:$0xff]  ;;  %v3014_v13 = vld [vmem:[#allocation12_spill] sm:$0xff] }
  0x91   : > { %v1234_v8 = vor.u32 %v3000_v10, %v2999_v21  ;;  %v3016_v21 = vld [vmem:[#allocation7_spill] sm:$0xff] }
  0x92   : > { %535 = vmatpush.bf16.msrb.mxu1 %v1286_v18  ;;  %v2995_v18 = vld [vmem:[#allocation29_spill] sm:$0xff] }
  0x93   : > { %521 = vmatpush.bf16.msrb.mxu0 %v1282_v14  ;;  %v2993_v14 = vld [vmem:[#allocation30_spill] sm:$0xff]  ;;  %550 = vmatpush.bf16.msrb.mxu2 %v1274_v56  ;;  %v1258_v15 = vor.u32 %v2996_v4, %v2995_v18  ;;  %v3005_v56 = vld [vmem:[#allocation24_spill] sm:$0xff]  ;;  %v3012_v18 = vld [vmem:[#allocation17_spill] sm:$0xff] }
  0x94   : > { %v1254_v60 = vor.u32 %v2994_v23, %v2993_v14  ;;  %564 = vmatpush.bf16.msrb.mxu3 %v1278_v22  ;;  %v1246_v5 = vor.u32 %v3006_v25, %v3005_v56  ;;  %v3007_v22 = vld [vmem:[#allocation11_spill] sm:$0xff]  ;;  %v3010_v14 = vld [vmem:[#allocation10_spill] sm:$0xff]  ;;  %v3022_v56 = vld [vmem:[#allocation4_spill] sm:$0xff] }
  0x95   : > { %v1218_v7 = vor.u32 %v3008_v16, %v3007_v22 }
  0x96   : > { %536 = vmatpush.bf16.msrb.mxu1 %v1270_v6  ;;  %v3003_v6 = vld [vmem:[#allocation21_spill] sm:$0xff] }
  0x97   : > { %522 = vmatpush.bf16.msrb.mxu0 %v1266_v11  ;;  %v3001_v11 = vld [vmem:[#allocation22_spill] sm:$0xff]  ;;  %551 = vmatpush.bf16.msrb.mxu2 %v1258_v15  ;;  %v1242_v24 = vor.u32 %v3004_v1, %v3003_v6  ;;  %v3013_v15 = vld [vmem:[#allocation16_spill] sm:$0xff]  ;;  %v3020_v6 = vld [vmem:[#allocation9_spill] sm:$0xff] }
  0x98   : > { %v1238_v20 = vor.u32 %v3002_v12, %v3001_v11  ;;  %565 = vmatpush.bf16.msrb.mxu3 %v1262_v19  ;;  %v1230_v17 = vor.u32 %v3014_v13, %v3013_v15  ;;  %v3015_v19 = vld [vmem:[#allocation3_spill] sm:$0xff]  ;;  %v3018_v11 = vld [vmem:[#allocation2_spill] sm:$0xff] }
  0x99   : > { %v1202_v10 = vor.u32 %v3016_v21, %v3015_v19  ;;  %v3023_v19 = vld [vmem:[#allocation98_spill] sm:$0xff] }
  0x9a   : > { %537 = vmatpush.bf16.msrb.mxu1 %v1254_v60  ;;  %v3011_v60 = vld [vmem:[#allocation13_spill] sm:$0xff]  ;;  %v3024_v21 = vperm.slane %v3023_v19, 0 }
  0x9b   : > { %523 = vmatpush.bf16.msrb.mxu0 %v1250_v9  ;;  %v3009_v9 = vld [vmem:[#allocation14_spill] sm:$0xff]  ;;  %552 = vmatpush.bf16.msrb.mxu2 %v1242_v24  ;;  %v1226_v4 = vor.u32 %v3012_v18, %v3011_v60  ;;  %v3021_v24 = vld [vmem:[#allocation8_spill] sm:$0xff] }
  0x9c   : > { %v1222_v23 = vor.u32 %v3010_v14, %v3009_v9  ;;  %566 = vmatpush.bf16.msrb.mxu3 %v1246_v5  ;;  %v1214_v25 = vor.u32 %v3022_v56, %v3021_v24  ;;  %v1430_v5 = vld [vmem:[%s133_s24] sm:$0xff] }
  0x9e   : > { %538 = vmatpush.bf16.msrb.mxu1 %v1238_v20  ;;  %v3019_v20 = vld [vmem:[#allocation5_spill] sm:$0xff] }
  0x9f   : > { %524 = vmatpush.bf16.msrb.mxu0 %v1234_v8  ;;  %v3017_v8 = vld [vmem:[#allocation6_spill] sm:$0xff]  ;;  %553 = vmatpush.bf16.msrb.mxu2 %v1226_v4  ;;  %v1210_v1 = vor.u32 %v3020_v6, %v3019_v20 }
  0xa0   : > { %v1206_v12 = vor.u32 %v3018_v11, %v3017_v8  ;;  %567 = vmatpush.bf16.msrb.mxu3 %v1230_v17  ;;  %v3025_v8 = vperm.slane %v3023_v19, 1 }
  0xa2   : > { %539 = vmatpush.bf16.msrb.mxu1 %v1222_v23 }
  0xa3   : > { %525 = vmatpush.bf16.msrb.mxu0 %v1218_v7  ;;  %554 = vmatpush.bf16.msrb.mxu2 %v1210_v1 }
  0xa4   : > { %568 = vmatpush.bf16.msrb.mxu3 %v1214_v25 }
  0xa6   : > { %540 = vmatpush.bf16.msrb.mxu1 %v1206_v12  ;;  %555 = vmatmul.bf16.vlgmr.msrb.gmra.mxu2 %v1430_v5 }
  0xa7   : > { %526 = vmatpush.bf16.msrb.mxu0 %v1202_v10  ;;  %569 = vmatmul.bf16.vlgmr.msrb.gmra.mxu3 %v1430_v5 }
  0xa9   : > { %541 = vmatmul.bf16.vlgmr.msrb.gmra.mxu1 %v1430_v5 }
  0xaa   : > { %527 = vmatmul.bf16.vlgmr.msrb.gmra.mxu0 %v1430_v5  ;;  %956 = vmatpush.msra.mxu1 (%p117_p0), %v951_v54 }
  0xac   :  { %957 = vmatpush.msra.mxu1 (%p117_p0), %v950_v55 }
  0xae   :  { %958 = vmatpush.msra.mxu1 (%p117_p0), %v949_v57 }
  0xb0   :  { %959 = vmatpush.msra.mxu1 (%p117_p0), %v948_v58 }
  0xb2   :  { %960 = vmatpush.msra.mxu1 (%p117_p0), %v947_v61 }
  0xb4   :  { %961 = vmatpush.msra.mxu1 (%p117_p0), %v946_v63 }
 0x106   : > { %v320_v16 = vpop.f32.mrf.mxu1 }
 0x107   : > { %v306_v22 = vpop.f32.mrf.mxu0 }
 0x109   : > { %v334_v9 = vpop.f32.mrf.mxu2 }
 0x10c   : > { %v348_v7 = vpop.f32.mrf.mxu3 }
 0x10e   : > { %v322_v23 = vpop.f32.mrf.mxu1 }
 0x10f   : > { %v308_v14 = vpop.f32.mrf.mxu0 }
 0x111   : > { %v336_v18 = vpop.f32.mrf.mxu2 }
 0x114   : > { %v350_v60 = vpop.f32.mrf.mxu3 }
 0x126   : > { %v542_v15 = vpop.f32.mrf.mxu1 }
 0x127   : > { %v528_v4 = vpop.f32.mrf.mxu0  ;;  %v543_v17 = vadd.f32 %v542_v15, %v320_v16 }
 0x128   : > { %v529_v13 = vadd.f32 %v528_v4, %v306_v22  ;;  %v3026_v22 = vperm.slane %v3023_v19, 3  ;;  %v3027_v4 = vmov %v3024_v21 }
 0x129   : > { %v576_v11 = vadd.f32 %v543_v17, %v3025_v8  ;;  %v556_v26 = vpop.f32.mrf.mxu2 }
 0x12a   : > { %v575_v10 = vadd.f32 %v529_v13, %v3024_v21  ;;  %v570_v6 = vpop.f32.mrf.mxu3  ;;  %v3028_v13 = vmov %v3025_v8 }
 0x12b   : > { %v1329_v20 = vmul.f32 -1.442695, %v576_v11  ;;  %v571_v1 = vadd.f32 %v570_v6, %v348_v7  ;;  %v557_v7 = vadd.f32 %v556_v26, %v334_v9  ;;  %v3029_v6 = vperm.slane %v3023_v19, 2 }
 0x12c   : > { %v1327_v12 = vmul.f32 -1.442695, %v575_v10 }
 0x12d   : > { %v578_v16 = vadd.f32 %v571_v1, %v3026_v22  ;;  %v577_v1 = vadd.f32 %v557_v7, %v3029_v6 }
 0x12e   : > { %1529 = vpow2.f32 %v1327_v12  ;;  %v544_v56 = vpop.f32.mrf.mxu1 }
 0x12f   : > { %1531 = vpow2.f32 %v1329_v20  ;;  %v530_v24 = vpop.f32.mrf.mxu0  ;;  %v545_v5 = vadd.f32 %v544_v56, %v322_v23  ;;  %v1331_v21 = vmul.f32 -1.442695, %v578_v16  ;;  %v3030_v16 = vperm.slane %v3023_v19, 3 }
 0x130   : > { %v531_v25 = vadd.f32 %v530_v24, %v308_v14 }
 0x131   : > { %v580_v17 = vadd.f32 %v545_v5, %v3028_v13  ;;  %1533 = vpow2.f32 %v1331_v21 }
 0x132   : > { %v579_v15 = vadd.f32 %v531_v25, %v3027_v4  ;;  %v572_v23 = vpop.f32.mrf.mxu3  ;;  %v558_v25 = vpop.f32.mrf.mxu2 }
 0x133   : > { %v1330_v20 = vmul.f32 -1.442695, %v580_v17  ;;  %v573_v24 = vadd.f32 %v572_v23, %v350_v60  ;;  %v559_v17 = vadd.f32 %v558_v25, %v336_v18  ;;  %v3031_v18 = vperm.slane %v3023_v19, 2 }
 0x134   : > { %v1530_v10 = vpop.eup %1529  ;;  %v1328_v8 = vmul.f32 -1.442695, %v579_v15 }
 0x135   : > { %v1532_v11 = vpop.eup %1531  ;;  %v589_v12 = vadd.f32 1.0, %v1530_v10  ;;  %v582_v26 = vadd.f32 %v573_v24, %v3030_v16 }
 0x136   : > { %v627_v14 = vadd.f32 1.0, %v1532_v11  ;;  %1535 = vpow2.f32 %v1328_v8 }
 0x137   : > { %1537 = vrcp.f32 %v589_v12  ;;  %v1534_v56 = vpop.eup %1533  ;;  %v1332_v21 = vmul.f32 -1.442695, %v582_v26  ;;  %v600_v11 = vand.u32 2147483647, %v589_v12  ;;  %v602_v7 = vand.u32 2147483648, %v589_v12 }
 0x138   : > { %1539 = vrcp.f32 %v627_v14  ;;  %v2603_v22 = vadd.f32 1.0, %v1534_v56  ;;  %v640_v6 = vand.u32 2147483648, %v627_v14  ;;  %v581_v56 = vadd.f32 %v559_v17, %v3031_v18 }
 0x139   : > { %1541 = vpow2.f32 %v1330_v20  ;;  %vm634_vm2 = vweird.f32 %v627_v14  ;;  %vm596_vm3 = vweird.f32 %v589_v12  ;;  %vm601_vm4 = vcmp.eq.f32.partialorder %v600_v11, 8.507059e+37 }
 0x13a   : > { %1543 = vtanh.f32 %v577_v1  ;;  %v638_v1 = vand.u32 2147483647, %v627_v14  ;;  %vm674_vm14 = vweird.f32 %v2603_v22 }
 0x13b   : > { %1545 = vrcp.f32 %v2603_v22 }
 0x13c   : > { %v1536_v5 = vpop.eup %1535  ;;  %vm639_vm7 = vcmp.eq.f32.partialorder %v638_v1, 8.507059e+37 }
 0x13d   : > { %v1538_v9 = vpop.eup %1537  ;;  %v2607_v4 = vadd.f32 1.0, %v1536_v5 }
 0x13e   : > { %v1540_v15 = vpop.eup %1539  ;;  %v592_v13 = vmul.f32 %v1538_v9, %v589_v12  ;;  %vm597_vm0 = vweird.f32 %v1538_v9 }
 0x13f   : > { %v1542_v10 = vpop.eup %1541  ;;  %v630_v60 = vmul.f32 %v1540_v15, %v627_v14  ;;  %1547 = vrcp.f32 %v2607_v4  ;;  %vm635_vm1 = vweird.f32 %v1540_v15  ;;  %vm598_vm5 = vmor %vm596_vm3, %vm597_vm0  ;;  %v617_v12 = vand.u32 2147483648, %v2607_v4 }
 0x140   : > { %v593_v8 = vsub.f32 1.0, %v592_v13  ;;  %v2611_v20 = vadd.f32 1.0, %v1542_v10  ;;  %1549 = vpow2.f32 %v1332_v21  ;;  %v1544_v25 = vpop.eup %1543  ;;  %v641_v10 = vor.u32 1.1754944e-38, %v640_v6  ;;  %vm636_vm6 = vmor %vm634_vm2, %vm635_vm1 }
 0x141   : > { %v631_v23 = vsub.f32 1.0, %v630_v60  ;;  %v2616_v16 = vpop.eup %1545  ;;  %v603_v21 = vor.u32 1.1754944e-38, %v602_v7  ;;  %vm611_vm8 = vweird.f32 %v2607_v4 }
 0x142   : > { %v594_v24 = vmul.f32 %v1538_v9, %v593_v8  ;;  %1551 = vrcp.f32 %v2611_v20  ;;  %v670_v8 = vmul.f32 %v2616_v16, %v2603_v22  ;;  %vm675_vm10 = vweird.f32 %v2616_v16 }
 0x143   : > { %v632_v5 = vmul.f32 %v1540_v15, %v631_v23  ;;  %1553 = vtanh.f32 %v581_v56  ;;  %v655_v56 = vand.u32 2147483648, %v2611_v20  ;;  %vm649_vm15 = vweird.f32 %v2611_v20  ;;  %vm2640_vm0 = vmor %vm674_vm14, %vm675_vm10 }
 0x144   : > { %v595_v26 = vadd.f32 %v1538_v9, %v594_v24  ;;  %v671_v11 = vsub.f32 1.0, %v670_v8 }
 0x145   : > { %v1548_v13 = vpop.eup %1547  ;;  %v633_v60 = vadd.f32 %v1540_v15, %v632_v5 }
 0x146   : > { %v599_v19 = vsel %vm598_vm5, %v1538_v9, %v595_v26  ;;  %v607_v17 = vmul.f32 %v1548_v13, %v2607_v4  ;;  %v1550_v23 = vpop.eup %1549  ;;  %v672_v9 = vmul.f32 %v2616_v16, %v671_v11  ;;  %vm612_vm9 = vweird.f32 %v1548_v13 }
 0x147   : > { %v604_v18 = vsel %vm601_vm4, %v603_v21, %v599_v19  ;;  %v637_v14 = vsel %vm636_vm6, %v1540_v15, %v633_v60  ;;  %v668_v5 = vadd.f32 1.0, %v1550_v23  ;;  %v615_v19 = vand.u32 2147483647, %v2607_v4  ;;  %vm613_vm12 = vmor %vm611_vm8, %vm612_vm9 }
 0x148   : > { %v1552_v24 = vpop.eup %1551  ;;  %v642_v6 = vsel %vm639_vm7, %v641_v10, %v637_v14  ;;  %v701_v27 = vmul.f32 %v1544_v25, %v604_v18  ;;  %v608_v7 = vsub.f32 1.0, %v607_v17  ;;  %v618_v25 = vor.u32 1.1754944e-38, %v617_v12  ;;  %v3035_v18 = vld [vmem:[#allocation104_spill] sm:$0xff] }
 0x149   : > { %v699_v28 = vmul.f32 %v1673_v2, %v642_v6  ;;  %v645_v29 = vmul.f32 %v1552_v24, %v2611_v20  ;;  %1555 = vrcp.f32 %v668_v5  ;;  %v1554_v26 = vpop.eup %1553  ;;  %v653_v21 = vand.u32 2147483647, %v2611_v20 }
 0x14a   : > { %v609_v1 = vmul.f32 %v1548_v13, %v608_v7  ;;  %v673_v60 = vadd.f32 %v2616_v16, %v672_v9  ;;  %vm650_vm11 = vweird.f32 %v1552_v24  ;;  %vm616_vm13 = vcmp.eq.f32.partialorder %v615_v19, 8.507059e+37 }
 0x14b   : > { %v2627_v2 = vadd.f32 %v701_v27, %v699_v28   ;;  %v646_v15 = vsub.f32 1.0, %v645_v29  ;;  %v680_v27 = vand.u32 2147483648, %v2603_v22  ;;  %v678_v29 = vand.u32 2147483647, %v2603_v22  ;;  %vm651_vm1 = vmor %vm649_vm15, %vm650_vm11 }
 0x14c   : > { %v610_v10 = vadd.f32 %v1548_v13, %v609_v1  ;;  %v656_v14 = vor.u32 1.1754944e-38, %v655_v56  ;;  %vm654_vm2 = vcmp.eq.f32.partialorder %v653_v21, 8.507059e+37  ;;  %vm689_vm5 = vweird.f32 %v668_v5 }
 0x14d   : > { %v647_v8 = vmul.f32 %v1552_v24, %v646_v15  ;;  %1557 = vtanh.f32 %v2627_v2  ;;  %v681_v22 = vor.u32 1.1754944e-38, %v680_v27  ;;  %vm679_vm3 = vcmp.eq.f32.partialorder %v678_v29, 8.507059e+37 }
 0x14e   : > { %v614_v28 = vsel %vm613_vm12, %v1548_v13, %v610_v10  ;;  %v677_v13 = vsel %vm2640_vm0, %v2616_v16, %v673_v60 }
 0x14f   : > { %v619_v17 = vsel %vm616_vm13, %v618_v25, %v614_v28  ;;  %v648_v23 = vadd.f32 %v1552_v24, %v647_v8  ;;  %v1556_v4 = vpop.eup %1555  ;;  %v682_v19 = vsel %vm679_vm3, %v681_v22, %v677_v13 }
 0x150   : > { %v702_v11 = vmul.f32 %v1554_v26, %v619_v17  ;;  %v685_v6 = vmul.f32 %v1556_v4, %v668_v5  ;;  %vm690_vm4 = vweird.f32 %v1556_v4  ;;  %v693_v26 = vand.u32 2147483647, %v668_v5 }
 0x151   : > { %v652_v12 = vsel %vm651_vm1, %v1552_v24, %v648_v23  ;;  %v695_v24 = vand.u32 2147483648, %v668_v5  ;;  %vm691_vm6 = vmor %vm689_vm5, %vm690_vm4 }
 0x152   : > { %v657_v7 = vsel %vm654_vm2, %v656_v14, %v652_v12  ;;  %v686_v1 = vsub.f32 1.0, %v685_v6  ;;  %vm694_vm7 = vcmp.eq.f32.partialorder %v693_v26, 8.507059e+37 }
 0x153   : > { %v1558_v20 = vpop.eup %1557  ;;  %v700_v9 = vmul.f32 %v1669_v3, %v657_v7  ;;  %v696_v21 = vor.u32 1.1754944e-38, %v695_v24 }
 0x154   : > { %v2648_v15 = vmul.f32 %v1558_v20, %v682_v19   ;;  %v687_v56 = vmul.f32 %v1556_v4, %v686_v1  ;;  %v3037_v19 = vld [vmem:[#allocation102_spill] sm:$0xff] }
 0x155   : > { %v704_v3 = vadd.f32 %v702_v11, %v700_v9   ;;  %v3036_v11 = vld [vmem:[#allocation103_spill] sm:$0xff] }
 0x156   : > { %v3034_v25 = vmov %v2648_v15  ;;  %v688_v16 = vadd.f32 %v1556_v4, %v687_v56  ;;  %v3038_v56 = vld [vmem:[#allocation100_spill] sm:$0xff] }
 0x157   : > { %1559 = vtanh.f32 %v3034_v25 }
 0x158   : > { %1561 = vtanh.f32 %v704_v3  ;;  %v692_v10 = vsel %vm691_vm6, %v1556_v4, %v688_v16 }
 0x159   : > { %v697_v28 = vsel %vm694_vm7, %v696_v21, %v692_v10 }
 0x15d   : > { %v1560_v60 = vpop.eup %1559 }
 0x15e   : > { %v1562_v8 = vpop.eup %1561  ;;  %v711_v27 = vmul.f32 %v1560_v60, %v2400_v0 }
 0x15f   : > { %v708_v7 = vmul.f32 %v1562_v8, %v697_v28   ;;  %v3040_v28 = vld [vmem:[#allocation101_spill] sm:$0xff] }
 0x160   : > { %713 = vadd.xlane.f32.xlu0 %v711_v27 }
 0x161   : > { %1563 = vtanh.f32 %v708_v7 }
 0x167   : > { %v1564_v29 = vpop.eup %1563 }
 0x168   : > { %v712_v17 = vmul.f32 %v1564_v29, %v2400_v0 }
 0x16a   : > { %715 = vadd.xlane.f32.xlu0 %v712_v17  ;;  %v3041_v17 = vld [vmem:[#allocation99_spill] sm:$0xff] }
 0x1d3   : > { %v714_v23 = vpop.xlane.xlu0 %713 }
 0x1d4   : > { %v717_v1 = vmax.f32 %v3035_v18, %v714_v23  }
 0x1d6   : > { %v719_v5 = vsub.f32 %v3035_v18, %v717_v1  ;;  %v725_v4 = vsub.f32 %v714_v23, %v717_v1  ;;  %v945_v1 = vld [vmem:[%s2811_s7 + $0x48] sm:$0xff] (%p117_p0) }
 0x1d7   :  { %962 = vmatpush.msra.mxu1 (%p117_p0), %v945_v1 }
 0x1d8   : > { %v721_v14 = vmul.f32 1.442695, %v719_v5  ;;  %v727_v13 = vmul.f32 1.442695, %v725_v4 }
 0x1da   : > { %1565 = vpow2.f32 %v721_v14 }
 0x1db   : > { %1567 = vpow2.f32 %v727_v13 }
 0x1dd   : > { %v716_v12 = vpop.xlane.xlu0 %715 }
 0x1de   : > { %v718_v5 = vmax.f32 %v3036_v11, %v716_v12  }
 0x1e0   : > { %v1566_v6 = vpop.eup %1565  ;;  %v720_v22 = vsub.f32 %v3036_v11, %v718_v5  ;;  %v726_v20 = vsub.f32 %v716_v12, %v718_v5  ;;  %v1438_v11 = vld [vmem:[%s2809_s5 + $0x38] sm:$0xff] (%p117_p0) }
 0x1e1   : > { %v1568_v9 = vpop.eup %1567  ;;  %v731_v15 = vmul.f32 %v3037_v19, %v1566_v6  ;;  %v735_v16 = vmul.f32 %v3038_v56, %v1566_v6  ;;  %842 = vmatpush.bf16.msra.mxu0 (%p117_p0), %v1438_v11  ;;  %v936_v11 = vld [vmem:[%s2811_s7] sm:$0xff] (%p117_p0) }
 0x1e2   : > { %v737_v24 = vmul.f32 %v1568_v9, %v3034_v25  ;;  %v723_v26 = vmul.f32 1.442695, %v720_v22  ;;  %v729_v10 = vmul.f32 1.442695, %v726_v20  ;;  %v1437_v22 = vld [vmem:[%s2809_s5 + $0x30] sm:$0xff] (%p117_p0) }
 0x1e3   : > { %v733_v21 = vadd.f32 %v1568_v9, %v731_v15   ;;  %v3046_v9 = vmov %v3034_v25  ;;  %v1436_v25 = vld [vmem:[%s2809_s5 + $0x28] sm:$0xff] (%p117_p0) }
 0x1e4   : > { %v2660_v6 = vadd.f32 %v737_v24, %v735_v16   ;;  %1569 = vpow2.f32 %v723_v26  ;;  %v942_v16 = vld [vmem:[%s2811_s7 + $0x30] sm:$0xff] (%p117_p0) }
 0x1e5   : > { %1571 = vpow2.f32 %v729_v10  ;;  %v3045_v13 = vmov %v733_v21  ;;  %843 = vmatpush.bf16.msra.mxu0 (%p117_p0), %v1437_v22  ;;  %vm746_vm8 = vweird.f32 (%p117_p0), %v733_v21  ;;  %v752_v0 = vand.u32 (%p117_p0), 2147483648, %v733_v21  ;;  %v941_v10 = vld [vmem:[%s2811_s7 + $0x28] sm:$0xff] (%p117_p0) }
 0x1e6   : > { %v3039_v60 = vmov %v2660_v6  ;;  %1575 = vrcp.f32 (%p117_p0), %v733_v21  ;;  %v750_v30 = vand.u32 (%p117_p0), 2147483647, %v733_v21 }
 0x1e7   : > { %v3043_v6 = vmov %v3039_v60  ;;  %v753_v36 = vor.u32 (%p117_p0), 1.1754944e-38, %v752_v0 }
 0x1e8   :  { %vm751_vm13 = vcmp.eq.f32.partialorder (%p117_p0), %v750_v30, 8.507059e+37  ;;  %v943_v6 = vld [vmem:[%s2811_s7 + $0x38] sm:$0xff] (%p117_p0) }
 0x1e9   :  { %844 = vmatpush.bf16.msra.mxu0 (%p117_p0), %v1436_v25 }
 0x1ea   : > { %v1570_v8 = vpop.eup %1569 }
 0x1eb   : > { %v1572_v27 = vpop.eup %1571  ;;  %v732_v29 = vmul.f32 %v3040_v28, %v1570_v8  ;;  %v736_v23 = vmul.f32 %v3041_v17, %v1570_v8 }
 0x1ec   : > { %v738_v18 = vmul.f32 %v1572_v27, %v708_v7  ;;  %119 = sbr.rel (!%p117_p0) target bundleno = 99 (0x63), region = 76  ;;  %v1576_v20 = vpop.eup (%p117_p0), %1575 }
 0x1ed   : > { %v734_v14 = vadd.f32 %v1572_v27, %v732_v29   ;;  %v742_v19 = vmul.f32 (%p117_p0), %v1576_v20, %v733_v21  ;;  %vm747_vm9 = vweird.f32 (%p117_p0), %v1576_v20  ;;  %845 = vmatpush.bf16.msra.mxu0 (%p117_p0), %v1435_v32  ;;  %v939_v27 = vld [vmem:[%s2811_s7 + $0x18] sm:$0xff] (%p117_p0)  ;;  %v938_v29 = vld [vmem:[%s2811_s7 + $0x10] sm:$0xff] (%p117_p0) }
 0x1ee   : > { %v740_v12 = vadd.f32 %v738_v18, %v736_v23   ;;  %vm748_vm12 = vmor (%p117_p0), %vm746_vm8, %vm747_vm9 }
 0x1ef   : > { %v3044_v15 = vmov %v734_v14  ;;  %1577 = vrcp.f32 (%p117_p0), %v734_v14  ;;  %v743_v3 = vsub.f32 (%p117_p0), 1.0, %v742_v19  ;;  %v767_v31 = vand.u32 (%p117_p0), 2147483648, %v734_v14 }
 0x1f0   : > { %v3042_v4 = vmov %v740_v12  ;;  %vm761_vm10 = vweird.f32 (%p117_p0), %v734_v14  ;;  %v765_v34 = vand.u32 (%p117_p0), 2147483647, %v734_v14 }
 0x1f1   :  { %v744_v35 = vmul.f32 %v1576_v20, %v743_v3  ;;  %v768_v39 = vor.u32 1.1754944e-38, %v767_v31  ;;  %846 = vmatpush.bf16.msra.mxu0 %v1434_v40  ;;  %v944_v4 = vld [vmem:[%s2811_s7 + $0x40] sm:$0xff] }
 0x1f2   :  { %vm766_vm15 = vcmp.eq.f32.partialorder %v765_v34, 8.507059e+37  ;;  %963 = vmatpush.msra.mxu1 %v944_v4 }
 0x1f3   :  { %v745_v38 = vadd.f32 %v1576_v20, %v744_v35 }
 0x1f4   :  { %964 = vmatpush.msra.mxu1 %v943_v6 }
 0x1f5   :  { %v1578_v9 = vpop.eup %1577  ;;  %v749_v42 = vsel %vm748_vm12, %v1576_v20, %v745_v38  ;;  %847 = vmatpush.bf16.msra.mxu0 %v1433_v47 }
 0x1f6   :  { %v757_v2 = vmul.f32 %v1578_v9, %v734_v14  ;;  %vm762_vm11 = vweird.f32 %v1578_v9  ;;  %v754_v43 = vsel %vm751_vm13, %v753_v36, %v749_v42  ;;  %965 = vmatpush.msra.mxu1 %v942_v16  ;;  %v937_v14 = vld [vmem:[%s2811_s7 + $0x8] sm:$0xff] }
 0x1f7   :  { %vm763_vm14 = vmor %vm761_vm10, %vm762_vm11  ;;  %v755_v45 = vmul.f32 %v754_v43, %v3039_v60  ;;  %v940_v60 = vld [vmem:[%s2811_s7 + $0x20] sm:$0xff] }
 0x1f8   :  { %v758_v33 = vsub.f32 1.0, %v757_v2  ;;  %966 = vmatpush.msra.mxu1 %v941_v10 }
 0x1f9   :  { %1579 = vtanh.f32 %v755_v45  ;;  %848 = vmatpush.bf16.msra.mxu0 %v1432_v49 }
 0x1fa   :  { %v759_v37 = vmul.f32 %v1578_v9, %v758_v33  ;;  %967 = vmatpush.msra.mxu1 %v940_v60 }
 0x1fc   :  { %v760_v41 = vadd.f32 %v1578_v9, %v759_v37  ;;  %968 = vmatpush.msra.mxu1 %v939_v27 }
 0x1fd   :  { %849 = vmatpush.bf16.msra.mxu0 %v1431_v52 }
 0x1fe   :  { %v764_v44 = vsel %vm763_vm14, %v1578_v9, %v760_v41  ;;  %969 = vmatpush.msra.mxu1 %v938_v29 }
 0x1ff   :  { %v769_v46 = vsel %vm766_vm15, %v768_v39, %v764_v44  ;;  %v1580_v50 = vpop.eup %1579 }
 0x200   :  { %v770_v48 = vmul.f32 %v769_v46, %v740_v12  ;;  %970 = vmatpush.msra.mxu1 %v937_v14  ;;  %v981_v14 = vlaneseq }
 0x202   :  { %1581 = vtanh.f32 %v770_v48  ;;  %971 = vmatpush.msra.mxu1 %v936_v11 }
 0x208   :  { %v1582_v51 = vpop.eup %1581 }
 0x209   :  { %v773_v53 = vpack.c.bf16 %v1582_v51, %v1580_v50 }
 0x20b   :  { %850 = vmatmul.bf16.vlgmr.msra.gmra.mxu0 %v773_v53 }
 0x288   :  { %v851_v62 = vpop.f32.mrf.mxu0 }
 0x289   :  { %v2736_v7 = vadd.f32 %v1573_v59, %v851_v62 }
 0x28b   :  { %v2742_v5 = vmul.f32 0.70710677, %v2736_v7  ;;  %v856_v16 = vmul.f32 0.5, %v2736_v7  ;;  %v1574_v7 = vld [vmem:[%s2812_s8] ss:$0 sm:$0xff] }
 0x28d   :  { %v864_v13 = vand.u32 2147483647, %v2742_v5  ;;  %vm860_vm8 = vcmp.ge.f32.partialorder %v2742_v5, 0.0 }
 0x28f   :  { %v866_v15 = vmul.f32 0.3275911, %v864_v13  ;;  %v918_v30 = vsub.f32 0.0, %v864_v13 }
 0x290   :  { %v853_v56 = vpop.f32.mrf.mxu0 }
 0x291   :  { %v868_v24 = vadd.f32 1.0, %v866_v15  ;;  %v2754_v26 = vadd.f32 %v1573_v59, %v853_v56  ;;  %v920_v38 = vmul.f32 %v918_v30, %v864_v13  ;;  %v1687_v13 = vmov -1.0  }
 0x292   :  { %v862_v6 = vsel %vm860_vm8, 1.0, %v1687_v13 }
 0x293   :  { %1583 = vrcp.f32 %v868_v24  ;;  %v2760_v21 = vmul.f32 0.70710677, %v2754_v26  ;;  %v881_v22 = vand.u32 2147483648, %v868_v24  ;;  %v879_v25 = vand.u32 2147483647, %v868_v24 }
 0x294   :  { %vm875_vm1 = vweird.f32 %v868_v24  ;;  %v922_v44 = vmul.f32 1.442695, %v920_v38  ;;  %v1008_v38 = vld [vmem:[%s2813_s9] sm:$0xff] }
 0x295   :  { %v865_v8 = vand.u32 2147483647, %v2760_v21  ;;  %v882_v0 = vor.u32 1.1754944e-38, %v881_v22  ;;  %vm880_vm3 = vcmp.eq.f32.partialorder %v879_v25, 8.507059e+37  ;;  %vm861_vm9 = vcmp.ge.f32.partialorder %v2760_v21, 0.0 }
 0x297   :  { %v867_v28 = vmul.f32 0.3275911, %v865_v8  ;;  %v919_v45 = vsub.f32 0.0, %v865_v8 }
 0x299   :  { %v1584_v17 = vpop.eup %1583  ;;  %v869_v23 = vadd.f32 1.0, %v867_v28  ;;  %v921_v51 = vmul.f32 %v919_v45, %v865_v8  ;;  %v863_v28 = vsel %vm861_vm9, 1.0, %v1687_v13 }
 0x29a   :  { %v871_v18 = vmul.f32 %v1584_v17, %v868_v24  ;;  %vm876_vm0 = vweird.f32 %v1584_v17 }
 0x29b   :  { %1585 = vrcp.f32 %v869_v23  ;;  %vm877_vm2 = vmor %vm875_vm1, %vm876_vm0  ;;  %v896_v34 = vand.u32 2147483648, %v869_v23  ;;  %v894_v37 = vand.u32 2147483647, %v869_v23  ;;  %vm890_vm5 = vweird.f32 %v869_v23 }
 0x29c   :  { %v872_v12 = vsub.f32 1.0, %v871_v18  ;;  %1587 = vpow2.f32 %v922_v44  ;;  %v924_v57 = vmul.f32 1.442695, %v921_v51  ;;  %v1009_v44 = vld [vmem:[%s2813_s9 + $0x8] sm:$0xff] }
 0x29d   :  { %v897_v41 = vor.u32 1.1754944e-38, %v896_v34  ;;  %vm895_vm7 = vcmp.eq.f32.partialorder %v894_v37, 8.507059e+37 }
 0x29e   :  { %v873_v20 = vmul.f32 %v1584_v17, %v872_v12  ;;  %1589 = vpow2.f32 %v924_v57  ;;  %v982_v12 = vand.u32 127, %v981_v14 }
 0x2a0   :  { %v874_v9 = vadd.f32 %v1584_v17, %v873_v20  ;;  %vm983_vm10 = vcmp.lt.s32.totalorder %v982_v12, 2 }
 0x2a1   :  { %v1586_v19 = vpop.eup %1585 }
 0x2a2   :  { %v886_v2 = vmul.f32 %v1586_v19, %v869_v23  ;;  %v878_v3 = vsel %vm877_vm2, %v1584_v17, %v874_v9  ;;  %vm891_vm4 = vweird.f32 %v1586_v19  ;;  %v1588_v61 = vpop.eup %1587  ;;  %v857_v17 = vmul.f32 0.5, %v2754_v26 }
 0x2a3   :  { %v883_v31 = vsel %vm880_vm3, %v882_v0, %v878_v3  ;;  %vm892_vm6 = vmor %vm890_vm5, %vm891_vm4 }
 0x2a4   :  { %v887_v32 = vsub.f32 1.0, %v886_v2  ;;  %v900_v33 = vmul.f32 1.0614054, %v883_v31  ;;  %v1590_v60 = vpop.eup %1589 }
 0x2a6   :  { %v902_v35 = vadd.f32 -1.4531521, %v900_v33  ;;  %v888_v36 = vmul.f32 %v1586_v19, %v887_v32 }
 0x2a8   :  { %v904_v39 = vmul.f32 %v902_v35, %v883_v31  ;;  %v889_v40 = vadd.f32 %v1586_v19, %v888_v36 }
 0x2aa   :  { %v906_v42 = vadd.f32 1.4214138, %v904_v39  ;;  %v893_v43 = vsel %vm892_vm6, %v1586_v19, %v889_v40 }
 0x2ab   :  { %v898_v46 = vsel %vm895_vm7, %v897_v41, %v893_v43 }
 0x2ac   :  { %v908_v47 = vmul.f32 %v906_v42, %v883_v31  ;;  %v901_v48 = vmul.f32 1.0614054, %v898_v46 }
 0x2ae   :  { %v910_v49 = vadd.f32 -0.28449672, %v908_v47  ;;  %v903_v50 = vadd.f32 -1.4531521, %v901_v48 }
 0x2b0   :  { %v912_v52 = vmul.f32 %v910_v49, %v883_v31  ;;  %v905_v53 = vmul.f32 %v903_v50, %v898_v46 }
 0x2b2   :  { %v914_v54 = vadd.f32 0.2548296, %v912_v52  ;;  %v907_v55 = vadd.f32 1.4214138, %v905_v53 }
 0x2b4   :  { %v916_v58 = vmul.f32 %v914_v54, %v883_v31  ;;  %v909_v59 = vmul.f32 %v907_v55, %v898_v46 }
 0x2b6   :  { %v926_v62 = vmul.f32 %v1588_v61, %v916_v58  ;;  %v911_v63 = vadd.f32 -0.28449672, %v909_v59 }
 0x2b8   :  { %v928_v1 = vsub.f32 1.0, %v926_v62  ;;  %v913_v4 = vmul.f32 %v911_v63, %v898_v46 }
 0x2ba   :  { %v930_v15 = vmul.f32 %v928_v1, %v862_v6  ;;  %v915_v56 = vadd.f32 0.2548296, %v913_v4 }
 0x2bc   :  { %v932_v24 = vadd.f32 1.0, %v930_v15  ;;  %v917_v10 = vmul.f32 %v915_v56, %v898_v46 }
 0x2be   :  { %v934_v8 = vmul.f32 %v932_v24, %v856_v16  ;;  %v927_v27 = vmul.f32 %v1590_v60, %v917_v10 }
 0x2c0   :  { %972 = vmatmul.f32.vlgmr.msra.gmra.mxu1 %v934_v8  ;;  %v929_v5 = vsub.f32 1.0, %v927_v27 }
 0x2c2   :  { %v931_v29 = vmul.f32 %v929_v5, %v863_v28 }
 0x2c4   :  { %v933_v23 = vadd.f32 1.0, %v931_v29 }
 0x2c6   :  { %v935_v18 = vmul.f32 %v933_v23, %v857_v17 }
 0x2c8   :  { %975 = vmatmul.f32.gmra.mxu1 %v935_v18 }
 0x33d   :  { %v973_v11 = vpop.f32.mrf.mxu1 }
 0x33e   :  { %v974_v21 = vadd.f32 %v1574_v7, %v973_v11 }
 0x340   :  { %979 = vst [vmem:[%s2815_s11] sm:$0xff] %v974_v21  ;;  %v984_v22 = vsel %vm983_vm10, %v974_v21, -1e+30 }
 0x341   :  { %986 = vmax.xlane.f32.xlu0 %v984_v22 }
 0x345   :  { %v976_v26 = vpop.f32.mrf.mxu1 }
 0x346   :  { %v977_v20 = vadd.f32 %v1574_v7, %v976_v26 }
 0x348   :  { %980 = vst [vmem:[%s2815_s11 + $0x8] sm:$0xff] %v977_v20  ;;  %v985_v25 = vsel %vm983_vm10, %v977_v20, -1e+30 }
 0x349   :  { %988 = vmax.xlane.f32.xlu0 %v985_v25 }
 0x3b4   :  { %v987_v9 = vpop.xlane.xlu0 %986 }
 0x3b5   :  { %v990_v19 = vsub.f32 %v984_v22, %v987_v9 }
 0x3b7   :  { %v992_v0 = vmul.f32 1.442695, %v990_v19 }
 0x3b9   :  { %1591 = vpow2.f32 %v992_v0 }
 0x3bc   :  { %v989_v2 = vpop.xlane.xlu0 %988 }
 0x3bd   :  { %v991_v3 = vsub.f32 %v985_v25, %v989_v2 }
 0x3bf   :  { %v1592_v30 = vpop.eup %1591  ;;  %v994_v31 = vmul.f32 1.442695, %v991_v3 }
 0x3c0   :  { %996 = vadd.xlane.f32.xlu1 %v1592_v30 }
 0x3c1   :  { %1593 = vpow2.f32 %v994_v31 }
 0x3c7   :  { %v1594_v32 = vpop.eup %1593 }
 0x3c8   :  { %998 = vadd.xlane.f32.xlu1 %v1594_v32 }
 0x433   :  { %v997_v33 = vpop.xlane.xlu1 %996 }
 0x434   :  { %1595 = vlog2.f32 %v997_v33 }
 0x43a   :  { %v1596_v34 = vpop.eup %1595 }
 0x43b   :  { %v1001_v35 = vmul.f32 0.6931472, %v1596_v34  ;;  %v999_v36 = vpop.xlane.xlu1 %998 }
 0x43c   :  { %1597 = vlog2.f32 %v999_v36 }
 0x43d   :  { %v1004_v37 = vsub.f32 %v990_v19, %v1001_v35 }
 0x43f   :  { %v1006_v39 = vsel %vm983_vm10, %v1004_v37, 0.0 }
 0x440   :  { %v1010_v40 = vmul.f32 %v1008_v38, %v1006_v39 }
 0x442   :  { %v1598_v41 = vpop.eup %1597  ;;  %1012 = vadd.xlane.f32.xlu2 %v1010_v40 }
 0x443   :  { %v1003_v42 = vmul.f32 0.6931472, %v1598_v41 }
 0x445   :  { %v1005_v43 = vsub.f32 %v991_v3, %v1003_v42 }
 0x447   :  { %v1007_v45 = vsel %vm983_vm10, %v1005_v43, 0.0 }
 0x448   :  { %v1011_v46 = vmul.f32 %v1009_v44, %v1007_v45 }
 0x44a   :  { %1014 = vadd.xlane.f32.xlu2 %v1011_v46 }
 0x4b5   :  { %v1013_v47 = vpop.xlane.xlu2 %1012 }
 0x4b6   :  { %v1016_v48 = vsub.f32 0.0, %v1013_v47 }
 0x4b8   :  { %1018 = vst [vmem:[%s2814_s10] sm:$0xff] %v1016_v48 }
 0x4bd   :  { %v1015_v49 = vpop.xlane.xlu2 %1014 }
 0x4be   :  { %v1017_v50 = vsub.f32 0.0, %v1015_v49 }
 0x4c0   :  { %1019 = vst [vmem:[%s2814_s10 + $0x8] sm:$0xff] %v1017_v50 }

</bundles_post_ra>
